<compile_context>
chip_gen: v7x
topology: tpu7x:2x2x1
jax: 0.10.0
libtpu: 0.0.40
codegen_flags: <defaults>
</compile_context>

<pallas_src>
import functools

import jax
import jax.numpy as jnp
from jax.experimental import pallas as pl
from jax.experimental.pallas import tpu as pltpu

XPROJ_DTYPE = jnp.bfloat16  # HBM storage dtype of the precomputed input projection.


def _convlstm_seq_kernel(xprojT_ref, whT_ref, yidx_ref, xidx_ref,
                         hseqT_ref, clastT_ref, patch_ref,
                         *, KH, KW, H, W, Chid):
    """Whole-sequence ConvLSTM recurrence for one batch element (one grid step).

    Transposed layout: channels on sublanes, flattened H*W on lanes.

    xprojT_ref : (1, T, 4*Chid, H*W)   precomputed conv(x_t, W_x) + bias    (bf16)
    whT_ref    : (4*Chid, KH*KW*Chid)  transposed im2col recurrent weight   (f32)
    yidx_ref   : (Chid, H*W)           row index of each lane position      (int32)
    xidx_ref   : (Chid, H*W)           col index of each lane position      (int32)
    hseqT_ref  : (1, T, Chid, H*W)     per-timestep hidden-state output     (f32)
    clastT_ref : (1, Chid, H*W)        final cell-state output              (f32)
    patch_ref  : (KH*KW*Chid, H*W)     im2col patch^T scratch               (f32)
    """
    HW = H * W
    T = xprojT_ref.shape[1]
    ph, pw = KH // 2, KW // 2
    taps = [(ky - ph, kx - pw) for ky in range(KH) for kx in range(KW)]

    def step(t, carry):
        h, c = carry
        yv = yidx_ref[...]
        xv = xidx_ref[...]

        # Roll-based im2col: tap (dy, dx) of the "same" conv is a lane rotation of h
        # by dy*W + dx plus a boundary mask; each tap is a full-lane-width (Chid, HW)
        # store into patch^T at a (8,128)-tile-aligned sublane offset.
        for idx, (dy, dx) in enumerate(taps):
            s = dy * W + dx
            rolled = h if s == 0 else pltpu.roll(h, (-s) % HW, axis=1)
            mask = None
            if dy > 0:
                mask = yv < (H - dy)
            elif dy < 0:
                mask = yv >= (-dy)
            if dx > 0:
                mx = xv < (W - dx)
                mask = mx if mask is None else jnp.logical_and(mask, mx)
            elif dx < 0:
                mx = xv >= (-dx)
                mask = mx if mask is None else jnp.logical_and(mask, mx)
            tap = rolled if mask is None else jnp.where(mask, rolled, 0.0)
            patch_ref[idx * Chid:(idx + 1) * Chid, :] = tap

        # gates pre-activation = x-projection (bias folded in) + W_h^T @ patch^T.
        # M=4*Chid, K=KH*KW*Chid, N=H*W (N=256 fills the 256-wide MXU on v6e/v7x).
        gates = (xprojT_ref[0, t].astype(jnp.float32)
                 + jnp.dot(whT_ref[...], patch_ref[...],
                           preferred_element_type=jnp.float32))

        # torch.split order along the channel (sublane) axis is (i, f, o, g).
        # Per-gate slices are whole-tile aligned (Chid multiple of 8), so each
        # activation runs only on the gate that needs it (EUP slot).
        ig = jax.nn.sigmoid(gates[0 * Chid:1 * Chid])
        fg = jax.nn.sigmoid(gates[1 * Chid:2 * Chid])
        og = jax.nn.sigmoid(gates[2 * Chid:3 * Chid])
        gg = jnp.tanh(gates[3 * Chid:4 * Chid])

        c_next = fg * c + ig * gg
        h_next = og * jnp.tanh(c_next)

        # Full-lane-width store of this timestep's hidden state.
        hseqT_ref[0, t] = h_next
        return h_next, c_next

    zeros = jnp.zeros((Chid, HW), jnp.float32)
    _, c_last = jax.lax.fori_loop(0, T, step, (zeros, zeros))
    clastT_ref[0] = c_last


def _convlstm_layer_recurrence(xprojT, whT, y_idx, x_idx, *, H, W, Chid, KH, KW):
    """xprojT: (B, T, 4*Chid, H*W) bf16;  whT: (4*Chid, KH*KW*Chid) f32."""
    B, T, C4, HW = xprojT.shape
    assert C4 == 4 * Chid and HW == H * W
    K = KH * KW * Chid

    kernel = functools.partial(_convlstm_seq_kernel,
                               KH=KH, KW=KW, H=H, W=W, Chid=Chid)

    # VMEM budget per grid step (double-buffered): xprojT ~1 MiB, hseqT ~0.5 MiB,
    # weight/indices/patch well under 1 MiB -> far below the limit on v5e/v6e/v7x.
    # TODO(synk): for much larger T/H/W, chunk T in the BlockSpecs (v7x has 64 MiB).
    hseqT, clastT = pl.pallas_call(
        kernel,
        out_shape=(jax.ShapeDtypeStruct((B, T, Chid, HW), jnp.float32),
                   jax.ShapeDtypeStruct((B, Chid, HW), jnp.float32)),
        grid_spec=pltpu.PrefetchScalarGridSpec(
            num_scalar_prefetch=0,
            grid=(B,),
            in_specs=[
                pl.BlockSpec((1, T, C4, HW), lambda b: (b, 0, 0, 0)),
                pl.BlockSpec((C4, K), lambda b: (0, 0)),        # VMEM-resident weight
                pl.BlockSpec((Chid, HW), lambda b: (0, 0)),
                pl.BlockSpec((Chid, HW), lambda b: (0, 0)),
            ],
            out_specs=[
                pl.BlockSpec((1, T, Chid, HW), lambda b: (b, 0, 0, 0)),
                pl.BlockSpec((1, Chid, HW), lambda b: (b, 0, 0)),
            ],
            scratch_shapes=[pltpu.VMEM((K, HW), jnp.float32)],   # im2col patch^T
        ),
        compiler_params=pltpu.CompilerParams(
            dimension_semantics=("parallel",)),  # one batch element per TC on v7x
    )(xprojT, whT, y_idx, x_idx)
    return hseqT, clastT


def convlstm_block_forward(x, params):
    """ConvLSTMBlock.forward (batch_first=True, return_all_layers=False).

    x      : (B, T, H, W, Cin) f32
    params : list of (weight (KH, KW, Cin_l + Chid, 4*Chid) HWIO, bias (4*Chid,))
    returns: layer_output (B, T, H, W, Chid_last), (h_last, c_last)
    """
    B, T, H, W, _ = x.shape
    HW = H * W
    cur = x
    last_state = None
    for (w, bvec) in params:
        KH, KW, cin_tot, C4 = w.shape
        Chid = C4 // 4
        Cin = cin_tot - Chid
        ph, pw = KH // 2, KW // 2
        # TODO(synk): only "same" padding / stride 1 is implemented (as the module
        # docstring states); other padding/stride configs are not supported here.

        # Non-recurrent input projection, batched over all B*T frames at once.
        # bf16 operands (MXU-native) with f32 accumulation; bias folded in.
        w_x = w[:, :, :Cin, :]
        xproj = jax.lax.conv_general_dilated(
            cur.reshape(B * T, H, W, Cin).astype(jnp.bfloat16),
            w_x.astype(jnp.bfloat16),
            window_strides=(1, 1), padding=((ph, ph), (pw, pw)),
            dimension_numbers=("NHWC", "HWIO", "NHWC"),
            preferred_element_type=jnp.float32) + bvec
        # Transposed (channels-on-sublanes, space-on-lanes) bf16 stream for the kernel.
        xprojT = (xproj.reshape(B, T, HW, C4)
                  .transpose(0, 1, 3, 2).astype(XPROJ_DTYPE))

        # Recurrent weight in transposed im2col layout: (4*Chid, KH*KW*Chid).
        w_h = w[:, :, Cin:, :].reshape(KH * KW * Chid, C4)
        whT = jnp.transpose(w_h, (1, 0)).astype(jnp.float32)

        # Per-lane (row, col) coordinates of the flattened spatial axis; computed
        # outside the kernel so Mosaic never has to lower vector integer div/mod.
        lane = jnp.arange(HW, dtype=jnp.int32)
        y_idx = jnp.broadcast_to((lane // W)[None, :], (Chid, HW))
        x_idx = jnp.broadcast_to((lane % W)[None, :], (Chid, HW))

        # Recurrent part: one fused Pallas kernel over the whole sequence.
        hseqT, clastT = _convlstm_layer_recurrence(
            xprojT, whT, y_idx, x_idx, H=H, W=W, Chid=Chid, KH=KH, KW=KW)

        cur = hseqT.transpose(0, 1, 3, 2).reshape(B, T, H, W, Chid)
        last_state = (cur[:, -1], clastT.transpose(0, 2, 1).reshape(B, H, W, Chid))
    return cur, last_state


def _reference_forward(x, params):
    """Pure-JAX f32 reference of ConvLSTMBlock.forward (for a sanity check)."""
    B, T, H, W, _ = x.shape
    cur = x
    last = None
    for (w, bvec) in params:
        KH, KW, _, C4 = w.shape
        Chid = C4 // 4
        ph, pw = KH // 2, KW // 2
        h = jnp.zeros((B, H, W, Chid), jnp.float32)
        c = jnp.zeros((B, H, W, Chid), jnp.float32)
        outs = []
        for t in range(T):
            comb = jnp.concatenate([cur[:, t], h], axis=-1)
            conv = jax.lax.conv_general_dilated(
                comb, w, (1, 1), ((ph, ph), (pw, pw)),
                dimension_numbers=("NHWC", "HWIO", "NHWC")) + bvec
            i = jax.nn.sigmoid(conv[..., 0 * Chid:1 * Chid])
            f = jax.nn.sigmoid(conv[..., 1 * Chid:2 * Chid])
            o = jax.nn.sigmoid(conv[..., 2 * Chid:3 * Chid])
            g = jnp.tanh(conv[..., 3 * Chid:4 * Chid])
            c = f * c + i * g
            h = o * jnp.tanh(c)
            outs.append(h)
        cur = jnp.stack(outs, axis=1)
        last = (h, c)
    return cur, last


def init_params(key, input_dim, hidden_dims, kernel_sizes):
    """Deterministic Conv2d-style init per layer (HWIO layout)."""
    params = []
    cur_in = input_dim
    for li, (hd, (kh, kw)) in enumerate(zip(hidden_dims, kernel_sizes)):
        cin_tot = cur_in + hd
        kw_key, kb_key = jax.random.split(jax.random.fold_in(key, li))
        fan_in = cin_tot * kh * kw
        bound = 1.0 / jnp.sqrt(fan_in)
        w = jax.random.uniform(kw_key, (kh, kw, cin_tot, 4 * hd),
                               jnp.float32, -bound, bound)
        b = jax.random.uniform(kb_key, (4 * hd,), jnp.float32, -bound, bound)
        params.append((w, b))
        cur_in = hd
    return params


if __name__ == "__main__":
    # ConvLSTMBlock(input_dim=4, hidden_dim=32, kernel_size=(3,3), num_layers=2,
    #               padding=1, stride=1, batch_first=True, bias=True,
    #               return_all_layers=False)
    B, T, Cin, H, W = 2, 8, 4, 16, 16
    hidden_dims = [32, 32]
    kernel_sizes = [(3, 3), (3, 3)]

    key = jax.random.PRNGKey(0)
    xkey, pkey = jax.random.split(key)
    x = jax.random.normal(xkey, (B, T, H, W, Cin), jnp.float32)
    params = init_params(pkey, Cin, hidden_dims, kernel_sizes)

    fwd = jax.jit(lambda xx: convlstm_block_forward(xx, params))
    layer_output, (h_last, c_last) = fwd(x)
    jax.block_until_ready((layer_output, h_last, c_last))

    assert layer_output.shape == (B, T, H, W, hidden_dims[-1])
    assert h_last.shape == (B, H, W, hidden_dims[-1])
    assert c_last.shape == (B, H, W, hidden_dims[-1])

    # Numerical sanity check vs. a pure-JAX f32 reference (tolerance covers the bf16
    # feedforward projection; the recurrent path is f32).
    ref_out, (ref_h, ref_c) = jax.jit(lambda xx: _reference_forward(xx, params))(x)
    max_err = max(float(jnp.max(jnp.abs(layer_output - ref_out))),
                  float(jnp.max(jnp.abs(h_last - ref_h))),
                  float(jnp.max(jnp.abs(c_last - ref_c))))
    assert max_err < 0.1, f"max abs error vs reference: {max_err}"

    print("KERNEL_OK")
</pallas_src>

<mosaic_0001>
module attributes {stable_mosaic.version = 11 : i64} {
  func.func @_convlstm_seq_kernel(%arg0: i32, %arg1: memref<1x8x128x256xbf16, #tpu.memory_space<vmem>>, %arg2: memref<128x288xf32, #tpu.memory_space<vmem>>, %arg3: memref<32x256xi32, #tpu.memory_space<vmem>>, %arg4: memref<32x256xi32, #tpu.memory_space<vmem>>, %arg5: memref<1x8x32x256xf32, #tpu.memory_space<vmem>>, %arg6: memref<1x32x256xf32, #tpu.memory_space<vmem>>, %arg7: memref<288x256xf32, #tpu.memory_space<vmem>>) attributes {dimension_semantics = [#tpu.dimension_semantics<parallel>], iteration_bounds = array<i64: 2>, scalar_prefetch = 0 : i64, scratch_operands = 1 : i64, tpu.core_type = #tpu.core_type<tc>, window_params = [{transform_indices = @transform_0, window_bounds = array<i64: 1, 8, 128, 256>}, {pipeline_mode = #tpu.pipeline_mode<synchronous>, transform_indices = @transform_1, window_bounds = array<i64: 128, 288>}, {pipeline_mode = #tpu.pipeline_mode<synchronous>, transform_indices = @transform_2, window_bounds = array<i64: 32, 256>}, {pipeline_mode = #tpu.pipeline_mode<synchronous>, transform_indices = @transform_3, window_bounds = array<i64: 32, 256>}, {transform_indices = @transform_4, window_bounds = array<i64: 1, 8, 32, 256>}, {transform_indices = @transform_5, window_bounds = array<i64: 1, 32, 256>}]} {
    %cst = arith.constant 0.000000e+00 : f32
    %0 = vector.broadcast %cst : f32 to vector<32x256xf32>
    %c0_i32 = arith.constant 0 : i32
    %c8_i32 = arith.constant 8 : i32
    %1 = arith.addi %c0_i32, %c8_i32 : i32
    %c1_i32 = arith.constant 1 : i32
    %2:2 = scf.for %arg8 = %c0_i32 to %1 step %c1_i32 iter_args(%arg9 = %0, %arg10 = %0) -> (vector<32x256xf32>, vector<32x256xf32>)  : i32 {
      %c0_3 = arith.constant 0 : index
      %c0_4 = arith.constant 0 : index
      %6 = vector.load %arg3[%c0_3, %c0_4] : memref<32x256xi32, #tpu.memory_space<vmem>>, vector<32x256xi32>
      %c0_5 = arith.constant 0 : index
      %c0_6 = arith.constant 0 : index
      %7 = vector.load %arg4[%c0_5, %c0_6] : memref<32x256xi32, #tpu.memory_space<vmem>>, vector<32x256xi32>
      %c17_i32 = arith.constant 17 : i32
      %8 = tpu.dynamic_rotate %arg9 by %c17_i32 dim 1 : vector<32x256xf32>, i32 -> vector<32x256xf32>
      %c1_i32_7 = arith.constant 1 : i32
      %9 = vector.broadcast %c1_i32_7 : i32 to vector<32x256xi32>
      %10 = arith.cmpi sge, %6, %9 : vector<32x256xi32>
      %c1_i32_8 = arith.constant 1 : i32
      %11 = vector.broadcast %c1_i32_8 : i32 to vector<32x256xi32>
      %12 = arith.cmpi sge, %7, %11 : vector<32x256xi32>
      %13 = arith.andi %10, %12 : vector<32x256xi1>
      %cst_9 = arith.constant 0.000000e+00 : f32
      %14 = vector.broadcast %cst_9 : f32 to vector<32x256xf32>
      %15 = arith.select %13, %8, %14 : vector<32x256xi1>, vector<32x256xf32>
      %c0_10 = arith.constant 0 : index
      %c0_11 = arith.constant 0 : index
      %16 = vector.load %arg7[%c0_10, %c0_11] : memref<288x256xf32, #tpu.memory_space<vmem>>, vector<32x256xf32>
      tpu.vector_store %arg7[%c0_10, %c0_11], %15 {strides = array<i32>} : memref<288x256xf32, #tpu.memory_space<vmem>>, vector<32x256xf32>,
      %c16_i32 = arith.constant 16 : i32
      %17 = tpu.dynamic_rotate %arg9 by %c16_i32 dim 1 : vector<32x256xf32>, i32 -> vector<32x256xf32>
      %c1_i32_12 = arith.constant 1 : i32
      %18 = vector.broadcast %c1_i32_12 : i32 to vector<32x256xi32>
      %19 = arith.cmpi sge, %6, %18 : vector<32x256xi32>
      %cst_13 = arith.constant 0.000000e+00 : f32
      %20 = vector.broadcast %cst_13 : f32 to vector<32x256xf32>
      %21 = arith.select %19, %17, %20 : vector<32x256xi1>, vector<32x256xf32>
      %c32 = arith.constant 32 : index
      %c0_14 = arith.constant 0 : index
      %22 = vector.load %arg7[%c32, %c0_14] : memref<288x256xf32, #tpu.memory_space<vmem>>, vector<32x256xf32>
      tpu.vector_store %arg7[%c32, %c0_14], %21 {strides = array<i32>} : memref<288x256xf32, #tpu.memory_space<vmem>>, vector<32x256xf32>,
      %c15_i32 = arith.constant 15 : i32
      %23 = tpu.dynamic_rotate %arg9 by %c15_i32 dim 1 : vector<32x256xf32>, i32 -> vector<32x256xf32>
      %c1_i32_15 = arith.constant 1 : i32
      %24 = vector.broadcast %c1_i32_15 : i32 to vector<32x256xi32>
      %25 = arith.cmpi sge, %6, %24 : vector<32x256xi32>
      %c15_i32_16 = arith.constant 15 : i32
      %26 = vector.broadcast %c15_i32_16 : i32 to vector<32x256xi32>
      %27 = arith.cmpi slt, %7, %26 : vector<32x256xi32>
      %28 = arith.andi %25, %27 : vector<32x256xi1>
      %cst_17 = arith.constant 0.000000e+00 : f32
      %29 = vector.broadcast %cst_17 : f32 to vector<32x256xf32>
      %30 = arith.select %28, %23, %29 : vector<32x256xi1>, vector<32x256xf32>
      %c64 = arith.constant 64 : index
      %c0_18 = arith.constant 0 : index
      %31 = vector.load %arg7[%c64, %c0_18] : memref<288x256xf32, #tpu.memory_space<vmem>>, vector<32x256xf32>
      tpu.vector_store %arg7[%c64, %c0_18], %30 {strides = array<i32>} : memref<288x256xf32, #tpu.memory_space<vmem>>, vector<32x256xf32>,
      %c1_i32_19 = arith.constant 1 : i32
      %32 = tpu.dynamic_rotate %arg9 by %c1_i32_19 dim 1 : vector<32x256xf32>, i32 -> vector<32x256xf32>
      %c1_i32_20 = arith.constant 1 : i32
      %33 = vector.broadcast %c1_i32_20 : i32 to vector<32x256xi32>
      %34 = arith.cmpi sge, %7, %33 : vector<32x256xi32>
      %cst_21 = arith.constant 0.000000e+00 : f32
      %35 = vector.broadcast %cst_21 : f32 to vector<32x256xf32>
      %36 = arith.select %34, %32, %35 : vector<32x256xi1>, vector<32x256xf32>
      %c96 = arith.constant 96 : index
      %c0_22 = arith.constant 0 : index
      %37 = vector.load %arg7[%c96, %c0_22] : memref<288x256xf32, #tpu.memory_space<vmem>>, vector<32x256xf32>
      tpu.vector_store %arg7[%c96, %c0_22], %36 {strides = array<i32>} : memref<288x256xf32, #tpu.memory_space<vmem>>, vector<32x256xf32>,
      %c128 = arith.constant 128 : index
      %c0_23 = arith.constant 0 : index
      %38 = vector.load %arg7[%c128, %c0_23] : memref<288x256xf32, #tpu.memory_space<vmem>>, vector<32x256xf32>
      tpu.vector_store %arg7[%c128, %c0_23], %arg9 {strides = array<i32>} : memref<288x256xf32, #tpu.memory_space<vmem>>, vector<32x256xf32>,
      %c255_i32 = arith.constant 255 : i32
      %39 = tpu.dynamic_rotate %arg9 by %c255_i32 dim 1 : vector<32x256xf32>, i32 -> vector<32x256xf32>
      %c15_i32_24 = arith.constant 15 : i32
      %40 = vector.broadcast %c15_i32_24 : i32 to vector<32x256xi32>
      %41 = arith.cmpi slt, %7, %40 : vector<32x256xi32>
      %cst_25 = arith.constant 0.000000e+00 : f32
      %42 = vector.broadcast %cst_25 : f32 to vector<32x256xf32>
      %43 = arith.select %41, %39, %42 : vector<32x256xi1>, vector<32x256xf32>
      %c160 = arith.constant 160 : index
      %c0_26 = arith.constant 0 : index
      %44 = vector.load %arg7[%c160, %c0_26] : memref<288x256xf32, #tpu.memory_space<vmem>>, vector<32x256xf32>
      tpu.vector_store %arg7[%c160, %c0_26], %43 {strides = array<i32>} : memref<288x256xf32, #tpu.memory_space<vmem>>, vector<32x256xf32>,
      %c241_i32 = arith.constant 241 : i32
      %45 = tpu.dynamic_rotate %arg9 by %c241_i32 dim 1 : vector<32x256xf32>, i32 -> vector<32x256xf32>
      %c15_i32_27 = arith.constant 15 : i32
      %46 = vector.broadcast %c15_i32_27 : i32 to vector<32x256xi32>
      %47 = arith.cmpi slt, %6, %46 : vector<32x256xi32>
      %c1_i32_28 = arith.constant 1 : i32
      %48 = vector.broadcast %c1_i32_28 : i32 to vector<32x256xi32>
      %49 = arith.cmpi sge, %7, %48 : vector<32x256xi32>
      %50 = arith.andi %47, %49 : vector<32x256xi1>
      %cst_29 = arith.constant 0.000000e+00 : f32
      %51 = vector.broadcast %cst_29 : f32 to vector<32x256xf32>
      %52 = arith.select %50, %45, %51 : vector<32x256xi1>, vector<32x256xf32>
      %c192 = arith.constant 192 : index
      %c0_30 = arith.constant 0 : index
      %53 = vector.load %arg7[%c192, %c0_30] : memref<288x256xf32, #tpu.memory_space<vmem>>, vector<32x256xf32>
      tpu.vector_store %arg7[%c192, %c0_30], %52 {strides = array<i32>} : memref<288x256xf32, #tpu.memory_space<vmem>>, vector<32x256xf32>,
      %c240_i32 = arith.constant 240 : i32
      %54 = tpu.dynamic_rotate %arg9 by %c240_i32 dim 1 : vector<32x256xf32>, i32 -> vector<32x256xf32>
      %c15_i32_31 = arith.constant 15 : i32
      %55 = vector.broadcast %c15_i32_31 : i32 to vector<32x256xi32>
      %56 = arith.cmpi slt, %6, %55 : vector<32x256xi32>
      %cst_32 = arith.constant 0.000000e+00 : f32
      %57 = vector.broadcast %cst_32 : f32 to vector<32x256xf32>
      %58 = arith.select %56, %54, %57 : vector<32x256xi1>, vector<32x256xf32>
      %c224 = arith.constant 224 : index
      %c0_33 = arith.constant 0 : index
      %59 = vector.load %arg7[%c224, %c0_33] : memref<288x256xf32, #tpu.memory_space<vmem>>, vector<32x256xf32>
      tpu.vector_store %arg7[%c224, %c0_33], %58 {strides = array<i32>} : memref<288x256xf32, #tpu.memory_space<vmem>>, vector<32x256xf32>,
      %c239_i32 = arith.constant 239 : i32
      %60 = tpu.dynamic_rotate %arg9 by %c239_i32 dim 1 : vector<32x256xf32>, i32 -> vector<32x256xf32>
      %c15_i32_34 = arith.constant 15 : i32
      %61 = vector.broadcast %c15_i32_34 : i32 to vector<32x256xi32>
      %62 = arith.cmpi slt, %6, %61 : vector<32x256xi32>
      %c15_i32_35 = arith.constant 15 : i32
      %63 = vector.broadcast %c15_i32_35 : i32 to vector<32x256xi32>
      %64 = arith.cmpi slt, %7, %63 : vector<32x256xi32>
      %65 = arith.andi %62, %64 : vector<32x256xi1>
      %cst_36 = arith.constant 0.000000e+00 : f32
      %66 = vector.broadcast %cst_36 : f32 to vector<32x256xf32>
      %67 = arith.select %65, %60, %66 : vector<32x256xi1>, vector<32x256xf32>
      %c256 = arith.constant 256 : index
      %c0_37 = arith.constant 0 : index
      %68 = vector.load %arg7[%c256, %c0_37] : memref<288x256xf32, #tpu.memory_space<vmem>>, vector<32x256xf32>
      tpu.vector_store %arg7[%c256, %c0_37], %67 {strides = array<i32>} : memref<288x256xf32, #tpu.memory_space<vmem>>, vector<32x256xf32>,
      %c0_38 = arith.constant 0 : index
      %69 = arith.index_cast %arg8 : i32 to index
      %c0_39 = arith.constant 0 : index
      %c0_40 = arith.constant 0 : index
      %70 = vector.load %arg1[%c0_38, %69, %c0_39, %c0_40] : memref<1x8x128x256xbf16, #tpu.memory_space<vmem>>, vector<1x1x128x256xbf16>
      %71 = vector.shape_cast %70 : vector<1x1x128x256xbf16> to vector<128x256xbf16>
      %72 = arith.extf %71 : vector<128x256xbf16> to vector<128x256xf32>
      %c0_41 = arith.constant 0 : index
      %c0_42 = arith.constant 0 : index
      %73 = vector.load %arg2[%c0_41, %c0_42] : memref<128x288xf32, #tpu.memory_space<vmem>>, vector<128x288xf32>
      %c0_43 = arith.constant 0 : index
      %c0_44 = arith.constant 0 : index
      %74 = vector.load %arg7[%c0_43, %c0_44] : memref<288x256xf32, #tpu.memory_space<vmem>>, vector<288x256xf32>
      %cst_45 = arith.constant dense<0.000000e+00> : vector<128x256xf32>
      %75 = tpu.matmul %73, %74, %cst_45 {dimension_numbers = #tpu.dot_dimension_numbers<[1], [0], [0], [1], [0, 0, 1, 1], [], []>} : vector<128x288xf32>, vector<288x256xf32>, vector<128x256xf32> -> vector<128x256xf32>
      %76 = arith.addf %72, %75 : vector<128x256xf32>
      %77 = vector.extract_strided_slice %76 {offsets = [0, 0], sizes = [32, 256], strides = [1, 1]} : vector<128x256xf32> to vector<32x256xf32>
      %78 = arith.negf %77 : vector<32x256xf32>
      %79 = math.exp %78 : vector<32x256xf32>
      %cst_46 = arith.constant 1.000000e+00 : f32
      %80 = vector.broadcast %cst_46 : f32 to vector<32x256xf32>
      %81 = arith.addf %80, %79 : vector<32x256xf32>
      %82 = arith.divf %80, %81 : vector<32x256xf32>
      %83 = vector.extract_strided_slice %76 {offsets = [32, 0], sizes = [32, 256], strides = [1, 1]} : vector<128x256xf32> to vector<32x256xf32>
      %84 = arith.negf %83 : vector<32x256xf32>
      %85 = math.exp %84 : vector<32x256xf32>
      %cst_47 = arith.constant 1.000000e+00 : f32
      %86 = vector.broadcast %cst_47 : f32 to vector<32x256xf32>
      %87 = arith.addf %86, %85 : vector<32x256xf32>
      %88 = arith.divf %86, %87 : vector<32x256xf32>
      %89 = vector.extract_strided_slice %76 {offsets = [64, 0], sizes = [32, 256], strides = [1, 1]} : vector<128x256xf32> to vector<32x256xf32>
      %90 = arith.negf %89 : vector<32x256xf32>
      %91 = math.exp %90 : vector<32x256xf32>
      %cst_48 = arith.constant 1.000000e+00 : f32
      %92 = vector.broadcast %cst_48 : f32 to vector<32x256xf32>
      %93 = arith.addf %92, %91 : vector<32x256xf32>
      %94 = arith.divf %92, %93 : vector<32x256xf32>
      %95 = vector.extract_strided_slice %76 {offsets = [96, 0], sizes = [32, 256], strides = [1, 1]} : vector<128x256xf32> to vector<32x256xf32>
      %96 = math.tanh %95 : vector<32x256xf32>
      %97 = arith.mulf %88, %arg10 : vector<32x256xf32>
      %98 = arith.mulf %82, %96 : vector<32x256xf32>
      %99 = arith.addf %97, %98 : vector<32x256xf32>
      %100 = math.tanh %99 : vector<32x256xf32>
      %101 = arith.mulf %94, %100 : vector<32x256xf32>
      %c0_49 = arith.constant 0 : index
      %102 = arith.index_cast %arg8 : i32 to index
      %c0_50 = arith.constant 0 : index
      %c0_51 = arith.constant 0 : index
      %103 = vector.load %arg5[%c0_49, %102, %c0_50, %c0_51] : memref<1x8x32x256xf32, #tpu.memory_space<vmem>>, vector<1x1x32x256xf32>
      %104 = vector.shape_cast %103 : vector<1x1x32x256xf32> to vector<32x256xf32>
      %105 = vector.shape_cast %101 : vector<32x256xf32> to vector<1x1x32x256xf32>
      tpu.vector_store %arg5[%c0_49, %102, %c0_50, %c0_51], %105 {strides = array<i32>} : memref<1x8x32x256xf32, #tpu.memory_space<vmem>>, vector<1x1x32x256xf32>,
      scf.yield %101, %99 : vector<32x256xf32>, vector<32x256xf32>
    }
    %c8_i32_0 = arith.constant 8 : i32
    %c0 = arith.constant 0 : index
    %c0_1 = arith.constant 0 : index
    %c0_2 = arith.constant 0 : index
    %3 = vector.load %arg6[%c0, %c0_1, %c0_2] : memref<1x32x256xf32, #tpu.memory_space<vmem>>, vector<1x32x256xf32>
    %4 = vector.shape_cast %3 : vector<1x32x256xf32> to vector<32x256xf32>
    %5 = vector.shape_cast %2#1 : vector<32x256xf32> to vector<1x32x256xf32>
    tpu.vector_store %arg6[%c0, %c0_1, %c0_2], %5 {strides = array<i32>} : memref<1x32x256xf32, #tpu.memory_space<vmem>>, vector<1x32x256xf32>,
    return
  }
  func.func @transform_0(%arg0: i32) -> (i32, i32, i32, i32) {
    %c0_i32 = arith.constant 0 : i32
    %c0_i32_0 = arith.constant 0 : i32
    %c0_i32_1 = arith.constant 0 : i32
    %c0_i32_2 = arith.constant 0 : i32
    return %arg0, %c0_i32, %c0_i32_0, %c0_i32_1 : i32, i32, i32, i32
  }
  func.func @transform_1(%arg0: i32) -> (i32, i32) {
    %c0_i32 = arith.constant 0 : i32
    %c0_i32_0 = arith.constant 0 : i32
    %c0_i32_1 = arith.constant 0 : i32
    return %c0_i32, %c0_i32_0 : i32, i32
  }
  func.func @transform_2(%arg0: i32) -> (i32, i32) {
    %c0_i32 = arith.constant 0 : i32
    %c0_i32_0 = arith.constant 0 : i32
    %c0_i32_1 = arith.constant 0 : i32
    return %c0_i32, %c0_i32_0 : i32, i32
  }
  func.func @transform_3(%arg0: i32) -> (i32, i32) {
    %c0_i32 = arith.constant 0 : i32
    %c0_i32_0 = arith.constant 0 : i32
    %c0_i32_1 = arith.constant 0 : i32
    return %c0_i32, %c0_i32_0 : i32, i32
  }
  func.func @transform_4(%arg0: i32) -> (i32, i32, i32, i32) {
    %c0_i32 = arith.constant 0 : i32
    %c0_i32_0 = arith.constant 0 : i32
    %c0_i32_1 = arith.constant 0 : i32
    %c0_i32_2 = arith.constant 0 : i32
    return %arg0, %c0_i32, %c0_i32_0, %c0_i32_1 : i32, i32, i32, i32
  }
  func.func @transform_5(%arg0: i32) -> (i32, i32, i32) {
    %c0_i32 = arith.constant 0 : i32
    %c0_i32_0 = arith.constant 0 : i32
    %c0_i32_1 = arith.constant 0 : i32
    return %arg0, %c0_i32, %c0_i32_0 : i32, i32, i32
  }
}

module attributes {stable_mosaic.version = 11 : i64} {
  func.func @_convlstm_seq_kernel(%arg0: i32, %arg1: memref<1x8x128x256xbf16, #tpu.memory_space<vmem>>, %arg2: memref<128x288xf32, #tpu.memory_space<vmem>>, %arg3: memref<32x256xi32, #tpu.memory_space<vmem>>, %arg4: memref<32x256xi32, #tpu.memory_space<vmem>>, %arg5: memref<1x8x32x256xf32, #tpu.memory_space<vmem>>, %arg6: memref<1x32x256xf32, #tpu.memory_space<vmem>>, %arg7: memref<288x256xf32, #tpu.memory_space<vmem>>) attributes {dimension_semantics = [#tpu.dimension_semantics<parallel>], iteration_bounds = array<i64: 2>, scalar_prefetch = 0 : i64, scratch_operands = 1 : i64, tpu.core_type = #tpu.core_type<tc>, window_params = [{transform_indices = @transform_0, window_bounds = array<i64: 1, 8, 128, 256>}, {pipeline_mode = #tpu.pipeline_mode<synchronous>, transform_indices = @transform_1, window_bounds = array<i64: 128, 288>}, {pipeline_mode = #tpu.pipeline_mode<synchronous>, transform_indices = @transform_2, window_bounds = array<i64: 32, 256>}, {pipeline_mode = #tpu.pipeline_mode<synchronous>, transform_indices = @transform_3, window_bounds = array<i64: 32, 256>}, {transform_indices = @transform_4, window_bounds = array<i64: 1, 8, 32, 256>}, {transform_indices = @transform_5, window_bounds = array<i64: 1, 32, 256>}]} {
    %cst = arith.constant 0.000000e+00 : f32
    %0 = vector.broadcast %cst : f32 to vector<32x256xf32>
    %c0_i32 = arith.constant 0 : i32
    %c8_i32 = arith.constant 8 : i32
    %1 = arith.addi %c0_i32, %c8_i32 : i32
    %c1_i32 = arith.constant 1 : i32
    %2:2 = scf.for %arg8 = %c0_i32 to %1 step %c1_i32 iter_args(%arg9 = %0, %arg10 = %0) -> (vector<32x256xf32>, vector<32x256xf32>)  : i32 {
      %c0_3 = arith.constant 0 : index
      %c0_4 = arith.constant 0 : index
      %6 = vector.load %arg3[%c0_3, %c0_4] : memref<32x256xi32, #tpu.memory_space<vmem>>, vector<32x256xi32>
      %c0_5 = arith.constant 0 : index
      %c0_6 = arith.constant 0 : index
      %7 = vector.load %arg4[%c0_5, %c0_6] : memref<32x256xi32, #tpu.memory_space<vmem>>, vector<32x256xi32>
      %c17_i32 = arith.constant 17 : i32
      %8 = tpu.dynamic_rotate %arg9 by %c17_i32 dim 1 : vector<32x256xf32>, i32 -> vector<32x256xf32>
      %c1_i32_7 = arith.constant 1 : i32
      %9 = vector.broadcast %c1_i32_7 : i32 to vector<32x256xi32>
      %10 = arith.cmpi sge, %6, %9 : vector<32x256xi32>
      %c1_i32_8 = arith.constant 1 : i32
      %11 = vector.broadcast %c1_i32_8 : i32 to vector<32x256xi32>
      %12 = arith.cmpi sge, %7, %11 : vector<32x256xi32>
      %13 = arith.andi %10, %12 : vector<32x256xi1>
      %cst_9 = arith.constant 0.000000e+00 : f32
      %14 = vector.broadcast %cst_9 : f32 to vector<32x256xf32>
      %15 = arith.select %13, %8, %14 : vector<32x256xi1>, vector<32x256xf32>
      %c0_10 = arith.constant 0 : index
      %c0_11 = arith.constant 0 : index
      %16 = vector.load %arg7[%c0_10, %c0_11] : memref<288x256xf32, #tpu.memory_space<vmem>>, vector<32x256xf32>
      tpu.vector_store %arg7[%c0_10, %c0_11], %15 {strides = array<i32>} : memref<288x256xf32, #tpu.memory_space<vmem>>, vector<32x256xf32>,
      %c16_i32 = arith.constant 16 : i32
      %17 = tpu.dynamic_rotate %arg9 by %c16_i32 dim 1 : vector<32x256xf32>, i32 -> vector<32x256xf32>
      %c1_i32_12 = arith.constant 1 : i32
      %18 = vector.broadcast %c1_i32_12 : i32 to vector<32x256xi32>
      %19 = arith.cmpi sge, %6, %18 : vector<32x256xi32>
      %cst_13 = arith.constant 0.000000e+00 : f32
      %20 = vector.broadcast %cst_13 : f32 to vector<32x256xf32>
      %21 = arith.select %19, %17, %20 : vector<32x256xi1>, vector<32x256xf32>
      %c32 = arith.constant 32 : index
      %c0_14 = arith.constant 0 : index
      %22 = vector.load %arg7[%c32, %c0_14] : memref<288x256xf32, #tpu.memory_space<vmem>>, vector<32x256xf32>
      tpu.vector_store %arg7[%c32, %c0_14], %21 {strides = array<i32>} : memref<288x256xf32, #tpu.memory_space<vmem>>, vector<32x256xf32>,
      %c15_i32 = arith.constant 15 : i32
      %23 = tpu.dynamic_rotate %arg9 by %c15_i32 dim 1 : vector<32x256xf32>, i32 -> vector<32x256xf32>
      %c1_i32_15 = arith.constant 1 : i32
      %24 = vector.broadcast %c1_i32_15 : i32 to vector<32x256xi32>
      %25 = arith.cmpi sge, %6, %24 : vector<32x256xi32>
      %c15_i32_16 = arith.constant 15 : i32
      %26 = vector.broadcast %c15_i32_16 : i32 to vector<32x256xi32>
      %27 = arith.cmpi slt, %7, %26 : vector<32x256xi32>
      %28 = arith.andi %25, %27 : vector<32x256xi1>
      %cst_17 = arith.constant 0.000000e+00 : f32
      %29 = vector.broadcast %cst_17 : f32 to vector<32x256xf32>
      %30 = arith.select %28, %23, %29 : vector<32x256xi1>, vector<32x256xf32>
      %c64 = arith.constant 64 : index
      %c0_18 = arith.constant 0 : index
      %31 = vector.load %arg7[%c64, %c0_18] : memref<288x256xf32, #tpu.memory_space<vmem>>, vector<32x256xf32>
      tpu.vector_store %arg7[%c64, %c0_18], %30 {strides = array<i32>} : memref<288x256xf32, #tpu.memory_space<vmem>>, vector<32x256xf32>,
      %c1_i32_19 = arith.constant 1 : i32
      %32 = tpu.dynamic_rotate %arg9 by %c1_i32_19 dim 1 : vector<32x256xf32>, i32 -> vector<32x256xf32>
      %c1_i32_20 = arith.constant 1 : i32
      %33 = vector.broadcast %c1_i32_20 : i32 to vector<32x256xi32>
      %34 = arith.cmpi sge, %7, %33 : vector<32x256xi32>
      %cst_21 = arith.constant 0.000000e+00 : f32
      %35 = vector.broadcast %cst_21 : f32 to vector<32x256xf32>
      %36 = arith.select %34, %32, %35 : vector<32x256xi1>, vector<32x256xf32>
      %c96 = arith.constant 96 : index
      %c0_22 = arith.constant 0 : index
      %37 = vector.load %arg7[%c96, %c0_22] : memref<288x256xf32, #tpu.memory_space<vmem>>, vector<32x256xf32>
      tpu.vector_store %arg7[%c96, %c0_22], %36 {strides = array<i32>} : memref<288x256xf32, #tpu.memory_space<vmem>>, vector<32x256xf32>,
      %c128 = arith.constant 128 : index
      %c0_23 = arith.constant 0 : index
      %38 = vector.load %arg7[%c128, %c0_23] : memref<288x256xf32, #tpu.memory_space<vmem>>, vector<32x256xf32>
      tpu.vector_store %arg7[%c128, %c0_23], %arg9 {strides = array<i32>} : memref<288x256xf32, #tpu.memory_space<vmem>>, vector<32x256xf32>,
      %c255_i32 = arith.constant 255 : i32
      %39 = tpu.dynamic_rotate %arg9 by %c255_i32 dim 1 : vector<32x256xf32>, i32 -> vector<32x256xf32>
      %c15_i32_24 = arith.constant 15 : i32
      %40 = vector.broadcast %c15_i32_24 : i32 to vector<32x256xi32>
      %41 = arith.cmpi slt, %7, %40 : vector<32x256xi32>
      %cst_25 = arith.constant 0.000000e+00 : f32
      %42 = vector.broadcast %cst_25 : f32 to vector<32x256xf32>
      %43 = arith.select %41, %39, %42 : vector<32x256xi1>, vector<32x256xf32>
      %c160 = arith.constant 160 : index
      %c0_26 = arith.constant 0 : index
      %44 = vector.load %arg7[%c160, %c0_26] : memref<288x256xf32, #tpu.memory_space<vmem>>, vector<32x256xf32>
      tpu.vector_store %arg7[%c160, %c0_26], %43 {strides = array<i32>} : memref<288x256xf32, #tpu.memory_space<vmem>>, vector<32x256xf32>,
      %c241_i32 = arith.constant 241 : i32
      %45 = tpu.dynamic_rotate %arg9 by %c241_i32 dim 1 : vector<32x256xf32>, i32 -> vector<32x256xf32>
      %c15_i32_27 = arith.constant 15 : i32
      %46 = vector.broadcast %c15_i32_27 : i32 to vector<32x256xi32>
      %47 = arith.cmpi slt, %6, %46 : vector<32x256xi32>
      %c1_i32_28 = arith.constant 1 : i32
      %48 = vector.broadcast %c1_i32_28 : i32 to vector<32x256xi32>
      %49 = arith.cmpi sge, %7, %48 : vector<32x256xi32>
      %50 = arith.andi %47, %49 : vector<32x256xi1>
      %cst_29 = arith.constant 0.000000e+00 : f32
      %51 = vector.broadcast %cst_29 : f32 to vector<32x256xf32>
      %52 = arith.select %50, %45, %51 : vector<32x256xi1>, vector<32x256xf32>
      %c192 = arith.constant 192 : index
      %c0_30 = arith.constant 0 : index
      %53 = vector.load %arg7[%c192, %c0_30] : memref<288x256xf32, #tpu.memory_space<vmem>>, vector<32x256xf32>
      tpu.vector_store %arg7[%c192, %c0_30], %52 {strides = array<i32>} : memref<288x256xf32, #tpu.memory_space<vmem>>, vector<32x256xf32>,
      %c240_i32 = arith.constant 240 : i32
      %54 = tpu.dynamic_rotate %arg9 by %c240_i32 dim 1 : vector<32x256xf32>, i32 -> vector<32x256xf32>
      %c15_i32_31 = arith.constant 15 : i32
      %55 = vector.broadcast %c15_i32_31 : i32 to vector<32x256xi32>
      %56 = arith.cmpi slt, %6, %55 : vector<32x256xi32>
      %cst_32 = arith.constant 0.000000e+00 : f32
      %57 = vector.broadcast %cst_32 : f32 to vector<32x256xf32>
      %58 = arith.select %56, %54, %57 : vector<32x256xi1>, vector<32x256xf32>
      %c224 = arith.constant 224 : index
      %c0_33 = arith.constant 0 : index
      %59 = vector.load %arg7[%c224, %c0_33] : memref<288x256xf32, #tpu.memory_space<vmem>>, vector<32x256xf32>
      tpu.vector_store %arg7[%c224, %c0_33], %58 {strides = array<i32>} : memref<288x256xf32, #tpu.memory_space<vmem>>, vector<32x256xf32>,
      %c239_i32 = arith.constant 239 : i32
      %60 = tpu.dynamic_rotate %arg9 by %c239_i32 dim 1 : vector<32x256xf32>, i32 -> vector<32x256xf32>
      %c15_i32_34 = arith.constant 15 : i32
      %61 = vector.broadcast %c15_i32_34 : i32 to vector<32x256xi32>
      %62 = arith.cmpi slt, %6, %61 : vector<32x256xi32>
      %c15_i32_35 = arith.constant 15 : i32
      %63 = vector.broadcast %c15_i32_35 : i32 to vector<32x256xi32>
      %64 = arith.cmpi slt, %7, %63 : vector<32x256xi32>
      %65 = arith.andi %62, %64 : vector<32x256xi1>
      %cst_36 = arith.constant 0.000000e+00 : f32
      %66 = vector.broadcast %cst_36 : f32 to vector<32x256xf32>
      %67 = arith.select %65, %60, %66 : vector<32x256xi1>, vector<32x256xf32>
      %c256 = arith.constant 256 : index
      %c0_37 = arith.constant 0 : index
      %68 = vector.load %arg7[%c256, %c0_37] : memref<288x256xf32, #tpu.memory_space<vmem>>, vector<32x256xf32>
      tpu.vector_store %arg7[%c256, %c0_37], %67 {strides = array<i32>} : memref<288x256xf32, #tpu.memory_space<vmem>>, vector<32x256xf32>,
      %c0_38 = arith.constant 0 : index
      %69 = arith.index_cast %arg8 : i32 to index
      %c0_39 = arith.constant 0 : index
      %c0_40 = arith.constant 0 : index
      %70 = vector.load %arg1[%c0_38, %69, %c0_39, %c0_40] : memref<1x8x128x256xbf16, #tpu.memory_space<vmem>>, vector<1x1x128x256xbf16>
      %71 = vector.shape_cast %70 : vector<1x1x128x256xbf16> to vector<128x256xbf16>
      %72 = arith.extf %71 : vector<128x256xbf16> to vector<128x256xf32>
      %c0_41 = arith.constant 0 : index
      %c0_42 = arith.constant 0 : index
      %73 = vector.load %arg2[%c0_41, %c0_42] : memref<128x288xf32, #tpu.memory_space<vmem>>, vector<128x288xf32>
      %c0_43 = arith.constant 0 : index
      %c0_44 = arith.constant 0 : index
      %74 = vector.load %arg7[%c0_43, %c0_44] : memref<288x256xf32, #tpu.memory_space<vmem>>, vector<288x256xf32>
      %cst_45 = arith.constant dense<0.000000e+00> : vector<128x256xf32>
      %75 = tpu.matmul %73, %74, %cst_45 {dimension_numbers = #tpu.dot_dimension_numbers<[1], [0], [0], [1], [0, 0, 1, 1], [], []>} : vector<128x288xf32>, vector<288x256xf32>, vector<128x256xf32> -> vector<128x256xf32>
      %76 = arith.addf %72, %75 : vector<128x256xf32>
      %77 = vector.extract_strided_slice %76 {offsets = [0, 0], sizes = [32, 256], strides = [1, 1]} : vector<128x256xf32> to vector<32x256xf32>
      %78 = arith.negf %77 : vector<32x256xf32>
      %79 = math.exp %78 : vector<32x256xf32>
      %cst_46 = arith.constant 1.000000e+00 : f32
      %80 = vector.broadcast %cst_46 : f32 to vector<32x256xf32>
      %81 = arith.addf %80, %79 : vector<32x256xf32>
      %82 = arith.divf %80, %81 : vector<32x256xf32>
      %83 = vector.extract_strided_slice %76 {offsets = [32, 0], sizes = [32, 256], strides = [1, 1]} : vector<128x256xf32> to vector<32x256xf32>
      %84 = arith.negf %83 : vector<32x256xf32>
      %85 = math.exp %84 : vector<32x256xf32>
      %cst_47 = arith.constant 1.000000e+00 : f32
      %86 = vector.broadcast %cst_47 : f32 to vector<32x256xf32>
      %87 = arith.addf %86, %85 : vector<32x256xf32>
      %88 = arith.divf %86, %87 : vector<32x256xf32>
      %89 = vector.extract_strided_slice %76 {offsets = [64, 0], sizes = [32, 256], strides = [1, 1]} : vector<128x256xf32> to vector<32x256xf32>
      %90 = arith.negf %89 : vector<32x256xf32>
      %91 = math.exp %90 : vector<32x256xf32>
      %cst_48 = arith.constant 1.000000e+00 : f32
      %92 = vector.broadcast %cst_48 : f32 to vector<32x256xf32>
      %93 = arith.addf %92, %91 : vector<32x256xf32>
      %94 = arith.divf %92, %93 : vector<32x256xf32>
      %95 = vector.extract_strided_slice %76 {offsets = [96, 0], sizes = [32, 256], strides = [1, 1]} : vector<128x256xf32> to vector<32x256xf32>
      %96 = math.tanh %95 : vector<32x256xf32>
      %97 = arith.mulf %88, %arg10 : vector<32x256xf32>
      %98 = arith.mulf %82, %96 : vector<32x256xf32>
      %99 = arith.addf %97, %98 : vector<32x256xf32>
      %100 = math.tanh %99 : vector<32x256xf32>
      %101 = arith.mulf %94, %100 : vector<32x256xf32>
      %c0_49 = arith.constant 0 : index
      %102 = arith.index_cast %arg8 : i32 to index
      %c0_50 = arith.constant 0 : index
      %c0_51 = arith.constant 0 : index
      %103 = vector.load %arg5[%c0_49, %102, %c0_50, %c0_51] : memref<1x8x32x256xf32, #tpu.memory_space<vmem>>, vector<1x1x32x256xf32>
      %104 = vector.shape_cast %103 : vector<1x1x32x256xf32> to vector<32x256xf32>
      %105 = vector.shape_cast %101 : vector<32x256xf32> to vector<1x1x32x256xf32>
      tpu.vector_store %arg5[%c0_49, %102, %c0_50, %c0_51], %105 {strides = array<i32>} : memref<1x8x32x256xf32, #tpu.memory_space<vmem>>, vector<1x1x32x256xf32>,
      scf.yield %101, %99 : vector<32x256xf32>, vector<32x256xf32>
    }
    %c8_i32_0 = arith.constant 8 : i32
    %c0 = arith.constant 0 : index
    %c0_1 = arith.constant 0 : index
    %c0_2 = arith.constant 0 : index
    %3 = vector.load %arg6[%c0, %c0_1, %c0_2] : memref<1x32x256xf32, #tpu.memory_space<vmem>>, vector<1x32x256xf32>
    %4 = vector.shape_cast %3 : vector<1x32x256xf32> to vector<32x256xf32>
    %5 = vector.shape_cast %2#1 : vector<32x256xf32> to vector<1x32x256xf32>
    tpu.vector_store %arg6[%c0, %c0_1, %c0_2], %5 {strides = array<i32>} : memref<1x32x256xf32, #tpu.memory_space<vmem>>, vector<1x32x256xf32>,
    return
  }
  func.func @transform_0(%arg0: i32) -> (i32, i32, i32, i32) {
    %c0_i32 = arith.constant 0 : i32
    %c0_i32_0 = arith.constant 0 : i32
    %c0_i32_1 = arith.constant 0 : i32
    %c0_i32_2 = arith.constant 0 : i32
    return %arg0, %c0_i32, %c0_i32_0, %c0_i32_1 : i32, i32, i32, i32
  }
  func.func @transform_1(%arg0: i32) -> (i32, i32) {
    %c0_i32 = arith.constant 0 : i32
    %c0_i32_0 = arith.constant 0 : i32
    %c0_i32_1 = arith.constant 0 : i32
    return %c0_i32, %c0_i32_0 : i32, i32
  }
  func.func @transform_2(%arg0: i32) -> (i32, i32) {
    %c0_i32 = arith.constant 0 : i32
    %c0_i32_0 = arith.constant 0 : i32
    %c0_i32_1 = arith.constant 0 : i32
    return %c0_i32, %c0_i32_0 : i32, i32
  }
  func.func @transform_3(%arg0: i32) -> (i32, i32) {
    %c0_i32 = arith.constant 0 : i32
    %c0_i32_0 = arith.constant 0 : i32
    %c0_i32_1 = arith.constant 0 : i32
    return %c0_i32, %c0_i32_0 : i32, i32
  }
  func.func @transform_4(%arg0: i32) -> (i32, i32, i32, i32) {
    %c0_i32 = arith.constant 0 : i32
    %c0_i32_0 = arith.constant 0 : i32
    %c0_i32_1 = arith.constant 0 : i32
    %c0_i32_2 = arith.constant 0 : i32
    return %arg0, %c0_i32, %c0_i32_0, %c0_i32_1 : i32, i32, i32, i32
  }
  func.func @transform_5(%arg0: i32) -> (i32, i32, i32) {
    %c0_i32 = arith.constant 0 : i32
    %c0_i32_0 = arith.constant 0 : i32
    %c0_i32_1 = arith.constant 0 : i32
    return %arg0, %c0_i32, %c0_i32_0 : i32, i32, i32
  }
}

</mosaic_0001>

<bundles_post_ra>
// kernel: _lambda_.2
= control target key start
LH: loop header
LB: loop body
LE: loop exit
PB: predicated region body
PF: predicated region fallthrough
CT: control target
= control target key end

     0   :  { %11 = vsyncpa [#allocation4], 0  ;;  %s3930_s0 = inlined_call_operand.vmem [shape: bf16[2,8,128,256], index: 0, kind: input, shape index: {}]   ;;  %s3931_s1 = inlined_call_operand.vmem [shape: f32[128,288], index: 1, kind: input, shape index: {}]   ;;  %s3932_s2 = inlined_call_operand.vmem [shape: s32[32,256], index: 2, kind: input, shape index: {}]   ;;  %s3933_s3 = inlined_call_operand.vmem [shape: s32[32,256], index: 3, kind: input, shape index: {}]   ;;  %s3934_s4 = inlined_call_operand.vmem [shape: f32[2,8,32,256], index: 4, kind: output, shape index: {0}]   ;;  %s3935_s5 = inlined_call_operand.hbm [shape: f32[2,32,256], index: 5, kind: output, shape index: {1}]  }
   0x1   :  { %13 = vsyncpa [#allocation4 + $0x1], 0  ;;  %s2606_s18 = smov 0   ;;  %s2608_s19 = smov 0  }
   0x2   :  { %s2610_s20 = smov 0   ;;  %s2612_s21 = smov 0  }
   0x3 LB: > { %s2627_s22 = sadd.s32 4294967295, %s2494_s21   ;;  %s1627_s23 = sadd.s32 4294967294, %s2494_s21   ;;  %s2494_s21 = sphi %s2612_s21, %s4170_s21   ;;  %s2490_s20 = sphi %s2610_s20, %s4169_s20   ;;  %s2486_s19 = sphi %s2608_s19, %s4168_s19   ;;  %s2482_s18 = sphi %s2606_s18, %s4167_s18  }
   0x4   : > { %s2631_s24 = sadd.s32 1, %s2494_s21   ;;  %s141_s25 = sadd.s32 1, %s2490_s20 }
   0x5   : > { %s138_s26 = ssub.s32 %s2494_s21, %s2631_s24  ;;  %p151_p0 = scmp.ne.s32.totalorder %s2490_s20, %s2486_s19 }
   0x6   : > { %p139_p1 = scmp.eq.s32.totalorder %s138_s26, 0  ;;  %p152_p2 = scmp.eq.s32.totalorder %s2627_s22, 1 }
   0x7   : > { %p157_p3 = scmp.ne.s32.totalorder %s2486_s19, %s2482_s18  ;;  %p158_p4 = scmp.eq.s32.totalorder %s1627_s23, 1 }
   0x8   : > { %s2642_s27 = scalar_select %p139_p1, %s2490_s20, %s141_s25  }
   0x9   : > { %p2644_p5 = por %p152_p2, %p151_p0  ;;  %p2648_p6 = por %p158_p4, %p157_p3 }
   0xa   : > { %p1630_p7 = scmp.ge.s32.totalorder %s2494_s21, 1  ;;  %p193_p8 = scmp.lt.s32.totalorder %s2494_s21, 3 }
   0xc   : > { %p194_p9 = pnand %p1630_p7, %p193_p8 }
   0xd   : > { %s223_s30 = sand.u32 (!%p194_p9), 1, %s2486_s19   ;;  %p226_p10 = scmp.lt.s32.totalorder (!%p194_p9), %s2627_s22, 1  ;;  %v2671_v0 = vmov (!%p194_p9), 0.0   ;;  %v2673_v1 = vmov (!%p194_p9), 0.0   ;;  %v2675_v2 = vmov (!%p194_p9), 0.0   ;;  %v2677_v3 = vmov (!%p194_p9), 0.0  }
   0xe   : > { %197 = sbr.rel (%p194_p9) target bundleno = 552 (0x228), region = 36  ;;  %s1631_s6 = sshll.u32 (!%p194_p9), %s223_s30, 6  ;;  %v2679_v4 = vmov (!%p194_p9), 0.0   ;;  %v2681_v5 = vmov (!%p194_p9), 0.0   ;;  %v2683_v6 = vmov (!%p194_p9), 0.0   ;;  %v2685_v7 = vmov (!%p194_p9), 0.0  }
   0xf   : > { %s2669_s16 = scalar_lea.vmem (!%p194_p9), [#allocation3], %s1631_s6  ;;  %v2687_v8 = vmov (!%p194_p9), 0.0   ;;  %v2689_v9 = vmov (!%p194_p9), 0.0   ;;  %v2691_v10 = vmov (!%p194_p9), 0.0   ;;  %v2693_v11 = vmov (!%p194_p9), 0.0   ;;  %s2703_s17 = smov (!%p194_p9), 0  }
  0x10   : > { %v2695_v12 = vmov (!%p194_p9), 0.0   ;;  %v2697_v13 = vmov (!%p194_p9), 0.0   ;;  %v2699_v14 = vmov (!%p194_p9), 0.0   ;;  %v2701_v15 = vmov (!%p194_p9), 0.0  }
  0x15   : > { %s227_s7 = scalar_select %p226_p10, %s2627_s22, 1 }
  0x17   : > { %s1685_s8 = sshll.u32 %s227_s7, 10  ;;  %s1686_s9 = sshll.u32 %s227_s7, 9 }
  0x18   : > { %s2662_s12 = scalar_lea.vmem %s3930_s0, %s1685_s8  ;;  %s2667_s15 = scalar_lea.vmem %s3934_s4, %s1686_s9 }
  0x19 LB: >> { %v2076_v16 = vpack.i.bf16 %v2550_v13, %v2558_v15  ;;  %v2086_v17 = vpack.i.bf16 %v2534_v9, %v2542_v11  ;;  %s2564_s23 = smov 17   ;;  %v2081_v18 = vpack.i.bf16 %v2546_v12, %v2554_v14  ;;  %v2091_v19 = vpack.i.bf16 %v2530_v8, %v2538_v10  ;;  %s2565_s25 = smov 16   ;;  %v728_v24 = vld [vmem:[%s3931_s1 + $0x8] sm:$0xff]  ;;  %v2789_v29 = vld [vmem:[%s3932_s2 + $0x18] sm:$0xff]  ;;  %v2799_v31 = vld [vmem:[%s3932_s2] sm:$0xff]  ;;  %s2562_s17 = sphi %s2703_s17, %s241_s17   ;;  %v2558_v15 = vphi %v2701_v15, %v1434_v15   ;;  %v2554_v14 = vphi %v2699_v14, %v1435_v14   ;;  %v2550_v13 = vphi %v2697_v13, %v1436_v13   ;;  %v2546_v12 = vphi %v2695_v12, %v1437_v12   ;;  %v2542_v11 = vphi %v2693_v11, %v1438_v11   ;;  %v2538_v10 = vphi %v2691_v10, %v1439_v10   ;;  %v2534_v9 = vphi %v2689_v9, %v1440_v9   ;;  %v2530_v8 = vphi %v2687_v8, %v1441_v8   ;;  %v2526_v7 = vphi %v2685_v7, %v4166_v7   ;;  %v2522_v6 = vphi %v2683_v6, %v4165_v6   ;;  %v2518_v5 = vphi %v2681_v5, %v4164_v5   ;;  %v2514_v4 = vphi %v2679_v4, %v4163_v4   ;;  %v2510_v3 = vphi %v2677_v3, %v4162_v3   ;;  %v2506_v2 = vphi %v2675_v2, %v4161_v2   ;;  %v2502_v1 = vphi %v2673_v1, %v4160_v1   ;;  %v2498_v0 = vphi %v2671_v0, %v4159_v0  }
  0x1a   : >> { %s2566_s26 = smov 15   ;;  %s2567_s6 = smov 1   ;;  %v1802_v20 = vpack.c.bf16 %v2546_v12, %v2554_v14  ;;  %v1804_v21 = vpack.c.bf16 %v2550_v13, %v2558_v15  ;;  %v1806_v22 = vpack.c.bf16 %v2530_v8, %v2538_v10  ;;  %v3946_v25 = vmov 0.0   ;;  %960 = vmatprep.mubr.f32.mxu1 %v728_v24  ;;  %v2779_v26 = vld [vmem:[%s3932_s2 + $0x8] sm:$0xff]  ;;  %v2794_v30 = vld [vmem:[%s3933_s3 + $0x18] sm:$0xff]  ;;  %v2804_v32 = vld [vmem:[%s3933_s3] sm:$0xff] }
  0x1b   : >> { %2077 = vrot.lane.b32.xlu0 %v2076_v16, %s2564_s23  ;;  %2087 = vrot.lane.b32.xlu1 %v2086_v17, %s2564_s23  ;;  %s2568_s7 = smov 127   ;;  %s2569_s8 = smov 113   ;;  %v2784_v27 = vld [vmem:[%s3933_s3 + $0x8] sm:$0xff]  ;;  %v290_v28 = vlaneseq  ;;  %vm3943_vm0 = vcmp.ge.s32.totalorder %v2779_v26, 1  ;;  %v2811_v33 = vld [vmem:[%s3932_s2 + $0x10] sm:$0xff]  ;;  %vm3942_vm2 = vcmp.ge.s32.totalorder %v2789_v29, 1 }
  0x1c   : >> { %s2570_s9 = smov 112   ;;  %s2571_s10 = smov 111   ;;  %1121 = vmatprep.mubr.f32.mxu0 %v3946_v25  ;;  %vm3939_vm1 = vcmp.ge.s32.totalorder %v2784_v27, 1  ;;  %v2816_v34 = vld [vmem:[%s3933_s3 + $0x10] sm:$0xff]  ;;  %vm3938_vm3 = vcmp.ge.s32.totalorder %v2794_v30, 1  ;;  %vm3941_vm4 = vcmp.ge.s32.totalorder %v2799_v31, 1 }
  0x1d   : >> { %v2820_v35 = vand.u32 127, %v290_v28  ;;  %vm3937_vm5 = vcmp.ge.s32.totalorder %v2804_v32, 1  ;;  %vm2828_vm6 = vmand %vm3943_vm0, %vm3939_vm1  ;;  %vm3940_vm7 = vcmp.ge.s32.totalorder %v2811_v33, 1  ;;  %vm3936_vm8 = vcmp.ge.s32.totalorder %v2816_v34, 1  ;;  %v2837_v39 = vld [vmem:[%s3932_s2 + $0x28] sm:$0xff]  ;;  %v2842_v40 = vld [vmem:[%s3932_s2 + $0x38] sm:$0xff] }
  0x1e   : >> { %vm2848_vm9 = vmand %vm3942_vm2, %vm3938_vm3  ;;  %v2855_v42 = vld [vmem:[%s3933_s3 + $0x28] sm:$0xff]  ;;  %v2860_v43 = vld [vmem:[%s3933_s3 + $0x38] sm:$0xff]  ;;  %vm3945_vm13 = vcmp.ge.s32.totalorder %v2837_v39, 1  ;;  %vm3953_vm14 = vcmp.ge.s32.totalorder %v2842_v40, 1  ;;  %v4051_v14 = vmov 0  ;;  %v4065_v10 = vmov 0 }
  0x1f   : >> { %2082 = vrot.lane.b32.xlu0 %v2081_v18, %s2564_s23  ;;  %2092 = vrot.lane.b32.xlu1 %v2091_v19, %s2564_s23  ;;  %vm2866_vm10 = vmand %vm3941_vm4, %vm3937_vm5  ;;  %vm292_vm11 = vcmp.lt.s32.totalorder %v2820_v35, 17  ;;  %v2884_v46 = vld [vmem:[%s3932_s2 + $0x20] sm:$0xff]  ;;  %vm3944_vm15 = vcmp.ge.s32.totalorder %v2855_v42, 1  ;;  %v2896_v52 = vld [vmem:[%s3932_s2 + $0x30] sm:$0xff]  ;;  %vm357_vm4 = vcmp.lt.s32.totalorder %v2820_v35, 16 }
  0x20   : >> { %vm2875_vm12 = vmand %vm3940_vm7, %vm3936_vm8  ;;  %v2889_v47 = vld [vmem:[%s3933_s3 + $0x20] sm:$0xff]  ;;  %vm3948_vm8 = vcmp.ge.s32.totalorder %v2860_v43, 1  ;;  %v2901_v53 = vld [vmem:[%s3933_s3 + $0x30] sm:$0xff]  ;;  %vm3950_vm1 = vcmp.ge.s32.totalorder %v2884_v46, 1  ;;  %vm3952_vm0 = vcmp.ge.s32.totalorder %v2896_v52, 1 }
  0x21   : >> { %vm1758_vm3 = vmpackc.low %vm2875_vm12, %vm2866_vm10  ;;  %vm3949_vm7 = vcmp.ge.s32.totalorder %v2889_v47, 1  ;;  %vm3951_vm5 = vcmp.ge.s32.totalorder %v2901_v53, 1  ;;  %vm3996_vm10 = vcmp.ge.s32.totalorder %v2811_v33, 1  ;;  %v745_v13 = vld [vmem:[%s3931_s1 + $0x90] sm:$0xff]  ;;  %v768_v15 = vld [vmem:[%s3931_s1 + $0x148] sm:$0xff] }
  0x22   : >> { %vm2918_vm2 = vmand %vm3945_vm13, %vm3944_vm15 }
  0x23   : >> { %2097 = vrot.lane.b32.xlu0 %v2076_v16, %s2565_s25  ;;  %2102 = vrot.lane.b32.xlu1 %v2081_v18, %s2565_s25  ;;  %vm2936_vm15 = vmand %vm3953_vm14, %vm3948_vm8 }
  0x24   : >> { %vm2946_vm13 = vmand %vm3950_vm1, %vm3949_vm7 }
  0x25   : >> { %vm2956_vm8 = vmand %vm3952_vm0, %vm3951_vm5  ;;  %vm3999_vm5 = vcmp.ge.s32.totalorder %v2837_v39, 1 }
  0x26   : >> { %vm3990_vm7 = vmpackc.low %vm2848_vm9, %vm2828_vm6  ;;  %vm3991_vm6 = vcmp.ge.s32.totalorder %v2779_v26, 1 }
  0x27   : >> { %2107 = vrot.lane.b32.xlu0 %v2086_v17, %s2565_s25  ;;  %2112 = vrot.lane.b32.xlu1 %v2091_v19, %s2565_s25  ;;  %vm1761_vm1 = vmpackc.low %vm2936_vm15, %vm2918_vm2  ;;  %vm3957_vm2 = vcmp.lt.s32.totalorder %v2804_v32, 15  ;;  %vm4002_vm15 = vcmp.ge.s32.totalorder %v2884_v46, 1 }
  0x2b   : >> { %2117 = vrot.lane.b32.xlu0 %v2076_v16, %s2566_s26  ;;  %2122 = vrot.lane.b32.xlu1 %v2081_v18, %s2566_s26 }
  0x2f   : >> { %2127 = vrot.lane.b32.xlu0 %v2086_v17, %s2566_s26  ;;  %2132 = vrot.lane.b32.xlu1 %v2091_v19, %s2566_s26 }
  0x33   : >> { %2137 = vrot.lane.b32.xlu0 %v2076_v16, %s2567_s6  ;;  %2142 = vrot.lane.b32.xlu1 %v2081_v18, %s2567_s6 }
  0x37   : >> { %2147 = vrot.lane.b32.xlu0 %v2086_v17, %s2567_s6  ;;  %2152 = vrot.lane.b32.xlu1 %v2091_v19, %s2567_s6 }
  0x3b   : >> { %2157 = vrot.lane.b32.xlu0 %v2076_v16, %s2568_s7  ;;  %2162 = vrot.lane.b32.xlu1 %v2081_v18, %s2568_s7 }
  0x3f   : >> { %2167 = vrot.lane.b32.xlu0 %v2086_v17, %s2568_s7  ;;  %2172 = vrot.lane.b32.xlu1 %v2091_v19, %s2568_s7  ;;  %s1687_s7 = sshll.u32 %s2562_s17, 7 }
  0x43   : >> { %2177 = vrot.lane.b32.xlu0 %v2076_v16, %s2569_s8  ;;  %2182 = vrot.lane.b32.xlu1 %v2081_v18, %s2569_s8 }
  0x47   : >> { %2187 = vrot.lane.b32.xlu0 %v2086_v17, %s2569_s8  ;;  %2192 = vrot.lane.b32.xlu1 %v2091_v19, %s2569_s8  ;;  %s3737_s8 = scalar_lea.vmem %s2662_s12, %s1687_s7 }
  0x4b   : >> { %2197 = vrot.lane.b32.xlu0 %v2076_v16, %s2570_s9  ;;  %2202 = vrot.lane.b32.xlu1 %v2081_v18, %s2570_s9 }
  0x4f   : >> { %2207 = vrot.lane.b32.xlu0 %v2076_v16, %s2571_s10  ;;  %2212 = vrot.lane.b32.xlu1 %v2081_v18, %s2571_s10 }
  0x53   : >> { %2217 = vrot.lane.b32.xlu0 %v2086_v17, %s2570_s9  ;;  %2222 = vrot.lane.b32.xlu1 %v2091_v19, %s2570_s9  ;;  %s1688_s9 = sshll.u32 %s2562_s17, 6  ;;  %s241_s17 = sadd.s32 1, %s2562_s17  }
  0x54   : >> { %p3818_p11 = scmp.ge.s32.totalorder %s241_s17, 8  }
  0x55   : > { %s1689_s12 = sshll.u32 (%p3818_p11), %s2627_s22, 10  ;;  %s1483_s14 = sshll.u32 (%p3818_p11), %s2669_s16, 4  ;;  %s3885_s14 = int_to_ptr.vmem [resolvable:$true] %s1483_s14 }
  0x56   : > { %s3882_s13 = scalar_lea.hbm (%p3818_p11), %s3935_s5, %s1689_s12  ;;  %s3889_s23 = scalar_lea.sflag (%p3818_p11), [#allocation4], %s223_s30 }
  0x57   : >> { %2227 = vrot.lane.b32.xlu0 %v2086_v17, %s2571_s10  ;;  %2232 = vrot.lane.b32.xlu1 %v2091_v19, %s2571_s10  ;;  %s3806_s10 = scalar_lea.vmem %s2667_s15, %s1688_s9  ;;  %s2364_s25 = scalar_lea.vmem (%p3818_p11), %s3885_s14, 1024 }
  0x58   : > { %p2365_p12 = scmp.ne.s32.totalorder (%p3818_p11), %s3885_s14, %s2364_s25  ;;  %s2573_s22 = smov (%p3818_p11), [#allocation3]  }
  0x59   : > { %s2368_s26 = sshll.u32 (%p3818_p11), %s2573_s22, 4  ;;  %s2369_s26 = int_to_ptr.vmem [resolvable:$false] %s2368_s26 }
  0x5a   : > { %p2366_p13 = pnand (%p3818_p11), %p2365_p12, %p2644_p5  ;;  %s2370_s6 = scalar_lea.vmem (%p3818_p11), %s2369_s26, 2048 }
  0x5b   : > { %p2371_p1 = scmp.lt.s32.totalorder (%p3818_p11), %s3885_s14, %s2369_s26  ;;  %p2372_p2 = scmp.lt.s32.totalorder (%p3818_p11), %s2370_s6, %s2364_s25 }
  0x5c   : > { %p2367_p0 = pneg (%p3818_p11), %p2366_p13 }
  0x5d   : > { %p2373_p3 = por (%p3818_p11), %p2372_p2, %p2371_p1 }
  0x5f   : > { %p2374_p4 = pnand (%p3818_p11), %p2373_p3, %p2367_p0 }
  0x8d   : >> { %v2078_v36 = vpop.permute.xlu0 %2077  ;;  %v2088_v37 = vpop.permute.xlu1 %2087 }
  0x8e   : >> { %v2090_v48 = vunpack.i.h.bf16 %v2088_v37  ;;  %v2089_v49 = vunpack.i.l.bf16 %v2088_v37  ;;  %v2080_v58 = vunpack.i.h.bf16 %v2078_v36  ;;  %v2079_v59 = vunpack.i.l.bf16 %v2078_v36 }
  0x91   : >> { %v2083_v50 = vpop.permute.xlu0 %2082  ;;  %v2093_v51 = vpop.permute.xlu1 %2092 }
  0x92   : >> { %v2085_v54 = vunpack.i.h.bf16 %v2083_v50  ;;  %v2084_v55 = vunpack.i.l.bf16 %v2083_v50  ;;  %v2095_v56 = vunpack.i.h.bf16 %v2093_v51  ;;  %v2094_v57 = vunpack.i.l.bf16 %v2093_v51 }
  0x94   : >> { %v296_v61 = vsel %vm292_vm11, %v2090_v48, %v2095_v56  ;;  %v295_v62 = vsel %vm292_vm11, %v2089_v49, %v2094_v57  ;;  %v293_v63 = vsel %vm292_vm11, %v2079_v59, %v2084_v55  ;;  %v294_v16 = vsel %vm292_vm11, %v2080_v58, %v2085_v54 }
  0x95   : >> { %v2098_v17 = vpop.permute.xlu0 %2097  ;;  %v2103_v18 = vpop.permute.xlu1 %2102  ;;  %v1754_v24 = vpack.c.bf16 %v294_v16, %v293_v63  ;;  %v297_v37 = vsel %vm292_vm11, %v2084_v55, %v2079_v59  ;;  %v298_v51 = vsel %vm292_vm11, %v2085_v54, %v2080_v58  ;;  %v300_v55 = vsel %vm292_vm11, %v2095_v56, %v2090_v48 }
  0x96   : >> { %v2100_v28 = vunpack.i.h.bf16 %v2098_v17  ;;  %v2099_v36 = vunpack.i.l.bf16 %v2098_v17  ;;  %v2105_v25 = vunpack.i.h.bf16 %v2103_v18  ;;  %v2104_v23 = vunpack.i.l.bf16 %v2103_v18 }
  0x97   : >> { %1756 = vmatprep.subr.msk.bf16.mxu1 %vm3990_vm7, %v1754_v24  ;;  %v1757_v54 = vpack.c.bf16 %v298_v51, %v297_v37  ;;  %v299_v58 = vsel %vm292_vm11, %v2094_v57, %v2089_v49  ;;  %v1760_v59 = vpack.c.bf16 %v296_v61, %v295_v62  ;;  %vm3992_vm7 = vcmp.ge.s32.totalorder %v2789_v29, 1  ;;  %vm1764_vm11 = vmpackc.low %vm2956_vm8, %vm2946_vm13 }
  0x98   : >> { %v359_v16 = vsel %vm357_vm4, %v2100_v28, %v2105_v25  ;;  %v358_v41 = vsel %vm357_vm4, %v2099_v36, %v2104_v23  ;;  %vm2981_vm9 = vmpackc.low %vm3992_vm7, %vm3991_vm6  ;;  %v363_v49 = vsel %vm357_vm4, %v2105_v25, %v2100_v28  ;;  %v362_v62 = vsel %vm357_vm4, %v2104_v23, %v2099_v36 }
  0x99   : >> { %v2108_v48 = vpop.permute.xlu0 %2107  ;;  %v2113_v38 = vpop.permute.xlu1 %2112  ;;  %1759 = vmatpush1.bf16.msk.msra.mxu1 %vm1758_vm3, %v1757_v54  ;;  %v1766_v17 = vpack.c.bf16 %v359_v16, %v358_v41  ;;  %vm3995_vm3 = vcmp.ge.s32.totalorder %v2799_v31, 1  ;;  %v1763_v18 = vpack.c.bf16 %v300_v55, %v299_v58  ;;  %vm3958_vm6 = vcmp.lt.s32.totalorder %v2794_v30, 15 }
  0x9a   : >> { %v2110_v57 = vunpack.i.h.bf16 %v2108_v48  ;;  %v2109_v61 = vunpack.i.l.bf16 %v2108_v48  ;;  %1762 = vmatprep.subr.msk.bf16.mxu1 %vm1761_vm1, %v1760_v59  ;;  %v2115_v44 = vunpack.i.h.bf16 %v2113_v38  ;;  %v2114_v45 = vunpack.i.l.bf16 %v2113_v38  ;;  %vm3008_vm12 = vmpackc.low %vm3996_vm10, %vm3995_vm3 }
  0x9b   : >> { %vm398_vm7 = vcmp.lt.s32.totalorder %v2820_v35, 15  ;;  %vm3018_vm1 = vmpackc.low %vm3953_vm14, %vm3999_vm5  ;;  %vm3956_vm5 = vcmp.lt.s32.totalorder %v2816_v34, 15  ;;  %vm3954_vm10 = vcmp.lt.s32.totalorder %v2855_v42, 15  ;;  %v1769_v37 = vpack.c.bf16 %v363_v49, %v362_v62 }
  0x9c   : >> { %v361_v60 = vsel %vm357_vm4, %v2110_v57, %v2115_v44  ;;  %v360_v19 = vsel %vm357_vm4, %v2109_v61, %v2114_v45  ;;  %vm3031_vm3 = vmpackc.low %vm3952_vm0, %vm4002_vm15  ;;  %v365_v51 = vsel %vm357_vm4, %v2115_v44, %v2110_v57  ;;  %vm4005_vm15 = vcmp.lt.s32.totalorder %v2784_v27, 15 }
  0x9d   : >> { %v2118_v24 = vpop.permute.xlu0 %2117  ;;  %v2123_v28 = vpop.permute.xlu1 %2122  ;;  %1765 = vmatpush1.bf16.msk.msra.mxu1 %vm1764_vm11, %v1763_v18  ;;  %vm4006_vm0 = vcmp.ge.s32.totalorder %v2779_v26, 1  ;;  %v364_v59 = vsel %vm357_vm4, %v2114_v45, %v2109_v61  ;;  %v1772_v16 = vpack.c.bf16 %v361_v60, %v360_v19  ;;  %vm4009_vm8 = vcmp.ge.s32.totalorder %v2789_v29, 1 }
  0x9e   : >> { %v2120_v55 = vunpack.i.h.bf16 %v2118_v24  ;;  %v2119_v54 = vunpack.i.l.bf16 %v2118_v24  ;;  %vm3048_vm14 = vmand %vm4006_vm0, %vm4005_vm15  ;;  %1768 = vmatprep.subr.msk.bf16.mxu1 %vm2981_vm9, %v1766_v17  ;;  %v2125_v50 = vunpack.i.h.bf16 %v2123_v28  ;;  %v2124_v63 = vunpack.i.l.bf16 %v2123_v28 }
  0x9f   : >> { %vm3060_vm13 = vmand %vm4009_vm8, %vm3958_vm6  ;;  %vm4012_vm0 = vcmp.ge.s32.totalorder %v2799_v31, 1  ;;  %vm3955_vm4 = vcmp.lt.s32.totalorder %v2860_v43, 15  ;;  %vm4015_vm9 = vcmp.ge.s32.totalorder %v2811_v33, 1  ;;  %v1775_v62 = vpack.c.bf16 %v365_v51, %v364_v59 }
  0xa0   : >> { %vm3068_vm11 = vmand %vm4012_vm0, %vm3957_vm2  ;;  %v400_v38 = vsel %vm398_vm7, %v2120_v55, %v2125_v50  ;;  %v399_v56 = vsel %vm398_vm7, %v2119_v54, %v2124_v63  ;;  %v404_v17 = vsel %vm398_vm7, %v2125_v50, %v2120_v55  ;;  %vm4018_vm8 = vcmp.ge.s32.totalorder %v2837_v39, 1 }
  0xa1   : >> { %v2128_v49 = vpop.permute.xlu0 %2127  ;;  %v2133_v57 = vpop.permute.xlu1 %2132  ;;  %vm3081_vm15 = vmand %vm4015_vm9, %vm3956_vm5  ;;  %1771 = vmatpush1.bf16.msk.msra.mxu1 %vm3008_vm12, %v1769_v37  ;;  %v403_v60 = vsel %vm398_vm7, %v2124_v63, %v2119_v54  ;;  %v1778_v19 = vpack.c.bf16 %v400_v38, %v399_v56  ;;  %vm4021_vm12 = vcmp.ge.s32.totalorder %v2842_v40, 1 }
  0xa2   : >> { %v2130_v44 = vunpack.i.h.bf16 %v2128_v49  ;;  %v2129_v45 = vunpack.i.l.bf16 %v2128_v49  ;;  %vm3093_vm0 = vmand %vm4018_vm8, %vm3954_vm10  ;;  %1774 = vmatprep.subr.msk.bf16.mxu1 %vm3018_vm1, %v1772_v16  ;;  %v2135_v24 = vunpack.i.h.bf16 %v2133_v57  ;;  %v2134_v25 = vunpack.i.l.bf16 %v2133_v57 }
  0xa3   : >> { %vm3105_vm9 = vmand %vm4021_vm12, %vm3955_vm4  ;;  %vm3963_vm10 = vcmp.lt.s32.totalorder %v2889_v47, 15  ;;  %vm455_vm1 = vcmp.lt.s32.totalorder %v2820_v35, 1  ;;  %vm3962_vm4 = vcmp.lt.s32.totalorder %v2901_v53, 15  ;;  %v1781_v54 = vpack.c.bf16 %v404_v17, %v403_v60 }
  0xa4   : >> { %vm1779_vm8 = vmpackc.low %vm3060_vm13, %vm3048_vm14  ;;  %v402_v23 = vsel %vm398_vm7, %v2130_v44, %v2135_v24  ;;  %v401_v37 = vsel %vm398_vm7, %v2129_v45, %v2134_v25  ;;  %v406_v59 = vsel %vm398_vm7, %v2135_v24, %v2130_v44  ;;  %v405_v63 = vsel %vm398_vm7, %v2134_v25, %v2129_v45 }
  0xa5   : >> { %v2138_v51 = vpop.permute.xlu0 %2137  ;;  %v2143_v55 = vpop.permute.xlu1 %2142  ;;  %vm1782_vm12 = vmpackc.low %vm3081_vm15, %vm3068_vm11  ;;  %1777 = vmatpush1.bf16.msk.msra.mxu1 %vm3031_vm3, %v1775_v62  ;;  %v1784_v38 = vpack.c.bf16 %v402_v23, %v401_v37  ;;  %vm4024_vm3 = vcmp.ge.s32.totalorder %v2884_v46, 1  ;;  %vm4027_vm7 = vcmp.ge.s32.totalorder %v2896_v52, 1  ;;  %v1787_v44 = vpack.c.bf16 %v406_v59, %v405_v63 }
  0xa6   : >> { %v2140_v16 = vunpack.i.h.bf16 %v2138_v51  ;;  %v2139_v50 = vunpack.i.l.bf16 %v2138_v51  ;;  %vm1785_vm5 = vmpackc.low %vm3105_vm9, %vm3093_vm0  ;;  %1780 = vmatprep.subr.msk.bf16.mxu1 %vm1779_vm8, %v1778_v19  ;;  %v2145_v56 = vunpack.i.h.bf16 %v2143_v55  ;;  %v2144_v36 = vunpack.i.l.bf16 %v2143_v55 }
  0xa7   : >> { %vm3143_vm2 = vmand %vm4024_vm3, %vm3963_vm10  ;;  %vm4030_vm13 = vcmp.ge.s32.totalorder %v2784_v27, 1  ;;  %vm4031_vm11 = vcmp.ge.s32.totalorder %v2794_v30, 1  ;;  %vm4034_vm0 = vcmp.ge.s32.totalorder %v2855_v42, 1  ;;  %vm4035_vm9 = vcmp.ge.s32.totalorder %v2860_v43, 1 }
  0xa8   : >> { %vm3151_vm6 = vmand %vm4027_vm7, %vm3962_vm4  ;;  %v457_v58 = vsel %vm455_vm1, %v2140_v16, %v2145_v56  ;;  %v456_v57 = vsel %vm455_vm1, %v2139_v50, %v2144_v36  ;;  %v461_v45 = vsel %vm455_vm1, %v2145_v56, %v2140_v16  ;;  %v460_v24 = vsel %vm455_vm1, %v2144_v36, %v2139_v50 }
  0xa9   : >> { %v2148_v62 = vpop.permute.xlu0 %2147  ;;  %v2153_v17 = vpop.permute.xlu1 %2152  ;;  %1783 = vmatpush1.bf16.msk.msra.mxu1 %vm1782_vm12, %v1781_v54  ;;  %v1790_v25 = vpack.c.bf16 %v457_v58, %v456_v57  ;;  %vm1788_vm14 = vmpackc.low %vm3151_vm6, %vm3143_vm2  ;;  %v1793_v51 = vpack.c.bf16 %v461_v45, %v460_v24  ;;  %vm4032_vm6 = vcmp.ge.s32.totalorder %v2804_v32, 1  ;;  %vm4033_vm2 = vcmp.ge.s32.totalorder %v2816_v34, 1 }
  0xaa   : >> { %v2150_v60 = vunpack.i.h.bf16 %v2148_v62  ;;  %v2149_v19 = vunpack.i.l.bf16 %v2148_v62  ;;  %1786 = vmatprep.subr.msk.bf16.mxu1 %vm1785_vm5, %v1784_v38  ;;  %v2155_v23 = vunpack.i.h.bf16 %v2153_v17  ;;  %v2154_v37 = vunpack.i.l.bf16 %v2153_v17  ;;  %vm1791_vm15 = vmpackc.low %vm4031_vm11, %vm4030_vm13 }
  0xab   : >> { %vm1794_vm5 = vmpackc.low %vm4033_vm2, %vm4032_vm6  ;;  %vm4036_vm12 = vcmp.ge.s32.totalorder %v2889_v47, 1  ;;  %vm3960_vm7 = vcmp.lt.s32.totalorder %v2779_v26, 15  ;;  %vm3959_vm13 = vcmp.lt.s32.totalorder %v2789_v29, 15  ;;  %vm4038_vm11 = vcmp.lt.s32.totalorder %v2784_v27, 15 }
  0xac   : >> { %v459_v48 = vsel %vm455_vm1, %v2150_v60, %v2155_v23  ;;  %v458_v61 = vsel %vm455_vm1, %v2149_v19, %v2154_v37  ;;  %v463_v55 = vsel %vm455_vm1, %v2155_v23, %v2150_v60  ;;  %v462_v54 = vsel %vm455_vm1, %v2154_v37, %v2149_v19  ;;  %vm1797_vm8 = vmpackc.low %vm4035_vm9, %vm4034_vm0 }
  0xad   : >> { %v2158_v18 = vpop.permute.xlu0 %2157  ;;  %v2163_v28 = vpop.permute.xlu1 %2162  ;;  %1789 = vmatpush1.bf16.msk.msra.mxu1 %vm1788_vm14, %v1787_v44  ;;  %v1796_v59 = vpack.c.bf16 %v459_v48, %v458_v61  ;;  %v1799_v63 = vpack.c.bf16 %v463_v55, %v462_v54  ;;  %vm4037_vm1 = vcmp.ge.s32.totalorder %v2901_v53, 1  ;;  %vm504_vm14 = vcmp.lt.s32.totalorder %v2820_v35, 127 }
  0xae   : >> { %1792 = vmatprep.subr.msk.bf16.mxu1 %vm1791_vm15, %v1790_v25  ;;  %vm1800_vm3 = vmpackc.low %vm4037_vm1, %vm4036_vm12  ;;  %v2160_v38 = vunpack.i.h.bf16 %v2158_v18  ;;  %v2159_v56 = vunpack.i.l.bf16 %v2158_v18  ;;  %v2165_v36 = vunpack.i.h.bf16 %v2163_v28  ;;  %v2164_v49 = vunpack.i.l.bf16 %v2163_v28 }
  0xaf   : >> { %vm4039_vm15 = vcmp.lt.s32.totalorder %v2794_v30, 15  ;;  %vm4042_vm2 = vcmp.lt.s32.totalorder %v2804_v32, 15  ;;  %vm3961_vm9 = vcmp.lt.s32.totalorder %v2799_v31, 15  ;;  %vm4046_vm12 = vcmp.lt.s32.totalorder %v2855_v42, 15 }
  0xb0   : >> { %vm3212_vm6 = vmpackc.low %vm4039_vm15, %vm4038_vm11  ;;  %v510_v17 = vsel %vm504_vm14, %v2165_v36, %v2160_v38  ;;  %v509_v44 = vsel %vm504_vm14, %v2164_v49, %v2159_v56  ;;  %vm4047_vm1 = vcmp.lt.s32.totalorder %v2860_v43, 15  ;;  %vm4050_vm11 = vcmp.ge.s32.totalorder %v2784_v27, 1 }
  0xb1   : >> { %v2168_v16 = vpop.permute.xlu0 %2167  ;;  %v2173_v50 = vpop.permute.xlu1 %2172  ;;  %1795 = vmatpush1.bf16.msk.msra.mxu1 %vm1794_vm5, %v1793_v51  ;;  %vm4043_vm5 = vcmp.lt.s32.totalorder %v2816_v34, 15  ;;  %vm3245_vm15 = vmand %vm3960_vm7, %vm4050_vm11  ;;  %vm4056_vm11 = vcmp.ge.s32.totalorder %v2804_v32, 1  ;;  %v4057_v28 = vmov 0  ;;  %v506_v8 = vsel %vm504_vm14, %v2160_v38, %v2165_v36 }
  0xb2   : >> { %1798 = vmatprep.subr.msk.bf16.mxu1 %vm1797_vm8, %v1796_v59  ;;  %vm3223_vm0 = vmpackc.low %vm4043_vm5, %vm4042_vm2  ;;  %vm3965_vm8 = vcmp.lt.s32.totalorder %v2811_v33, 15  ;;  %v4052_v14 = vsel %vm3245_vm15, 4294967295, %v4051_v14  ;;  %vm3964_vm2 = vcmp.lt.s32.totalorder %v2837_v39, 15  ;;  %v2169_v45 = vunpack.i.l.bf16 %v2168_v16 }
  0xb3   : >> { %v2175_v60 = vunpack.i.h.bf16 %v2173_v50  ;;  %v2174_v19 = vunpack.i.l.bf16 %v2173_v50  ;;  %vm3286_vm7 = vmpackc.low %vm3962_vm4, %vm3963_vm10  ;;  %vm4061_vm5 = vcmp.ge.s32.totalorder %v2816_v34, 1  ;;  %vm4064_vm4 = vcmp.ge.s32.totalorder %v2855_v42, 1 }
  0xb4   : >> { %vm3308_vm10 = vmand %vm3964_vm2, %vm4064_vm4  ;;  %vm4067_vm4 = vcmp.ge.s32.totalorder %v2860_v43, 1  ;;  %vm4068_vm2 = vcmp.lt.s32.totalorder %v2842_v40, 15  ;;  %v4071_v36 = vpack.c.bf16 %v2534_v9, %v2542_v11  ;;  %vm4080_vm15 = vcmp.lt.s32.totalorder %v2804_v32, 15 }
  0xb5   : >> { %v3203_v41 = vpop.permute.xlu0 %2177  ;;  %v3205_v58 = vpop.permute.xlu1 %2182  ;;  %1801 = vmatpush1.bf16.msk.msra.mxu1 %vm1800_vm3, %v1799_v63  ;;  %vm3237_vm3 = vmpackc.low %vm4047_vm1, %vm4046_vm12  ;;  %vm4053_vm12 = vcmp.ge.s32.totalorder %v2794_v30, 1  ;;  %v4066_v10 = vsel %vm3308_vm10, 4294967295, %v4065_v10  ;;  %v507_v50 = vsel %vm504_vm14, %v2169_v45, %v2174_v19  ;;  %v511_v63 = vsel %vm504_vm14, %v2174_v19, %v2169_v45 }
  0xb6   : >> { %1803 = vmatprep.subr.bf16.mxu1 %v1802_v20  ;;  %v2170_v20 = vunpack.i.h.bf16 %v2168_v16  ;;  %vm3259_vm1 = vmand %vm3959_vm13, %vm4053_vm12  ;;  %v2180_v37 = vunpack.i.h.bf16 %v3203_v41  ;;  %v2179_v48 = vunpack.i.l.bf16 %v3203_v41  ;;  %v2185_v61 = vunpack.i.h.bf16 %v3205_v58 }
  0xb7   : >> { %v2184_v18 = vunpack.i.l.bf16 %v3205_v58  ;;  %vm3274_vm12 = vmand %vm3961_vm9, %vm4056_vm11  ;;  %vm3966_vm13 = vcmp.lt.s32.totalorder %v2820_v35, 113  ;;  %v4069_v16 = vmov 0  ;;  %vm4086_vm10 = vcmp.lt.s32.totalorder %v2811_v33, 15 }
  0xb8   : >> { %v4058_v28 = vsel %vm3274_vm12, 4294967295, %v4057_v28  ;;  %vm3294_vm11 = vmand %vm3965_vm8, %vm4061_vm5  ;;  %v508_v51 = vsel %vm504_vm14, %v2170_v20, %v2175_v60  ;;  %v512_v55 = vsel %vm504_vm14, %v2175_v60, %v2170_v20  ;;  %v551_v38 = vsel %vm3966_vm13, %v2185_v61, %v2180_v37 }
  0xb9   : >> { %v3251_v24 = vpop.permute.xlu0 %2187  ;;  %v3253_v25 = vpop.permute.xlu1 %2192  ;;  %1805 = vmatpush1.bf16.msra.mxu1 %v1804_v21  ;;  %v505_v21 = vsel %vm504_vm14, %v2159_v56, %v2164_v49  ;;  %vm3327_vm9 = vmand %vm4068_vm2, %vm4067_vm4  ;;  %v550_v56 = vsel %vm3966_vm13, %v2184_v18, %v2179_v48  ;;  %vm4072_vm2 = vcmp.lt.s32.totalorder %v2784_v27, 15  ;;  %vm4073_vm4 = vcmp.lt.s32.totalorder %v2779_v26, 15 }
  0xba   : >> { %1807 = vmatprep.subr.bf16.mxu1 %v1806_v22  ;;  %v1810_v22 = vpack.c.bf16 %v510_v17, %v509_v44  ;;  %v4070_v16 = vsel %vm3327_vm9, 4294967295, %v4069_v16  ;;  %vm3346_vm5 = vmand %vm4073_vm4, %vm4072_vm2  ;;  %v2190_v41 = vunpack.i.h.bf16 %v3251_v24  ;;  %v2189_v58 = vunpack.i.l.bf16 %v3251_v24 }
  0xbb   : >> { %v2195_v17 = vunpack.i.h.bf16 %v3253_v25  ;;  %v2194_v44 = vunpack.i.l.bf16 %v3253_v25  ;;  %vm4076_vm2 = vcmp.lt.s32.totalorder %v2794_v30, 15  ;;  %vm4077_vm4 = vcmp.lt.s32.totalorder %v2789_v29, 15 }
  0xbc   : >> { %vm3364_vm8 = vmand %vm4077_vm4, %vm4076_vm2  ;;  %v1813_v11 = vpack.c.bf16 %v506_v8, %v505_v21  ;;  %vm4081_vm14 = vcmp.lt.s32.totalorder %v2799_v31, 15  ;;  %vm3971_vm2 = vcmp.lt.s32.totalorder %v2896_v52, 15  ;;  %v1816_v30 = vpack.c.bf16 %v512_v55, %v511_v63  ;;  %v730_v8 = vld [vmem:[%s3931_s1 + $0x18] sm:$0xff] }
  0xbd   : >> { %v3319_v54 = vpop.permute.xlu0 %2197  ;;  %v3321_v59 = vpop.permute.xlu1 %2202  ;;  %1809 = vmatpush1.bf16.msra.mxu1 %v4071_v36  ;;  %vm3377_vm12 = vmand %vm4081_vm14, %vm4080_vm15  ;;  %v1819_v57 = vpack.c.bf16 %v508_v51, %v507_v50  ;;  %vm4084_vm4 = vcmp.lt.s32.totalorder %v2820_v35, 113  ;;  %v1822_v24 = vpack.c.bf16 %v551_v38, %v550_v56  ;;  %vm4090_vm14 = vcmp.ge.s32.totalorder %v2889_v47, 1 }
  0xbe   : >> { %1812 = vmatprep.subr.msk.bf16.mxu1 %vm3212_vm6, %v1810_v22  ;;  %v547_v20 = vsel %vm4084_vm4, %v2180_v37, %v2185_v61  ;;  %vm4085_vm6 = vcmp.lt.s32.totalorder %v2816_v34, 15  ;;  %vm4089_vm15 = vmmov %vm4084_vm4  ;;  %vm4091_vm4 = vcmp.lt.s32.totalorder %v2884_v46, 15  ;;  %v2200_v21 = vunpack.i.h.bf16 %v3319_v54  ;;  %v729_v34 = vld [vmem:[%s3931_s1 + $0x10] sm:$0xff] }
  0xbf   : >> { %vm3389_vm9 = vmand %vm4086_vm10, %vm4085_vm6  ;;  %v546_v19 = vsel %vm4089_vm15, %v2179_v48, %v2184_v18  ;;  %v2199_v22 = vunpack.i.l.bf16 %v3319_v54  ;;  %v2205_v51 = vunpack.i.h.bf16 %v3321_v59  ;;  %v2204_v55 = vunpack.i.l.bf16 %v3321_v59 }
  0xc0   : >> { %vm3401_vm13 = vmand %vm4091_vm4, %vm4090_vm14  ;;  %vm4099_vm14 = vcmp.lt.s32.totalorder %v2820_v35, 111  ;;  %v1825_v56 = vpack.c.bf16 %v547_v20, %v546_v19 }
  0xc1   : >> { %v2208_v45 = vpop.permute.xlu0 %2207  ;;  %v2213_v60 = vpop.permute.xlu1 %2212  ;;  %1815 = vmatpush1.bf16.msk.msra.mxu1 %vm3223_vm0, %v1813_v11  ;;  %vm4094_vm10 = vmmov %vm4089_vm15  ;;  %vm4096_vm0 = vcmp.ge.s32.totalorder %v2901_v53, 1 }
  0xc2   : >> { %v2210_v25 = vunpack.i.h.bf16 %v2208_v45  ;;  %v2209_v37 = vunpack.i.l.bf16 %v2208_v45  ;;  %v553_v61 = vsel %vm4094_vm10, %v2195_v17, %v2190_v41  ;;  %vm4095_vm6 = vmmov %vm4094_vm10  ;;  %1818 = vmatprep.subr.msk.bf16.mxu1 %vm3237_vm3, %v1816_v30  ;;  %v2215_v62 = vunpack.i.h.bf16 %v2213_v60 }
  0xc3   : >> { %v552_v48 = vsel %vm4095_vm6, %v2194_v44, %v2189_v58  ;;  %v2214_v18 = vunpack.i.l.bf16 %v2213_v60  ;;  %vm3415_vm15 = vmand %vm3971_vm2, %vm4096_vm0  ;;  %vm4106_vm2 = vcmp.lt.s32.totalorder %v2855_v42, 15  ;;  %v756_v42 = vld [vmem:[%s3931_s1 + $0xe8] sm:$0xff]  ;;  %v757_v60 = vld [vmem:[%s3931_s1 + $0xf0] sm:$0xff] }
  0xc4   : >> { %vm4100_vm4 = vmmov %vm4099_vm14 }
  0xc5   : >> { %v3427_v12 = vpop.permute.xlu0 %2217  ;;  %v2223_v50 = vpop.permute.xlu1 %2222  ;;  %v648_v63 = vsel %vm4099_vm14, %v2214_v18, %v2209_v37  ;;  %v649_v38 = vsel %vm4100_vm4, %v2215_v62, %v2210_v25  ;;  %vm4101_vm10 = vmmov %vm4100_vm4  ;;  %1821 = vmatpush1.bf16.msk.msra.mxu1 %vm3286_vm7, %v1819_v57  ;;  %vm4107_vm7 = vcmp.lt.s32.totalorder %v2837_v39, 15 }
  0xc6   : >> { %v644_v54 = vsel %vm4101_vm10, %v2209_v37, %v2214_v18  ;;  %vm4102_vm6 = vmmov %vm4100_vm4  ;;  %vm4103_vm4 = vcmp.lt.s32.totalorder %v2820_v35, 113  ;;  %vm4104_vm10 = vnez %v4052_v14  ;;  %v1846_v11 = vpack.c.bf16 %v649_v38, %v648_v63  ;;  %v732_v18 = vld [vmem:[%s3931_s1 + $0x28] sm:$0xff] }
  0xc7   : >> { %v645_v59 = vsel %vm4102_vm6, %v2210_v25, %v2215_v62  ;;  %v549_v36 = vsel %vm4103_vm4, %v2190_v41, %v2195_v17  ;;  %vm4105_vm6 = vmpackc.low %vm3259_vm1, %vm4104_vm10  ;;  %v1828_v41 = vpack.c.bf16 %v553_v61, %v552_v48  ;;  %vm4113_vm10 = vcmp.lt.s32.totalorder %v2860_v43, 15  ;;  %v740_v63 = vld [vmem:[%s3931_s1 + $0x68] sm:$0xff] }
  0xc8   : >> { %1824 = vmatprep.subr.msk.bf16.mxu1 %vm4105_vm6, %v1822_v24  ;;  %v1849_v30 = vpack.c.bf16 %v645_v59, %v644_v54  ;;  %vm3458_vm0 = vmand %vm4107_vm7, %vm4106_vm2  ;;  %vm4114_vm6 = vcmp.lt.s32.totalorder %v2842_v40, 15  ;;  %v2220_v17 = vunpack.i.h.bf16 %v3427_v12  ;;  %v2219_v20 = vunpack.i.l.bf16 %v3427_v12  ;;  %v741_v12 = vld [vmem:[%s3931_s1 + $0x70] sm:$0xff]  ;;  %v744_v38 = vld [vmem:[%s3931_s1 + $0x88] sm:$0xff] }
  0xc9   : >> { %vm4110_vm14 = vmmov %vm4103_vm4  ;;  %vm4111_vm4 = vcmp.lt.s32.totalorder %v2820_v35, 112  ;;  %v2228_v45 = vpop.permute.xlu0 %2227  ;;  %v2233_v43 = vpop.permute.xlu1 %2232  ;;  %vm4119_vm7 = vcmp.lt.s32.totalorder %v2884_v46, 15  ;;  %v739_v54 = vld [vmem:[%s3931_s1 + $0x60] sm:$0xff] }
  0xca   : >> { %v548_v57 = vsel %vm4110_vm14, %v2189_v58, %v2194_v44  ;;  %v608_v23 = vsel %vm4111_vm4, %v2205_v51, %v2200_v21  ;;  %vm4112_vm1 = vmmov %vm4111_vm4  ;;  %v2225_v58 = vunpack.i.h.bf16 %v2223_v50  ;;  %v2224_v44 = vunpack.i.l.bf16 %v2223_v50  ;;  %v736_v50 = vld [vmem:[%s3931_s1 + $0x48] sm:$0xff]  ;;  %v743_v59 = vld [vmem:[%s3931_s1 + $0x80] sm:$0xff] }
  0xcb   : >> { %v607_v14 = vsel %vm4112_vm1, %v2204_v55, %v2199_v22  ;;  %vm3472_vm3 = vmand %vm4114_vm6, %vm4113_vm10  ;;  %vm4118_vm14 = vcmp.lt.s32.totalorder %v2889_v47, 15  ;;  %vm4122_vm1 = vnez %v4058_v28  ;;  %v2230_v49 = vunpack.i.h.bf16 %v2228_v45 }
  0xcc   : >> { %vm4117_vm2 = vmpackc.low %vm3364_vm8, %vm3346_vm5  ;;  %v2229_v47 = vunpack.i.l.bf16 %v2228_v45  ;;  %v2235_v9 = vunpack.i.h.bf16 %v2233_v43  ;;  %v2234_v19 = vunpack.i.l.bf16 %v2233_v43  ;;  %vm4125_vm5 = vcmp.lt.s32.totalorder %v2901_v53, 15  ;;  %v758_v45 = vld [vmem:[%s3931_s1 + $0xf8] sm:$0xff] }
  0xcd   : >> { %1848 = vmatprep.subr.msk.bf16.mxu0 %vm4117_vm2, %v1846_v11  ;;  %vm3487_vm4 = vmand %vm4119_vm7, %vm4118_vm14  ;;  %vm4126_vm6 = vcmp.lt.s32.totalorder %v2896_v52, 15  ;;  %v1831_v28 = vpack.c.bf16 %v549_v36, %v548_v57  ;;  %vm4130_vm14 = vnez %v4070_v16  ;;  %vm4133_vm7 = vcmp.lt.s32.totalorder %v2779_v26, 15  ;;  %v742_v36 = vld [vmem:[%s3931_s1 + $0x78] sm:$0xff]  ;;  %v749_v57 = vld [vmem:[%s3931_s1 + $0xb0] sm:$0xff] }
  0xce   : >> { %vm4123_vm10 = vmpackc.low %vm3294_vm11, %vm4122_vm1  ;;  %vm4129_vm11 = vcmp.lt.s32.totalorder %v2820_v35, 112  ;;  %vm4134_vm1 = vcmp.lt.s32.totalorder %v2789_v29, 15  ;;  %v1834_v29 = vpack.c.bf16 %v608_v23, %v607_v14  ;;  %v746_v11 = vld [vmem:[%s3931_s1 + $0x98] sm:$0xff]  ;;  %v748_v23 = vld [vmem:[%s3931_s1 + $0xa8] sm:$0xff] }
  0xcf   : >> { %1827 = vmatpush1.bf16.msk.msra.mxu1 %vm4123_vm10, %v1825_v56  ;;  %vm4124_vm8 = vmpackc.low %vm3389_vm9, %vm3377_vm12  ;;  %v604_v32 = vsel %vm4129_vm11, %v2200_v21, %v2205_v51  ;;  %vm4131_vm9 = vnez %v4066_v10  ;;  %v734_v21 = vld [vmem:[%s3931_s1 + $0x38] sm:$0xff]  ;;  %v733_v51 = vld [vmem:[%s3931_s1 + $0x30] sm:$0xff] }
  0xd0   : >> { %1851 = vmatpush1.bf16.msk.msra.mxu0 %vm4124_vm8, %v1849_v30  ;;  %vm3505_vm2 = vmand %vm4126_vm6, %vm4125_vm5  ;;  %vm4135_vm8 = vcmp.lt.s32.totalorder %v2820_v35, 111  ;;  %v747_v56 = vld [vmem:[%s3931_s1 + $0xa0] sm:$0xff]  ;;  %v750_v30 = vld [vmem:[%s3931_s1 + $0xb8] sm:$0xff] }
  0xd1   : >> { %vm4132_vm12 = vmpackc.low %vm4130_vm14, %vm4131_vm9  ;;  %v647_v53 = vsel %vm4135_vm8, %v2230_v49, %v2235_v9  ;;  %vm4139_vm9 = vcmp.lt.s32.totalorder %v2820_v35, 112  ;;  %v727_v35 = vld [vmem:[%s3931_s1] sm:$0xff]  ;;  %v752_v14 = vld [vmem:[%s3931_s1 + $0xc8] sm:$0xff] }
  0xd2   : >> { %1830 = vmatprep.subr.msk.bf16.mxu1 %vm4132_vm12, %v1828_v41  ;;  %vm1835_vm10 = vmpackc.low %vm4134_vm1, %vm4133_vm7  ;;  %v603_v26 = vsel %vm4139_vm9, %v2199_v22, %v2204_v55  ;;  %v738_v22 = vld [vmem:[%s3931_s1 + $0x58] sm:$0xff]  ;;  %v737_v55 = vld [vmem:[%s3931_s1 + $0x50] sm:$0xff] }
  0xd3   : >> { %vm4136_vm5 = vmmov %vm4135_vm8  ;;  %vm4144_vm8 = vcmp.lt.s32.totalorder %v2811_v33, 15  ;;  %v1837_v48 = vpack.c.bf16 %v604_v32, %v603_v26  ;;  %v753_v41 = vld [vmem:[%s3931_s1 + $0xd0] sm:$0xff]  ;;  %v762_v43 = vld [vmem:[%s3931_s1 + $0x118] sm:$0xff] }
  0xd4   : >> { %v651_v27 = vsel %vm4136_vm5, %v2235_v9, %v2230_v49  ;;  %vm4137_vm6 = vmmov %vm4136_vm5  ;;  %v761_v49 = vld [vmem:[%s3931_s1 + $0x110] sm:$0xff]  ;;  %v760_v9 = vld [vmem:[%s3931_s1 + $0x108] sm:$0xff] }
  0xd5   : >> { %v646_v24 = vsel %vm4137_vm6, %v2229_v47, %v2234_v19  ;;  %vm4138_vm11 = vmmov %vm4136_vm5  ;;  %v767_v32 = vld [vmem:[%s3931_s1 + $0x140] sm:$0xff]  ;;  %v769_v26 = vld [vmem:[%s3931_s1 + $0x150] sm:$0xff] }
  0xd6   : >> { %v650_v16 = vsel %vm4138_vm11, %v2234_v19, %v2229_v47  ;;  %vm1853_vm14 = vmpackc.low %vm3472_vm3, %vm3458_vm0  ;;  %v1855_v25 = vpack.c.bf16 %v647_v53, %v646_v24  ;;  %vm4143_vm0 = vcmp.lt.s32.totalorder %v2799_v31, 15  ;;  %vm4149_vm11 = vcmp.lt.s32.totalorder %v2884_v46, 15  ;;  %v731_v46 = vld [vmem:[%s3931_s1 + $0x20] sm:$0xff]  ;;  %v765_v47 = vld [vmem:[%s3931_s1 + $0x130] sm:$0xff] }
  0xd7   : >> { %v1852_v10 = vpack.c.bf16 %v651_v27, %v650_v16  ;;  %vm1856_vm12 = vmpackc.low %vm3505_vm2, %vm3487_vm4  ;;  %vm4145_vm4 = vcmp.lt.s32.totalorder %v2837_v39, 15  ;;  %vm4146_vm2 = vcmp.lt.s32.totalorder %v2842_v40, 15  ;;  %v4151_v40 = vmov 0.0   ;;  %v764_v19 = vld [vmem:[%s3931_s1 + $0x128] sm:$0xff]  ;;  %v771_v53 = vld [vmem:[%s3931_s1 + $0x160] sm:$0xff] }
  0xd8   : >> { %vm4140_vm7 = vmmov %vm4139_vm9  ;;  %v766_v27 = vld [vmem:[%s3931_s1 + $0x138] sm:$0xff] }
  0xd9   : >> { %v610_v37 = vsel %vm4140_vm7, %v2225_v58, %v2220_v17  ;;  %vm4141_vm1 = vmmov %vm4140_vm7  ;;  %1854 = vmatprep.subr.msk.bf16.mxu0 %vm1853_vm14, %v1852_v10  ;;  %vm4150_vm14 = vcmp.lt.s32.totalorder %v2896_v52, 15  ;;  %v735_v52 = vld [vmem:[%s3931_s1 + $0x40] sm:$0xff]  ;;  %v770_v24 = vld [vmem:[%s3931_s1 + $0x158] sm:$0xff] }
  0xda   : >> { %v609_v61 = vsel %vm4141_vm1, %v2224_v44, %v2219_v20  ;;  %vm4142_vm3 = vmpackc.low %vm3415_vm15, %vm3401_vm13  ;;  %1857 = vmatpush1.bf16.msk.msra.mxu0 %vm1856_vm12, %v1855_v25  ;;  %vm847_vm13 = vcmask 261120   ;;  %v774_v16 = vld [vmem:[%s3931_s1 + $0x178] sm:$0xff]  ;;  %v772_v10 = vld [vmem:[%s3931_s1 + $0x168] sm:$0xff] }
  0xdb   : >> { %1833 = vmatpush1.bf16.msk.msra.mxu1 %vm4142_vm3, %v1831_v28  ;;  %vm1838_vm5 = vmpackc.low %vm4144_vm8, %vm4143_vm0  ;;  %v1840_v33 = vpack.c.bf16 %v610_v37, %v609_v61  ;;  %v763_v28 = vld [vmem:[%s3931_s1 + $0x120] sm:$0xff] }
  0xdc   : >> { %1836 = vmatprep.subr.msk.bf16.mxu1 %vm1835_vm10, %v1834_v29  ;;  %vm1841_vm6 = vmpackc.low %vm4146_vm2, %vm4145_vm4  ;;  %v773_v29 = vld [vmem:[%s3931_s1 + $0x170] sm:$0xff] }
  0xdd   : >> { %vm4147_vm15 = vmmov %vm4141_vm1  ;;  %1638 = vmatmul.mubr.msk.f32.vlgmr.msra.gmra.mrb[0].mxu0 %vm847_vm13, %v729_v34  ;;  %v679_v34 = vld [vmem:[%s3737_s8] sm:$0xff] }
  0xde   : >> { %v606_v62 = vsel %vm4147_vm15, %v2220_v17, %v2225_v58  ;;  %vm4148_vm10 = vmmov %vm4141_vm1  ;;  %1127 = vmatprep.mubr.f32.mxu0 %v4151_v40  ;;  %v751_v17 = vld [vmem:[%s3931_s1 + $0xc0] sm:$0xff] }
  0xdf   : >> { %v605_v31 = vsel %vm4148_vm10, %v2219_v20, %v2224_v44  ;;  %1839 = vmatpush1.bf16.msk.msra.mxu1 %vm1838_vm5, %v1837_v48  ;;  %vm1844_vm9 = vmpackc.low %vm4150_vm14, %vm4149_vm11  ;;  %v755_v20 = vld [vmem:[%s3931_s1 + $0xe0] sm:$0xff]  ;;  %v754_v44 = vld [vmem:[%s3931_s1 + $0xd8] sm:$0xff] }
  0xe0   : >> { %1842 = vmatprep.subr.msk.bf16.mxu1 %vm1841_vm6, %v1840_v33  ;;  %v1843_v39 = vpack.c.bf16 %v606_v62, %v605_v31  ;;  %v759_v58 = vld [vmem:[%s3931_s1 + $0x100] sm:$0xff] }
  0xe1   : >> { %1639 = vmatmul.mubr.msk.f32.gmra.mrb[2].mxu0 %vm847_vm13, %v732_v18  ;;  %v695_v18 = vunpack.c.l.bf16 %v679_v34 }
  0xe2   : >> { %1133 = vmatprep.mubr.f32.mxu0 %v4151_v40 }
  0xe3   : >> { %1845 = vmatpush1.bf16.msk.msra.mxu1 %vm1844_vm9, %v1843_v39 }
  0xe5   : >> { %1640 = vmatmul.mubr.msk.f32.gmra.mrb[4].mxu0 %vm847_vm13, %v735_v52  ;;  %v680_v52 = vld [vmem:[%s3737_s8 + $0x8] sm:$0xff] }
  0xe6   : >> { %961 = vmatmul.mubr.f32.vlgmr.msra.gmra.mrb[0].mxu1 %v727_v35  ;;  %1139 = vmatprep.mubr.f32.mxu0 %v4151_v40 }
  0xe7   : >> { %966 = vmatprep.mubr.f32.mxu1 %v731_v46 }
  0xe9   : >> { %1641 = vmatmul.mubr.msk.f32.gmra.mrb[6].mxu0 %vm847_vm13, %v738_v22  ;;  %v696_v22 = vunpack.c.h.bf16 %v679_v34 }
  0xea   : >> { %967 = vmatmul.mubr.f32.gmra.mrb[2].mxu1 %v730_v8  ;;  %1145 = vmatprep.mubr.f32.mxu0 %v4151_v40 }
  0xeb   : >> { %972 = vmatprep.mubr.f32.mxu1 %v734_v21 }
  0xed   : >> { %1642 = vmatmul.mubr.msk.f32.gmra.mrb[8].mxu0 %vm847_vm13, %v741_v12 }
  0xee   : >> { %973 = vmatmul.mubr.f32.gmra.mrb[4].mxu1 %v733_v51  ;;  %1151 = vmatprep.mubr.f32.mxu0 %v4151_v40 }
  0xef   : >> { %978 = vmatprep.mubr.f32.mxu1 %v737_v55 }
  0xf1   : >> { %1643 = vmatmul.mubr.msk.f32.gmra.mrb[10].mxu0 %vm847_vm13, %v744_v38  ;;  %v697_v38 = vunpack.c.l.bf16 %v680_v52 }
  0xf2   : >> { %979 = vmatmul.mubr.f32.gmra.mrb[6].mxu1 %v736_v50  ;;  %1157 = vmatprep.mubr.f32.mxu0 %v4151_v40  ;;  %v681_v50 = vld [vmem:[%s3737_s8 + $0x10] sm:$0xff] }
  0xf3   : >> { %984 = vmatprep.mubr.f32.mxu1 %v740_v63 }
  0xf5   : >> { %1644 = vmatmul.mubr.msk.f32.gmra.mrb[12].mxu0 %vm847_vm13, %v747_v56 }
  0xf6   : >> { %985 = vmatmul.mubr.f32.gmra.mrb[8].mxu1 %v739_v54  ;;  %1163 = vmatprep.mubr.f32.mxu0 %v4151_v40 }
  0xf7   : >> { %990 = vmatprep.mubr.f32.mxu1 %v743_v59  ;;  %v698_v59 = vunpack.c.h.bf16 %v680_v52  ;;  %v685_v52 = vld [vmem:[%s3737_s8 + $0x30] sm:$0xff] }
  0xf9   : >> { %1645 = vmatmul.mubr.msk.f32.gmra.mrb[14].mxu0 %vm847_vm13, %v750_v30 }
  0xfa   : >> { %991 = vmatmul.mubr.f32.gmra.mrb[10].mxu1 %v742_v36  ;;  %1169 = vmatprep.mubr.f32.mxu0 %v4151_v40 }
  0xfb   : >> { %996 = vmatprep.mubr.f32.mxu1 %v746_v11  ;;  %v682_v11 = vld [vmem:[%s3737_s8 + $0x18] sm:$0xff] }
  0xfd   : >> { %1646 = vmatmul.mubr.msk.f32.gmra.mrb[16].mxu0 %vm847_vm13, %v753_v41 }
  0xfe   : >> { %997 = vmatmul.mubr.f32.gmra.mrb[12].mxu1 %v745_v13  ;;  %1175 = vmatprep.mubr.f32.mxu0 %v4151_v40  ;;  %v699_v13 = vunpack.c.l.bf16 %v681_v50 }
  0xff   : >> { %1002 = vmatprep.mubr.f32.mxu1 %v749_v57 }
 0x101   : >> { %1647 = vmatmul.mubr.msk.f32.gmra.mrb[18].mxu0 %vm847_vm13, %v756_v42 }
 0x102   : >> { %1003 = vmatmul.mubr.f32.gmra.mrb[14].mxu1 %v748_v23  ;;  %1181 = vmatprep.mubr.f32.mxu0 %v4151_v40 }
 0x103   : >> { %1008 = vmatprep.mubr.f32.mxu1 %v752_v14  ;;  %v700_v14 = vunpack.c.h.bf16 %v681_v50 }
 0x105   : >> { %1648 = vmatmul.mubr.msk.f32.gmra.mrb[20].mxu0 %vm847_vm13, %v759_v58 }
 0x106   : >> { %1009 = vmatmul.mubr.f32.gmra.mrb[16].mxu1 %v751_v17  ;;  %1187 = vmatprep.mubr.f32.mxu0 %v4151_v40 }
 0x107   : >> { %1014 = vmatprep.mubr.f32.mxu1 %v755_v20  ;;  %v701_v20 = vunpack.c.l.bf16 %v682_v11 }
 0x109   : >> { %1649 = vmatmul.mubr.msk.f32.gmra.mrb[22].mxu0 %vm847_vm13, %v762_v43 }
 0x10a   : >> { %1015 = vmatmul.mubr.f32.gmra.mrb[18].mxu1 %v754_v44  ;;  %1193 = vmatprep.mubr.f32.mxu0 %v4151_v40  ;;  %v683_v44 = vld [vmem:[%s3737_s8 + $0x20] sm:$0xff] }
 0x10b   : >> { %1020 = vmatprep.mubr.f32.mxu1 %v758_v45 }
 0x10d   : >> { %1650 = vmatmul.mubr.msk.f32.gmra.mrb[24].mxu0 %vm847_vm13, %v765_v47 }
 0x10e   : >> { %1021 = vmatmul.mubr.f32.gmra.mrb[20].mxu1 %v757_v60  ;;  %1199 = vmatprep.mubr.f32.mxu0 %v4151_v40  ;;  %v702_v60 = vunpack.c.h.bf16 %v682_v11 }
 0x10f   : >> { %1026 = vmatprep.mubr.f32.mxu1 %v761_v49 }
 0x111   : >> { %1651 = vmatmul.mubr.msk.f32.gmra.mrb[26].mxu0 %vm847_vm13, %v768_v15 }
 0x112   : >> { %1027 = vmatmul.mubr.f32.gmra.mrb[22].mxu1 %v760_v9  ;;  %1205 = vmatprep.mubr.f32.mxu0 %v4151_v40 }
 0x113   : >> { %1032 = vmatprep.mubr.f32.mxu1 %v764_v19 }
 0x115   : >> { %1652 = vmatmul.mubr.msk.f32.gmra.mrb[28].mxu0 %vm847_vm13, %v771_v53 }
 0x116   : >> { %1033 = vmatmul.mubr.f32.gmra.mrb[24].mxu1 %v763_v28  ;;  %1211 = vmatprep.mubr.f32.mxu0 %v4151_v40 }
 0x117   : >> { %1038 = vmatprep.mubr.f32.mxu1 %v767_v32  ;;  %v703_v32 = vunpack.c.l.bf16 %v683_v44 }
 0x119   : >> { %1653 = vmatmul.mubr.msk.f32.gmra.mrb[30].mxu0 %vm847_vm13, %v774_v16 }
 0x11a   : >> { %1039 = vmatmul.mubr.f32.gmra.mrb[26].mxu1 %v766_v27 }
 0x11b   : >> { %1044 = vmatprep.mubr.f32.mxu1 %v770_v24 }
 0x11e   : >> { %1045 = vmatmul.mubr.f32.gmra.mrb[28].mxu1 %v769_v26  ;;  %v684_v26 = vld [vmem:[%s3737_s8 + $0x28] sm:$0xff] }
 0x11f   : >> { %1050 = vmatprep.mubr.f32.mxu1 %v773_v29 }
 0x122   : >> { %1051 = vmatmul.mubr.f32.gmra.mrb[30].mxu1 %v772_v10 }
 0x1b0   : >> { %v1123_v25 = vpop.f32.mrb[0].mxu0 }
 0x1b1   : >> { %v1125_v37 = vpop.f32.mrb[1].mxu0 }
 0x1b4   : >> { %v1129_v61 = vpop.f32.mrb[2].mxu0 }
 0x1b5   : >> { %v1131_v48 = vpop.f32.mrb[3].mxu0 }
 0x1b8   : >> { %v1135_v40 = vpop.f32.mrb[4].mxu0 }
 0x1b9   : >> { %v962_v62 = vpop.f32.mrb[0].mxu1  ;;  %v1137_v35 = vpop.f32.mrb[5].mxu0 }
 0x1ba   : >> { %v1124_v31 = vadd.f32 %v1123_v25, %v962_v62  ;;  %v964_v33 = vpop.f32.mrb[1].mxu1 }
 0x1bb   : >> { %v1126_v39 = vadd.f32 %v1125_v37, %v964_v33  ;;  %v704_v37 = vunpack.c.h.bf16 %v683_v44 }
 0x1bc   : >> { %v1141_v55 = vpop.f32.mrb[6].mxu0  ;;  %v1218_v12 = vadd.f32 %v1124_v31, %v695_v18 }
 0x1bd   : >> { %v968_v46 = vpop.f32.mrb[2].mxu1  ;;  %v1143_v63 = vpop.f32.mrb[7].mxu0  ;;  %v1219_v30 = vadd.f32 %v1126_v39, %v696_v22  ;;  %v705_v39 = vunpack.c.l.bf16 %v684_v26 }
 0x1be   : >> { %v1130_v8 = vadd.f32 %v1129_v61, %v968_v46  ;;  %v970_v21 = vpop.f32.mrb[3].mxu1  ;;  %v1654_v23 = vmul.f32 -1.442695, %v1218_v12  ;;  %v706_v46 = vunpack.c.h.bf16 %v684_v26 }
 0x1bf   : >> { %v1132_v51 = vadd.f32 %v1131_v48, %v970_v21  ;;  %v1655_v47 = vmul.f32 -1.442695, %v1219_v30 }
 0x1c0   : >> { %v1147_v41 = vpop.f32.mrb[8].mxu0  ;;  %v1220_v17 = vadd.f32 %v1130_v8, %v697_v38  ;;  %2236 = vpow2.f32 %v1654_v23  ;;  %v707_v38 = vunpack.c.l.bf16 %v685_v52 }
 0x1c1   : >> { %v974_v54 = vpop.f32.mrb[4].mxu1  ;;  %v1149_v42 = vpop.f32.mrb[9].mxu0  ;;  %v1221_v45 = vadd.f32 %v1132_v51, %v698_v59  ;;  %2238 = vpow2.f32 %v1655_v47 }
 0x1c2   : >> { %v1136_v56 = vadd.f32 %v1135_v40, %v974_v54  ;;  %v976_v36 = vpop.f32.mrb[5].mxu1  ;;  %v1656_v27 = vmul.f32 -1.442695, %v1220_v17 }
 0x1c3   : >> { %v1138_v57 = vadd.f32 %v1137_v35, %v976_v36  ;;  %v1657_v29 = vmul.f32 -1.442695, %v1221_v45  ;;  %v686_v45 = vld [vmem:[%s3737_s8 + $0x38] sm:$0xff] }
 0x1c4   : >> { %v1222_v9 = vadd.f32 %v1136_v56, %v699_v13  ;;  %v1153_v15 = vpop.f32.mrb[10].mxu0  ;;  %2240 = vpow2.f32 %v1656_v27  ;;  %v708_v56 = vunpack.c.h.bf16 %v685_v52  ;;  %v709_v27 = vunpack.c.l.bf16 %v686_v45 }
 0x1c5   : >> { %v980_v58 = vpop.f32.mrb[6].mxu1  ;;  %v1223_v28 = vadd.f32 %v1138_v57, %v700_v14  ;;  %v1155_v53 = vpop.f32.mrb[11].mxu0  ;;  %2242 = vpow2.f32 %v1657_v29 }
 0x1c6   : >> { %v1142_v43 = vadd.f32 %v1141_v55, %v980_v58  ;;  %v982_v49 = vpop.f32.mrb[7].mxu1  ;;  %v1658_v48 = vmul.f32 -1.442695, %v1222_v9 }
 0x1c7   : >> { %v1144_v19 = vadd.f32 %v1143_v63, %v982_v49  ;;  %v1659_v31 = vmul.f32 -1.442695, %v1223_v28 }
 0x1c8   : >> { %v1224_v24 = vadd.f32 %v1142_v43, %v701_v20  ;;  %v1159_v62 = vpop.f32.mrb[12].mxu0  ;;  %2244 = vpow2.f32 %v1658_v48 }
 0x1c9   : >> { %v986_v16 = vpop.f32.mrb[8].mxu1  ;;  %v1225_v10 = vadd.f32 %v1144_v19, %v702_v60  ;;  %v1161_v40 = vpop.f32.mrb[13].mxu0  ;;  %2246 = vpow2.f32 %v1659_v31 }
 0x1ca   : >> { %v1148_v25 = vadd.f32 %v1147_v41, %v986_v16  ;;  %v988_v61 = vpop.f32.mrb[9].mxu1  ;;  %v1660_v18 = vmul.f32 -1.442695, %v1224_v24  ;;  %v2237_v36 = vpop.eup %2236 }
 0x1cb   : >> { %v1150_v34 = vadd.f32 %v1149_v42, %v988_v61  ;;  %v1661_v8 = vmul.f32 -1.442695, %v1225_v10  ;;  %v2239_v20 = vpop.eup %2238  ;;  %v1274_v58 = vadd.f32 1.0, %v2237_v36  ;;  %v687_v61 = vld [vmem:[%s3737_s8 + $0x40] sm:$0xff] }
 0x1cc   : >> { %v1226_v33 = vadd.f32 %v1148_v25, %v703_v32  ;;  %v1165_v12 = vpop.f32.mrb[14].mxu0  ;;  %2248 = vpow2.f32 %v1660_v18 }
 0x1cd   : >> { %v992_v35 = vpop.f32.mrb[10].mxu1  ;;  %v1227_v21 = vadd.f32 %v1150_v34, %v704_v37  ;;  %v1167_v54 = vpop.f32.mrb[15].mxu0  ;;  %2250 = vpow2.f32 %v1661_v8  ;;  %v710_v37 = vunpack.c.h.bf16 %v686_v45  ;;  %v711_v8 = vunpack.c.l.bf16 %v687_v61 }
 0x1ce   : >> { %v1154_v22 = vadd.f32 %v1153_v15, %v992_v35  ;;  %v994_v51 = vpop.f32.mrb[11].mxu1  ;;  %v1662_v50 = vmul.f32 -1.442695, %v1226_v33  ;;  %v2241_v9 = vpop.eup %2240 }
 0x1cf   : >> { %v1156_v55 = vadd.f32 %v1155_v53, %v994_v51  ;;  %v1663_v11 = vmul.f32 -1.442695, %v1227_v21  ;;  %v2243_v32 = vpop.eup %2242  ;;  %v1275_v53 = vadd.f32 1.0, %v2239_v20  ;;  %v1276_v25 = vadd.f32 1.0, %v2241_v9 }
 0x1d0   : >> { %v1228_v63 = vadd.f32 %v1154_v22, %v705_v39  ;;  %v1171_v14 = vpop.f32.mrb[16].mxu0  ;;  %2252 = vpow2.f32 %v1662_v50  ;;  %v1277_v31 = vadd.f32 1.0, %v2243_v32  ;;  %v712_v21 = vunpack.c.h.bf16 %v687_v61  ;;  %v688_v50 = vld [vmem:[%s3737_s8 + $0x48] sm:$0xff]  ;;  %v691_v61 = vld [vmem:[%s3737_s8 + $0x60] sm:$0xff] }
 0x1d1   : >> { %v998_v59 = vpop.f32.mrb[12].mxu1  ;;  %v1229_v30 = vadd.f32 %v1156_v55, %v706_v46  ;;  %v1173_v17 = vpop.f32.mrb[17].mxu0  ;;  %2254 = vpow2.f32 %v1663_v11 }
 0x1d2   : >> { %v1160_v13 = vadd.f32 %v1159_v62, %v998_v59  ;;  %v1000_v57 = vpop.f32.mrb[13].mxu1  ;;  %v1664_v41 = vmul.f32 -1.442695, %v1228_v63  ;;  %v2245_v16 = vpop.eup %2244 }
 0x1d3   : >> { %v1162_v23 = vadd.f32 %v1161_v40, %v1000_v57  ;;  %v1665_v60 = vmul.f32 -1.442695, %v1229_v30  ;;  %v2247_v10 = vpop.eup %2246  ;;  %v1278_v18 = vadd.f32 1.0, %v2245_v16 }
 0x1d4   : >> { %v1230_v42 = vadd.f32 %v1160_v13, %v707_v38  ;;  %2256 = vpow2.f32 %v1664_v41  ;;  %v1177_v28 = vpop.f32.mrb[18].mxu0  ;;  %v1279_v52 = vadd.f32 1.0, %v2247_v10 }
 0x1d5   : >> { %v1231_v44 = vadd.f32 %v1162_v23, %v708_v56  ;;  %v1004_v43 = vpop.f32.mrb[14].mxu1  ;;  %v1179_v24 = vpop.f32.mrb[19].mxu0  ;;  %2258 = vrcp.f32 %v1274_v58  ;;  %v713_v23 = vunpack.c.l.bf16 %v688_v50 }
 0x1d6   : >> { %v1166_v49 = vadd.f32 %v1165_v12, %v1004_v43  ;;  %v1006_v47 = vpop.f32.mrb[15].mxu1  ;;  %v1666_v19 = vmul.f32 -1.442695, %v1230_v42  ;;  %2260 = vpow2.f32 %v1665_v60  ;;  %v2249_v62 = vpop.eup %2248  ;;  %v714_v60 = vunpack.c.h.bf16 %v688_v50 }
 0x1d7   : >> { %v1168_v15 = vadd.f32 %v1167_v54, %v1006_v47  ;;  %v1667_v26 = vmul.f32 -1.442695, %v1231_v44  ;;  %v2251_v40 = vpop.eup %2250  ;;  %v1280_v55 = vadd.f32 1.0, %v2249_v62 }
 0x1d8   : >> { %2262 = vpow2.f32 %v1666_v19  ;;  %v1183_v39 = vpop.f32.mrb[20].mxu0  ;;  %v1232_v35 = vadd.f32 %v1166_v49, %v709_v27  ;;  %v1281_v54 = vadd.f32 1.0, %v2251_v40 }
 0x1d9   : >> { %v1010_v29 = vpop.f32.mrb[16].mxu1  ;;  %2264 = vrcp.f32 %v1275_v53  ;;  %v1185_v46 = vpop.f32.mrb[21].mxu0  ;;  %v1233_v12 = vadd.f32 %v1168_v15, %v710_v37 }
 0x1da   : >> { %v1172_v48 = vadd.f32 %v1171_v14, %v1010_v29  ;;  %v1012_v34 = vpop.f32.mrb[17].mxu1  ;;  %2266 = vpow2.f32 %v1667_v26  ;;  %v2253_v51 = vpop.eup %2252  ;;  %v1668_v11 = vmul.f32 -1.442695, %v1232_v35  ;;  %v689_v14 = vld [vmem:[%s3737_s8 + $0x50] sm:$0xff] }
 0x1db   : >> { %v1174_v33 = vadd.f32 %v1173_v17, %v1012_v34  ;;  %2268 = vrcp.f32 %v1276_v25  ;;  %v2255_v36 = vpop.eup %2254  ;;  %v1322_v57 = vadd.f32 1.0, %v2253_v51  ;;  %v1669_v17 = vmul.f32 -1.442695, %v1233_v12 }
 0x1dc   : >> { %2270 = vrcp.f32 %v1277_v31  ;;  %v1189_v56 = vpop.f32.mrb[22].mxu0  ;;  %v1234_v41 = vadd.f32 %v1172_v48, %v711_v8  ;;  %v1323_v43 = vadd.f32 1.0, %v2255_v36  ;;  %v715_v15 = vunpack.c.l.bf16 %v689_v14 }
 0x1dd   : >> { %v1016_v22 = vpop.f32.mrb[18].mxu1  ;;  %2272 = vrcp.f32 %v1278_v18  ;;  %v1191_v30 = vpop.f32.mrb[23].mxu0  ;;  %v1235_v20 = vadd.f32 %v1174_v33, %v712_v21  ;;  %v716_v10 = vunpack.c.h.bf16 %v689_v14 }
 0x1de   : >> { %v1178_v63 = vadd.f32 %v1177_v28, %v1016_v22  ;;  %v1018_v38 = vpop.f32.mrb[19].mxu1  ;;  %v2257_v13 = vpop.eup %2256  ;;  %2274 = vrcp.f32 %v1279_v52  ;;  %v1670_v53 = vmul.f32 -1.442695, %v1234_v41  ;;  %v719_v22 = vunpack.c.l.bf16 %v691_v61 }
 0x1df   : >> { %v1180_v59 = vadd.f32 %v1179_v24, %v1018_v38  ;;  %2276 = vrcp.f32 %v1280_v55  ;;  %v3750_v45 = vpop.eup %2258  ;;  %v1324_v19 = vadd.f32 1.0, %v2257_v13  ;;  %v690_v24 = vld [vmem:[%s3737_s8 + $0x58] sm:$0xff]  ;;  %v1671_v29 = vmul.f32 -1.442695, %v1235_v20  ;;  %v692_v55 = vld [vmem:[%s3737_s8 + $0x68] sm:$0xff] }
 0x1e0   : >> { %2278 = vrcp.f32 %v1281_v54  ;;  %v1195_v47 = vpop.f32.mrb[24].mxu0  ;;  %v2261_v9 = vpop.eup %2260  ;;  %v1236_v27 = vadd.f32 %v1178_v63, %v713_v23  ;;  %v717_v35 = vunpack.c.l.bf16 %v690_v24  ;;  %v718_v21 = vunpack.c.h.bf16 %v690_v24 }
 0x1e1   : >> { %v1022_v42 = vpop.f32.mrb[20].mxu1  ;;  %2280 = vpow2.f32 %v1668_v11  ;;  %v1197_v28 = vpop.f32.mrb[25].mxu0  ;;  %v1325_v34 = vadd.f32 1.0, %v2261_v9  ;;  %v1237_v62 = vadd.f32 %v1180_v59, %v714_v60  ;;  %v720_v38 = vunpack.c.h.bf16 %v691_v61 }
 0x1e2   : >> { %v1184_v58 = vadd.f32 %v1183_v39, %v1022_v42  ;;  %v1024_v44 = vpop.f32.mrb[21].mxu1  ;;  %v2263_v32 = vpop.eup %2262  ;;  %2282 = vrcp.f32 %v1322_v57  ;;  %v1672_v8 = vmul.f32 -1.442695, %v1236_v27  ;;  %v721_v41 = vunpack.c.l.bf16 %v692_v55 }
 0x1e3   : >> { %v1186_v49 = vadd.f32 %v1185_v46, %v1024_v44  ;;  %v3753_v26 = vpop.eup %2264  ;;  %2284 = vpow2.f32 %v1669_v17  ;;  %v1326_v40 = vadd.f32 1.0, %v2263_v32  ;;  %v722_v27 = vunpack.c.h.bf16 %v692_v55 }
 0x1e4   : >> { %v2267_v48 = vpop.eup %2266  ;;  %2286 = vrcp.f32 %v1323_v43  ;;  %v1201_v33 = vpop.f32.mrb[26].mxu0  ;;  %v1238_v18 = vadd.f32 %v1184_v58, %v715_v15 }
 0x1e5   : >> { %v1028_v16 = vpop.f32.mrb[22].mxu1  ;;  %v3756_v39 = vpop.eup %2268  ;;  %2288 = vrcp.f32 %v1324_v19  ;;  %v1327_v50 = vadd.f32 1.0, %v2267_v48  ;;  %v1239_v36 = vadd.f32 %v1186_v49, %v716_v10  ;;  %v693_v49 = vld [vmem:[%s3737_s8 + $0x70] sm:$0xff] }
 0x1e6   : >> { %v1190_v25 = vadd.f32 %v1189_v56, %v1028_v16  ;;  %v1030_v37 = vpop.f32.mrb[23].mxu1  ;;  %v1203_v46 = vpop.f32.mrb[27].mxu0  ;;  %2290 = vpow2.f32 %v1670_v53  ;;  %v1673_v56 = vmul.f32 -1.442695, %v1237_v62  ;;  %v1674_v57 = vmul.f32 -1.442695, %v1238_v18 }
 0x1e7   : >> { %v1192_v31 = vadd.f32 %v1191_v30, %v1030_v37  ;;  %v3758_v52 = vpop.eup %2270  ;;  %2292 = vpow2.f32 %v1671_v29  ;;  %v1675_v9 = vmul.f32 -1.442695, %v1239_v36  ;;  %v723_v10 = vunpack.c.l.bf16 %v693_v49  ;;  %v694_v62 = vld [vmem:[%s3737_s8 + $0x78] sm:$0xff] }
 0x1e8   : >> { %v3761_v12 = vpop.eup %2272  ;;  %2294 = vrcp.f32 %v1325_v34  ;;  %v1207_v30 = vpop.f32.mrb[28].mxu0  ;;  %v1240_v58 = vadd.f32 %v1190_v25, %v717_v35 }
 0x1e9   : >> { %v1034_v51 = vpop.f32.mrb[24].mxu1  ;;  %v3763_v59 = vpop.eup %2274  ;;  %2296 = vrcp.f32 %v1326_v40  ;;  %v1241_v19 = vadd.f32 %v1192_v31, %v718_v21 }
 0x1ea   : >> { %v1196_v63 = vadd.f32 %v1195_v47, %v1034_v51  ;;  %v1036_v54 = vpop.f32.mrb[25].mxu1  ;;  %v3765_v13 = vpop.eup %2276  ;;  %2298 = vpow2.f32 %v1672_v8  ;;  %v1676_v61 = vmul.f32 -1.442695, %v1240_v58 }
 0x1eb   : >> { %v1198_v11 = vadd.f32 %v1197_v28, %v1036_v54  ;;  %v1209_v23 = vpop.f32.mrb[29].mxu0  ;;  %v3767_v14 = vpop.eup %2278  ;;  %2300 = vrcp.f32 %v1327_v50 }
 0x1ec   : >> { %v1242_v42 = vadd.f32 %v1196_v63, %v719_v22  ;;  %v2281_v20 = vpop.eup %2280  ;;  %2302 = vpow2.f32 %v1673_v56  ;;  %v1213_v28 = vpop.f32.mrb[30].mxu0  ;;  %v725_v22 = vunpack.c.l.bf16 %v694_v62 }
 0x1ed   : >> { %v1040_v17 = vpop.f32.mrb[26].mxu1  ;;  %v1243_v44 = vadd.f32 %v1198_v11, %v720_v38  ;;  %v2283_v47 = vpop.eup %2282  ;;  %2304 = vpow2.f32 %v1674_v57  ;;  %v1328_v29 = vadd.f32 1.0, %v2281_v20  ;;  %v726_v38 = vunpack.c.h.bf16 %v694_v62 }
 0x1ee   : >> { %v1202_v43 = vadd.f32 %v1201_v33, %v1040_v17  ;;  %v1042_v60 = vpop.f32.mrb[27].mxu1  ;;  %v2285_v32 = vpop.eup %2284  ;;  %2306 = vtanh.f32 %v1242_v42  ;;  %v1677_v33 = vmul.f32 -1.442695, %v1241_v19 }
 0x1ef   : >> { %v1204_v15 = vadd.f32 %v1203_v46, %v1042_v60  ;;  %v1215_v24 = vpop.f32.mrb[31].mxu0  ;;  %v2287_v16 = vpop.eup %2286  ;;  %2308 = vtanh.f32 %v1243_v44  ;;  %v724_v46 = vunpack.c.h.bf16 %v693_v49  ;;  %v1329_v50 = vadd.f32 1.0, %v2285_v32 }
 0x1f0   : >> { %v1244_v53 = vadd.f32 %v1202_v43, %v721_v41  ;;  %v2289_v37 = vpop.eup %2288  ;;  %2310 = vpow2.f32 %v1675_v9  ;;  %v1402_v43 = vmul.f32 %v2526_v7, %v2283_v47  ;;  %v1403_v9 = vmul.f32 %v2522_v6, %v2287_v16 }
 0x1f1   : >> { %v1046_v25 = vpop.f32.mrb[28].mxu1  ;;  %v2291_v31 = vpop.eup %2290  ;;  %v1245_v35 = vadd.f32 %v1204_v15, %v722_v27  ;;  %v1404_v27 = vmul.f32 %v2518_v5, %v2289_v37 }
 0x1f2   : >> { %v1208_v48 = vadd.f32 %v1207_v30, %v1046_v25  ;;  %v1048_v34 = vpop.f32.mrb[29].mxu1  ;;  %v2293_v18 = vpop.eup %2292  ;;  %2312 = vtanh.f32 %v1244_v53  ;;  %v1370_v36 = vadd.f32 1.0, %v2291_v31 }
 0x1f3   : >> { %v1210_v40 = vadd.f32 %v1209_v23, %v1048_v34  ;;  %v2295_v8 = vpop.eup %2294  ;;  %2314 = vrcp.f32 %v1328_v29  ;;  %v1371_v58 = vadd.f32 1.0, %v2293_v18 }
 0x1f4   : >> { %v1246_v21 = vadd.f32 %v1208_v48, %v723_v10  ;;  %v2297_v55 = vpop.eup %2296  ;;  %2316 = vpow2.f32 %v1676_v61  ;;  %v1405_v37 = vmul.f32 %v2514_v4, %v2295_v8 }
 0x1f5   : >> { %v1052_v51 = vpop.f32.mrb[30].mxu1  ;;  %v2299_v56 = vpop.eup %2298  ;;  %2318 = vpow2.f32 %v1677_v33  ;;  %v1247_v57 = vadd.f32 %v1210_v40, %v724_v46  ;;  %v1406_v48 = vmul.f32 %v2510_v3, %v2297_v55 }
 0x1f6   : >> { %v1214_v63 = vadd.f32 %v1213_v28, %v1052_v51  ;;  %v1054_v54 = vpop.f32.mrb[31].mxu1  ;;  %v2301_v30 = vpop.eup %2300  ;;  %2320 = vtanh.f32 %v1245_v35  ;;  %v1372_v28 = vadd.f32 1.0, %v2299_v56 }
 0x1f7   : >> { %v1216_v11 = vadd.f32 %v1215_v24, %v1054_v54  ;;  %v2303_v41 = vpop.eup %2302  ;;  %2322 = vtanh.f32 %v1246_v21 }
 0x1f8   : >> { %v1248_v23 = vadd.f32 %v1214_v63, %v725_v22  ;;  %v2305_v42 = vpop.eup %2304  ;;  %2324 = vrcp.f32 %v1329_v50  ;;  %v1373_v29 = vadd.f32 1.0, %v2303_v41 }
 0x1f9   : >> { %v1249_v17 = vadd.f32 %v1216_v11, %v726_v38  ;;  %v2307_v20 = vpop.eup %2306  ;;  %2326 = vrcp.f32 %v1370_v36 }
 0x1fa   : >> { %v2309_v44 = vpop.eup %2308  ;;  %v1410_v60 = vmul.f32 %v2307_v20, %v3750_v45  ;;  %2328 = vtanh.f32 %v1247_v57 }
 0x1fb   : >> { %v2311_v49 = vpop.eup %2310  ;;  %v1411_v19 = vmul.f32 %v2309_v44, %v3753_v26  ;;  %2330 = vtanh.f32 %v1248_v23  ;;  %v1374_v26 = vadd.f32 1.0, %v2305_v42 }
 0x1fc   : >> { %v2313_v15 = vpop.eup %2312  ;;  %v3775_v7 = vadd.f32 %v1410_v60, %v1402_v43   ;;  %2332 = vtanh.f32 %v1249_v17  ;;  %v1375_v10 = vadd.f32 1.0, %v2311_v49 }
 0x1fd   : >> { %v2315_v53 = vpop.eup %2314  ;;  %2334 = vrcp.f32 %v1371_v58  ;;  %v3778_v6 = vadd.f32 %v1411_v19, %v1403_v9   ;;  %v1412_v45 = vmul.f32 %v2313_v15, %v3756_v39 }
 0x1fe   : >> { %v4152_v32 = vmov %v3775_v7  ;;  %v2317_v24 = vpop.eup %2316  ;;  %v1408_v8 = vmul.f32 %v2502_v1, %v2315_v53 }
 0x1ff   : >> { %v4153_v47 = vmov %v3778_v6  ;;  %2336 = vtanh.f32 %v4152_v32  ;;  %v2319_v16 = vpop.eup %2318  ;;  %v3783_v5 = vadd.f32 %v1412_v45, %v1404_v27   ;;  %1453 = vst [vmem:[%s2669_s16] sm:$0xff] (%p3818_p11), %v4152_v32 }
 0x200   : >> { %2338 = vtanh.f32 %v4153_v47  ;;  %v2321_v7 = vpop.eup %2320  ;;  %v1377_v40 = vadd.f32 1.0, %v2319_v16  ;;  %1454 = vst [vmem:[%s2669_s16 + $0x8] sm:$0xff] (%p3818_p11), %v4153_v47 }
 0x201   : >> { %v4154_v25 = vmov %v3783_v5  ;;  %2340 = vrcp.f32 %v1372_v28  ;;  %v2323_v61 = vpop.eup %2322  ;;  %v1413_v6 = vmul.f32 %v2321_v7, %v3758_v52  ;;  %v1376_v5 = vadd.f32 1.0, %v2317_v24 }
 0x202   : >> { %2342 = vtanh.f32 %v4154_v25  ;;  %v2325_v39 = vpop.eup %2324  ;;  %v1414_v34 = vmul.f32 %v2323_v61, %v3761_v12  ;;  %v1407_v52 = vmul.f32 %v2506_v2, %v2301_v30  ;;  %v4166_v7 = vmov %v4152_v32  ;;  %1455 = vst [vmem:[%s2669_s16 + $0x10] sm:$0xff] (%p3818_p11), %v4154_v25 }
 0x203   : >> { %2344 = vrcp.f32 %v1373_v29  ;;  %v2327_v62 = vpop.eup %2326  ;;  %v3790_v4 = vadd.f32 %v1413_v6, %v1405_v37   ;;  %v1409_v22 = vmul.f32 %v2498_v0, %v2325_v39  ;;  %v4165_v6 = vmov %v4153_v47 }
 0x204   : >> { %2346 = vrcp.f32 %v1374_v26  ;;  %v2329_v33 = vpop.eup %2328  ;;  %v3792_v3 = vadd.f32 %v1414_v34, %v1406_v48  }
 0x205   : >> { %v4155_v31 = vmov %v3790_v4  ;;  %2348 = vrcp.f32 %v1375_v10  ;;  %v2331_v35 = vpop.eup %2330  ;;  %v1415_v46 = vmul.f32 %v2329_v33, %v3763_v59 }
 0x206   : >> { %v4156_v18 = vmov %v3792_v3  ;;  %2350 = vtanh.f32 %v4155_v31  ;;  %v2333_v12 = vpop.eup %2332  ;;  %v1416_v4 = vmul.f32 %v2331_v35, %v3765_v13  ;;  %1456 = vst [vmem:[%s2669_s16 + $0x18] sm:$0xff] (%p3818_p11), %v4155_v31 }
 0x207   : >> { %2352 = vtanh.f32 %v4156_v18  ;;  %v2335_v21 = vpop.eup %2334  ;;  %v3802_v2 = vadd.f32 %v1415_v46, %v1407_v52   ;;  %v1417_v3 = vmul.f32 %v2333_v12, %v3767_v14  ;;  %1457 = vst [vmem:[%s2669_s16 + $0x20] sm:$0xff] (%p3818_p11), %v4156_v18 }
 0x208   : >> { %2354 = vrcp.f32 %v1376_v5  ;;  %v1424_v59 = vadd.f32 %v1416_v4, %v1408_v8   ;;  %v4163_v4 = vmov %v4155_v31  ;;  %v4164_v5 = vmov %v4154_v25 }
 0x209   : >> { %v4157_v51 = vmov %v3802_v2  ;;  %v2337_v55 = vpop.eup %2336  ;;  %2356 = vrcp.f32 %v1377_v40  ;;  %v1425_v50 = vadd.f32 %v1417_v3, %v1409_v22   ;;  %v4162_v3 = vmov %v4156_v18 }
 0x20a   : >> { %v2339_v1 = vpop.eup %2338  ;;  %v1434_v15 = vmul.f32 %v2337_v55, %v2327_v62   ;;  %2358 = vtanh.f32 %v4157_v51  ;;  %1458 = vst [vmem:[%s2669_s16 + $0x28] sm:$0xff] (%p3818_p11), %v4157_v51  ;;  %1459 = vst [vmem:[%s2669_s16 + $0x30] sm:$0xff] (%p3818_p11), %v1424_v59 }
 0x20b   : >> { %v2341_v13 = vpop.eup %2340  ;;  %v1435_v14 = vmul.f32 %v2339_v1, %v2335_v21   ;;  %2360 = vtanh.f32 %v1424_v59  ;;  %v4160_v1 = vmov %v1424_v59  ;;  %1460 = vst [vmem:[%s2669_s16 + $0x38] sm:$0xff] (%p3818_p11), %v1425_v50 }
 0x20c   : >> { %v2343_v0 = vpop.eup %2342  ;;  %1445 = vst [vmem:[%s3806_s10] sm:$0xff] %v1434_v15  ;;  %2362 = vtanh.f32 %v1425_v50 }
 0x20d   : >> { %v2345_v2 = vpop.eup %2344  ;;  %1446 = vst [vmem:[%s3806_s10 + $0x8] sm:$0xff] %v1435_v14  ;;  %v1436_v13 = vmul.f32 %v2343_v0, %v2341_v13   ;;  %v4159_v0 = vmov %v1425_v50 }
 0x20e   : >> { %v2347_v63 = vpop.eup %2346 }
 0x20f   : >> { %v2349_v38 = vpop.eup %2348  ;;  %1447 = vst [vmem:[%s3806_s10 + $0x10] sm:$0xff] %v1436_v13 }
 0x210   : >> { %v2351_v54 = vpop.eup %2350 }
 0x211   : >> { %v2353_v56 = vpop.eup %2352  ;;  %v1437_v12 = vmul.f32 %v2351_v54, %v2345_v2   ;;  %v4161_v2 = vmov %v4157_v51 }
 0x212   : >> { %v2355_v36 = vpop.eup %2354  ;;  %v1438_v11 = vmul.f32 %v2353_v56, %v2347_v63  }
 0x213   : >> { %v2357_v30 = vpop.eup %2356  ;;  %1448 = vst [vmem:[%s3806_s10 + $0x18] sm:$0xff] %v1437_v12  ;;  %240 = sbr.rel (!%p3818_p11) target bundleno = 25 (0x19), region = 92 }
 0x214   : >> { %v2359_v57 = vpop.eup %2358  ;;  %1449 = vst [vmem:[%s3806_s10 + $0x20] sm:$0xff] %v1438_v11 }
 0x215   : >> { %v2361_v41 = vpop.eup %2360  ;;  %v1439_v10 = vmul.f32 %v2359_v57, %v2349_v38  }
 0x216   : >> { %v2363_v23 = vpop.eup %2362  ;;  %v1440_v9 = vmul.f32 %v2361_v41, %v2355_v36  }
 0x217   : >> { %1450 = vst [vmem:[%s3806_s10 + $0x28] sm:$0xff] %v1439_v10  ;;  %v1441_v8 = vmul.f32 %v2363_v23, %v2357_v30  }
 0x218   : >> { %1451 = vst [vmem:[%s3806_s10 + $0x30] sm:$0xff] %v1440_v9 }
 0x219   : >> { %1452 = vst [vmem:[%s3806_s10 + $0x38] sm:$0xff] %v1441_v8 }
 0x21a   : > { %2377 = shalt.err (!%p2374_p4)
}
 0x21b   : > { %s2378_s30 = scalar_lea.hbm %s3882_s13, 1024  ;;  %s2382_s8 = scalar_lea.hbm %s3935_s5, 2048 }
 0x21c   : > { %p2379_p7 = scmp.ne.s32.totalorder %s3882_s13, %s2378_s30  ;;  %p2383_p10 = scmp.lt.u32.totalorder %s3882_s13, %s3935_s5 }
 0x21d   : > { %p2384_p11 = scmp.lt.u32.totalorder %s2382_s8, %s2378_s30  ;;  %p2386_p13 = scmp.lt.u32.totalorder %s2378_s30, %s3882_s13 }
 0x21e   : > { %p2380_p8 = pnand %p2379_p7, %p2644_p5 }
 0x21f   : > { %p2385_p12 = por %p2384_p11, %p2383_p10 }
 0x220   : > { %p2381_p9 = pneg %p2380_p8 }
 0x221   : > { %p2387_p0 = por %p2386_p13, %p2385_p12 }
 0x223   : > { %p2388_p1 = pnand %p2387_p0, %p2381_p9 }
 0x225   : > { %2391 = shalt.err (!%p2388_p1)
}
 0x226   : > { %s2574_s11 = smov 256   ;;  %s2575_s12 = smov 16  }
 0x227   : > { %1890 = dma.vmem_to_hbm [thread:$0]  (%p2644_p5), %s3885_s14, 1024, %s3882_s13, %s3889_s23, %s2574_s11, %s2574_s11, %s2575_s12  }
 0x228 PF: > { %p1896_p2 = scmp.ge.s32.totalorder %s2494_s21, 2  ;;  %s1506_s15 = sand.u32 1, %s2482_s18  }
 0x229   : > { %s1507_s17 = scalar_lea.sflag [#allocation4], %s1506_s15 }
 0x22a   : > { %p1893_p3 = pnand %p1896_p2, %p2648_p6 }
 0x22c   : > { %2477 = dma.done.wait (!%p1893_p3), %s1507_s17, 1024  }
 0x22d   : > { %2479 = vsyncadd (!%p1893_p3), %s1507_s17, 4294966272  ;;  %p16_p4 = scmp.ge.s32.totalorder %s2631_s24, 4   ;;  %s4167_s18 = smov %s2486_s19 }
 0x22e   : > { %s4168_s19 = smov %s2490_s20  ;;  %s4169_s20 = smov %s2642_s27 }
 0x22f   : > { %s4170_s21 = smov %s2631_s24  ;;  %18 = sbr.rel (!%p16_p4) target bundleno = 3 (0x3), region = 103 }
 0x236   :  { %1512 = vsyncpa [#allocation4], 1 }
 0x237   :  { %1514 = vsyncpa [#allocation4 + $0x1], 1 }

// kernel: _lambda_.3
= control target key start
LH: loop header
LB: loop body
LE: loop exit
PB: predicated region body
PF: predicated region fallthrough
CT: control target
= control target key end

     0   :  { %s2494_s18 = smov 0   ;;  %s3727_s0 = inlined_call_operand.vmem [shape: bf16[2,8,128,256], index: 0, kind: input, shape index: {}]   ;;  %s3728_s1 = inlined_call_operand.vmem [shape: f32[128,288], index: 1, kind: input, shape index: {}]   ;;  %s3729_s2 = inlined_call_operand.vmem [shape: s32[32,256], index: 2, kind: input, shape index: {}]   ;;  %s3730_s3 = inlined_call_operand.vmem [shape: s32[32,256], index: 3, kind: input, shape index: {}]   ;;  %s3731_s4 = inlined_call_operand.vmem [shape: f32[2,8,32,256], index: 4, kind: output, shape index: {0}]   ;;  %s3732_s5 = inlined_call_operand.vmem [shape: f32[2,32,256], index: 5, kind: output, shape index: {1}]  }
   0x1 LB: > { %s1608_s19 = sadd.s32 4294967295, %s2385_s18   ;;  %p1612_p0 = scmp.ge.s32.totalorder %s2385_s18, 1  ;;  %s2385_s18 = sphi %s2494_s18, %s16_s18  }
   0x2   : > { %p190_p1 = scmp.lt.s32.totalorder %s2385_s18, 3 }
   0x4   : > { %p191_p2 = pnand %p1612_p0, %p190_p1 }
   0x5   : > { %p223_p3 = scmp.lt.s32.totalorder (!%p191_p2), %s1608_s19, 1  ;;  %v2517_v0 = vmov (!%p191_p2), 0.0   ;;  %v2519_v1 = vmov (!%p191_p2), 0.0   ;;  %v2521_v2 = vmov (!%p191_p2), 0.0   ;;  %v2523_v3 = vmov (!%p191_p2), 0.0   ;;  %s2549_s7 = smov (!%p191_p2), 0  }
   0x6   : > { %194 = sbr.rel (%p191_p2) target bundleno = 531 (0x213), region = 36  ;;  %v2525_v4 = vmov (!%p191_p2), 0.0   ;;  %v2527_v5 = vmov (!%p191_p2), 0.0   ;;  %v2529_v6 = vmov (!%p191_p2), 0.0   ;;  %v2531_v7 = vmov (!%p191_p2), 0.0  }
   0x7   : > { %v2533_v8 = vmov (!%p191_p2), 0.0   ;;  %v2535_v9 = vmov (!%p191_p2), 0.0   ;;  %v2537_v10 = vmov (!%p191_p2), 0.0   ;;  %v2539_v11 = vmov (!%p191_p2), 0.0  }
   0x8   : > { %v2541_v12 = vmov (!%p191_p2), 0.0   ;;  %v2543_v13 = vmov (!%p191_p2), 0.0   ;;  %v2545_v14 = vmov (!%p191_p2), 0.0   ;;  %v2547_v15 = vmov (!%p191_p2), 0.0  }
   0xd   : > { %s3963_s19 = smov (!%p223_p3, %s1608_s19), 1 }
   0xe   : > { %s1665_s20 = sshll.u32 %s3963_s19, 10  ;;  %s1666_s21 = sshll.u32 %s3963_s19, 9 }
   0xf   : > { %s2505_s24 = scalar_lea.vmem %s3727_s0, %s1665_s20  ;;  %s2510_s27 = scalar_lea.vmem %s3731_s4, %s1666_s21 }
  0x10   : > { %s1667_s28 = sshll.u32 %s3963_s19, 6 }
  0x11   : > { %s2515_s6 = scalar_lea.vmem %s3732_s5, %s1667_s28 }
  0x12 LB: >> { %v2023_v16 = vpack.i.bf16 %v2441_v13, %v2449_v15  ;;  %v2033_v17 = vpack.i.bf16 %v2425_v9, %v2433_v11  ;;  %s2455_s8 = smov 17   ;;  %v2028_v18 = vpack.i.bf16 %v2437_v12, %v2445_v14  ;;  %v2038_v19 = vpack.i.bf16 %v2421_v8, %v2429_v10  ;;  %s2456_s9 = smov 16   ;;  %v730_v24 = vld [vmem:[%s3728_s1 + $0x8] sm:$0xff]  ;;  %v2635_v29 = vld [vmem:[%s3729_s2 + $0x18] sm:$0xff]  ;;  %v2645_v31 = vld [vmem:[%s3729_s2] sm:$0xff]  ;;  %s2453_s7 = sphi %s2549_s7, %s243_s7   ;;  %v2449_v15 = vphi %v2547_v15, %v1436_v15   ;;  %v2445_v14 = vphi %v2545_v14, %v1437_v14   ;;  %v2441_v13 = vphi %v2543_v13, %v1438_v13   ;;  %v2437_v12 = vphi %v2541_v12, %v1439_v12   ;;  %v2433_v11 = vphi %v2539_v11, %v1440_v11   ;;  %v2429_v10 = vphi %v2537_v10, %v1441_v10   ;;  %v2425_v9 = vphi %v2535_v9, %v1442_v9   ;;  %v2421_v8 = vphi %v2533_v8, %v1443_v8   ;;  %v2417_v7 = vphi %v2531_v7, %v3961_v7   ;;  %v2413_v6 = vphi %v2529_v6, %v3960_v6   ;;  %v2409_v5 = vphi %v2527_v5, %v3959_v5   ;;  %v2405_v4 = vphi %v2525_v4, %v3958_v4   ;;  %v2401_v3 = vphi %v2523_v3, %v3957_v3   ;;  %v2397_v2 = vphi %v2521_v2, %v3956_v2   ;;  %v2393_v1 = vphi %v2519_v1, %v3955_v1   ;;  %v2389_v0 = vphi %v2517_v0, %v3954_v0  }
  0x13   : >> { %s2457_s10 = smov 15   ;;  %s2458_s11 = smov 1   ;;  %v1782_v20 = vpack.c.bf16 %v2437_v12, %v2445_v14  ;;  %v1784_v21 = vpack.c.bf16 %v2441_v13, %v2449_v15  ;;  %v1786_v22 = vpack.c.bf16 %v2421_v8, %v2429_v10  ;;  %v3743_v25 = vmov 0.0   ;;  %962 = vmatprep.mubr.f32.mxu1 %v730_v24  ;;  %v2625_v26 = vld [vmem:[%s3729_s2 + $0x8] sm:$0xff]  ;;  %v2640_v30 = vld [vmem:[%s3730_s3 + $0x18] sm:$0xff]  ;;  %v2650_v32 = vld [vmem:[%s3730_s3] sm:$0xff] }
  0x14   : >> { %2024 = vrot.lane.b32.xlu0 %v2023_v16, %s2455_s8  ;;  %2034 = vrot.lane.b32.xlu1 %v2033_v17, %s2455_s8  ;;  %s2459_s12 = smov 127   ;;  %s2460_s13 = smov 113   ;;  %v2630_v27 = vld [vmem:[%s3730_s3 + $0x8] sm:$0xff]  ;;  %v292_v28 = vlaneseq  ;;  %vm3740_vm0 = vcmp.ge.s32.totalorder %v2625_v26, 1  ;;  %v2657_v33 = vld [vmem:[%s3729_s2 + $0x10] sm:$0xff]  ;;  %vm3739_vm2 = vcmp.ge.s32.totalorder %v2635_v29, 1 }
  0x15   : >> { %s2461_s14 = smov 112   ;;  %s2462_s15 = smov 111   ;;  %1123 = vmatprep.mubr.f32.mxu0 %v3743_v25  ;;  %vm3736_vm1 = vcmp.ge.s32.totalorder %v2630_v27, 1  ;;  %v2662_v34 = vld [vmem:[%s3730_s3 + $0x10] sm:$0xff]  ;;  %vm3735_vm3 = vcmp.ge.s32.totalorder %v2640_v30, 1  ;;  %vm3738_vm4 = vcmp.ge.s32.totalorder %v2645_v31, 1 }
  0x16   : >> { %v2666_v35 = vand.u32 127, %v292_v28  ;;  %vm3734_vm5 = vcmp.ge.s32.totalorder %v2650_v32, 1  ;;  %vm2674_vm6 = vmand %vm3740_vm0, %vm3736_vm1  ;;  %vm3737_vm7 = vcmp.ge.s32.totalorder %v2657_v33, 1  ;;  %vm3733_vm8 = vcmp.ge.s32.totalorder %v2662_v34, 1  ;;  %v2683_v39 = vld [vmem:[%s3729_s2 + $0x28] sm:$0xff]  ;;  %v2688_v40 = vld [vmem:[%s3729_s2 + $0x38] sm:$0xff] }
  0x17   : >> { %vm2694_vm9 = vmand %vm3739_vm2, %vm3735_vm3  ;;  %v2701_v42 = vld [vmem:[%s3730_s3 + $0x28] sm:$0xff]  ;;  %v2706_v43 = vld [vmem:[%s3730_s3 + $0x38] sm:$0xff]  ;;  %vm3742_vm13 = vcmp.ge.s32.totalorder %v2683_v39, 1  ;;  %vm3750_vm14 = vcmp.ge.s32.totalorder %v2688_v40, 1  ;;  %v3846_v14 = vmov 0  ;;  %v3860_v10 = vmov 0 }
  0x18   : >> { %2029 = vrot.lane.b32.xlu0 %v2028_v18, %s2455_s8  ;;  %2039 = vrot.lane.b32.xlu1 %v2038_v19, %s2455_s8  ;;  %vm2712_vm10 = vmand %vm3738_vm4, %vm3734_vm5  ;;  %vm294_vm11 = vcmp.lt.s32.totalorder %v2666_v35, 17  ;;  %v2730_v46 = vld [vmem:[%s3729_s2 + $0x20] sm:$0xff]  ;;  %vm3741_vm15 = vcmp.ge.s32.totalorder %v2701_v42, 1  ;;  %v2742_v52 = vld [vmem:[%s3729_s2 + $0x30] sm:$0xff]  ;;  %vm359_vm4 = vcmp.lt.s32.totalorder %v2666_v35, 16  ;;  %s1668_s26 = sshll.u32 %s2453_s7, 7 }
  0x19   : >> { %vm2721_vm12 = vmand %vm3737_vm7, %vm3733_vm8  ;;  %v2735_v47 = vld [vmem:[%s3730_s3 + $0x20] sm:$0xff]  ;;  %vm3745_vm8 = vcmp.ge.s32.totalorder %v2706_v43, 1  ;;  %v2747_v53 = vld [vmem:[%s3730_s3 + $0x30] sm:$0xff]  ;;  %vm3747_vm1 = vcmp.ge.s32.totalorder %v2730_v46, 1  ;;  %vm3749_vm0 = vcmp.ge.s32.totalorder %v2742_v52, 1  ;;  %s3583_s28 = scalar_lea.vmem %s2505_s24, %s1668_s26  ;;  %s1669_s29 = sshll.u32 %s2453_s7, 6 }
  0x1a   : >> { %vm1738_vm3 = vmpackc.low %vm2721_vm12, %vm2712_vm10  ;;  %vm3746_vm7 = vcmp.ge.s32.totalorder %v2735_v47, 1  ;;  %vm3748_vm5 = vcmp.ge.s32.totalorder %v2747_v53, 1  ;;  %vm3791_vm10 = vcmp.ge.s32.totalorder %v2657_v33, 1  ;;  %v747_v13 = vld [vmem:[%s3728_s1 + $0x90] sm:$0xff]  ;;  %v770_v15 = vld [vmem:[%s3728_s1 + $0x148] sm:$0xff]  ;;  %s3652_s30 = scalar_lea.vmem %s2510_s27, %s1669_s29  ;;  %s243_s7 = sadd.s32 1, %s2453_s7  }
  0x1b   : >> { %vm2764_vm2 = vmand %vm3742_vm13, %vm3741_vm15  ;;  %p3664_p4 = scmp.ge.s32.totalorder %s243_s7, 8  }
  0x1c   : >> { %2044 = vrot.lane.b32.xlu0 %v2023_v16, %s2456_s9  ;;  %2049 = vrot.lane.b32.xlu1 %v2028_v18, %s2456_s9  ;;  %vm2782_vm15 = vmand %vm3750_vm14, %vm3745_vm8 }
  0x1d   : >> { %vm2792_vm13 = vmand %vm3747_vm1, %vm3746_vm7 }
  0x1e   : >> { %vm2802_vm8 = vmand %vm3749_vm0, %vm3748_vm5  ;;  %vm3794_vm5 = vcmp.ge.s32.totalorder %v2683_v39, 1 }
  0x1f   : >> { %vm3785_vm7 = vmpackc.low %vm2694_vm9, %vm2674_vm6  ;;  %vm3786_vm6 = vcmp.ge.s32.totalorder %v2625_v26, 1 }
  0x20   : >> { %2054 = vrot.lane.b32.xlu0 %v2033_v17, %s2456_s9  ;;  %2059 = vrot.lane.b32.xlu1 %v2038_v19, %s2456_s9  ;;  %vm1741_vm1 = vmpackc.low %vm2782_vm15, %vm2764_vm2  ;;  %vm3754_vm2 = vcmp.lt.s32.totalorder %v2650_v32, 15  ;;  %vm3797_vm15 = vcmp.ge.s32.totalorder %v2730_v46, 1 }
  0x24   : >> { %2064 = vrot.lane.b32.xlu0 %v2023_v16, %s2457_s10  ;;  %2069 = vrot.lane.b32.xlu1 %v2028_v18, %s2457_s10 }
  0x28   : >> { %2074 = vrot.lane.b32.xlu0 %v2033_v17, %s2457_s10  ;;  %2079 = vrot.lane.b32.xlu1 %v2038_v19, %s2457_s10 }
  0x2c   : >> { %2084 = vrot.lane.b32.xlu0 %v2023_v16, %s2458_s11  ;;  %2089 = vrot.lane.b32.xlu1 %v2028_v18, %s2458_s11 }
  0x30   : >> { %2094 = vrot.lane.b32.xlu0 %v2033_v17, %s2458_s11  ;;  %2099 = vrot.lane.b32.xlu1 %v2038_v19, %s2458_s11 }
  0x34   : >> { %2104 = vrot.lane.b32.xlu0 %v2023_v16, %s2459_s12  ;;  %2109 = vrot.lane.b32.xlu1 %v2028_v18, %s2459_s12 }
  0x38   : >> { %2114 = vrot.lane.b32.xlu0 %v2033_v17, %s2459_s12  ;;  %2119 = vrot.lane.b32.xlu1 %v2038_v19, %s2459_s12 }
  0x3c   : >> { %2124 = vrot.lane.b32.xlu0 %v2023_v16, %s2460_s13  ;;  %2129 = vrot.lane.b32.xlu1 %v2028_v18, %s2460_s13 }
  0x40   : >> { %2134 = vrot.lane.b32.xlu0 %v2033_v17, %s2460_s13  ;;  %2139 = vrot.lane.b32.xlu1 %v2038_v19, %s2460_s13 }
  0x44   : >> { %2144 = vrot.lane.b32.xlu0 %v2023_v16, %s2461_s14  ;;  %2149 = vrot.lane.b32.xlu1 %v2028_v18, %s2461_s14 }
  0x48   : >> { %2154 = vrot.lane.b32.xlu0 %v2023_v16, %s2462_s15  ;;  %2159 = vrot.lane.b32.xlu1 %v2028_v18, %s2462_s15 }
  0x4c   : >> { %2164 = vrot.lane.b32.xlu0 %v2033_v17, %s2461_s14  ;;  %2169 = vrot.lane.b32.xlu1 %v2038_v19, %s2461_s14 }
  0x50   : >> { %2174 = vrot.lane.b32.xlu0 %v2033_v17, %s2462_s15  ;;  %2179 = vrot.lane.b32.xlu1 %v2038_v19, %s2462_s15 }
  0x86   : >> { %v2025_v36 = vpop.permute.xlu0 %2024  ;;  %v2035_v37 = vpop.permute.xlu1 %2034 }
  0x87   : >> { %v2037_v48 = vunpack.i.h.bf16 %v2035_v37  ;;  %v2036_v49 = vunpack.i.l.bf16 %v2035_v37  ;;  %v2027_v58 = vunpack.i.h.bf16 %v2025_v36  ;;  %v2026_v59 = vunpack.i.l.bf16 %v2025_v36 }
  0x8a   : >> { %v2030_v50 = vpop.permute.xlu0 %2029  ;;  %v2040_v51 = vpop.permute.xlu1 %2039 }
  0x8b   : >> { %v2032_v54 = vunpack.i.h.bf16 %v2030_v50  ;;  %v2031_v55 = vunpack.i.l.bf16 %v2030_v50  ;;  %v2042_v56 = vunpack.i.h.bf16 %v2040_v51  ;;  %v2041_v57 = vunpack.i.l.bf16 %v2040_v51 }
  0x8d   : >> { %v298_v61 = vsel %vm294_vm11, %v2037_v48, %v2042_v56  ;;  %v297_v62 = vsel %vm294_vm11, %v2036_v49, %v2041_v57  ;;  %v295_v63 = vsel %vm294_vm11, %v2026_v59, %v2031_v55  ;;  %v296_v16 = vsel %vm294_vm11, %v2027_v58, %v2032_v54 }
  0x8e   : >> { %v2045_v17 = vpop.permute.xlu0 %2044  ;;  %v2050_v18 = vpop.permute.xlu1 %2049  ;;  %v1734_v24 = vpack.c.bf16 %v296_v16, %v295_v63  ;;  %v299_v37 = vsel %vm294_vm11, %v2031_v55, %v2026_v59  ;;  %v300_v51 = vsel %vm294_vm11, %v2032_v54, %v2027_v58  ;;  %v302_v55 = vsel %vm294_vm11, %v2042_v56, %v2037_v48 }
  0x8f   : >> { %v2047_v28 = vunpack.i.h.bf16 %v2045_v17  ;;  %v2046_v36 = vunpack.i.l.bf16 %v2045_v17  ;;  %v2052_v25 = vunpack.i.h.bf16 %v2050_v18  ;;  %v2051_v23 = vunpack.i.l.bf16 %v2050_v18 }
  0x90   : >> { %1736 = vmatprep.subr.msk.bf16.mxu1 %vm3785_vm7, %v1734_v24  ;;  %v1737_v54 = vpack.c.bf16 %v300_v51, %v299_v37  ;;  %v301_v58 = vsel %vm294_vm11, %v2041_v57, %v2036_v49  ;;  %v1740_v59 = vpack.c.bf16 %v298_v61, %v297_v62  ;;  %vm3787_vm7 = vcmp.ge.s32.totalorder %v2635_v29, 1  ;;  %vm1744_vm11 = vmpackc.low %vm2802_vm8, %vm2792_vm13 }
  0x91   : >> { %v361_v16 = vsel %vm359_vm4, %v2047_v28, %v2052_v25  ;;  %v360_v41 = vsel %vm359_vm4, %v2046_v36, %v2051_v23  ;;  %vm2827_vm9 = vmpackc.low %vm3787_vm7, %vm3786_vm6  ;;  %v365_v49 = vsel %vm359_vm4, %v2052_v25, %v2047_v28  ;;  %v364_v62 = vsel %vm359_vm4, %v2051_v23, %v2046_v36 }
  0x92   : >> { %v2055_v48 = vpop.permute.xlu0 %2054  ;;  %v2060_v38 = vpop.permute.xlu1 %2059  ;;  %1739 = vmatpush1.bf16.msk.msra.mxu1 %vm1738_vm3, %v1737_v54  ;;  %v1746_v17 = vpack.c.bf16 %v361_v16, %v360_v41  ;;  %vm3790_vm3 = vcmp.ge.s32.totalorder %v2645_v31, 1  ;;  %v1743_v18 = vpack.c.bf16 %v302_v55, %v301_v58  ;;  %vm3755_vm6 = vcmp.lt.s32.totalorder %v2640_v30, 15 }
  0x93   : >> { %v2057_v57 = vunpack.i.h.bf16 %v2055_v48  ;;  %v2056_v61 = vunpack.i.l.bf16 %v2055_v48  ;;  %1742 = vmatprep.subr.msk.bf16.mxu1 %vm1741_vm1, %v1740_v59  ;;  %v2062_v44 = vunpack.i.h.bf16 %v2060_v38  ;;  %v2061_v45 = vunpack.i.l.bf16 %v2060_v38  ;;  %vm2854_vm12 = vmpackc.low %vm3791_vm10, %vm3790_vm3 }
  0x94   : >> { %vm400_vm7 = vcmp.lt.s32.totalorder %v2666_v35, 15  ;;  %vm2864_vm1 = vmpackc.low %vm3750_vm14, %vm3794_vm5  ;;  %vm3753_vm5 = vcmp.lt.s32.totalorder %v2662_v34, 15  ;;  %vm3751_vm10 = vcmp.lt.s32.totalorder %v2701_v42, 15  ;;  %v1749_v37 = vpack.c.bf16 %v365_v49, %v364_v62 }
  0x95   : >> { %v363_v60 = vsel %vm359_vm4, %v2057_v57, %v2062_v44  ;;  %v362_v19 = vsel %vm359_vm4, %v2056_v61, %v2061_v45  ;;  %vm2877_vm3 = vmpackc.low %vm3749_vm0, %vm3797_vm15  ;;  %v367_v51 = vsel %vm359_vm4, %v2062_v44, %v2057_v57  ;;  %vm3800_vm15 = vcmp.lt.s32.totalorder %v2630_v27, 15 }
  0x96   : >> { %v2065_v24 = vpop.permute.xlu0 %2064  ;;  %v2070_v28 = vpop.permute.xlu1 %2069  ;;  %1745 = vmatpush1.bf16.msk.msra.mxu1 %vm1744_vm11, %v1743_v18  ;;  %vm3801_vm0 = vcmp.ge.s32.totalorder %v2625_v26, 1  ;;  %v366_v59 = vsel %vm359_vm4, %v2061_v45, %v2056_v61  ;;  %v1752_v16 = vpack.c.bf16 %v363_v60, %v362_v19  ;;  %vm3804_vm8 = vcmp.ge.s32.totalorder %v2635_v29, 1 }
  0x97   : >> { %v2067_v55 = vunpack.i.h.bf16 %v2065_v24  ;;  %v2066_v54 = vunpack.i.l.bf16 %v2065_v24  ;;  %vm2894_vm14 = vmand %vm3801_vm0, %vm3800_vm15  ;;  %1748 = vmatprep.subr.msk.bf16.mxu1 %vm2827_vm9, %v1746_v17  ;;  %v2072_v50 = vunpack.i.h.bf16 %v2070_v28  ;;  %v2071_v63 = vunpack.i.l.bf16 %v2070_v28 }
  0x98   : >> { %vm2906_vm13 = vmand %vm3804_vm8, %vm3755_vm6  ;;  %vm3807_vm0 = vcmp.ge.s32.totalorder %v2645_v31, 1  ;;  %vm3752_vm4 = vcmp.lt.s32.totalorder %v2706_v43, 15  ;;  %vm3810_vm9 = vcmp.ge.s32.totalorder %v2657_v33, 1  ;;  %v1755_v62 = vpack.c.bf16 %v367_v51, %v366_v59 }
  0x99   : >> { %vm2914_vm11 = vmand %vm3807_vm0, %vm3754_vm2  ;;  %v402_v38 = vsel %vm400_vm7, %v2067_v55, %v2072_v50  ;;  %v401_v56 = vsel %vm400_vm7, %v2066_v54, %v2071_v63  ;;  %v406_v17 = vsel %vm400_vm7, %v2072_v50, %v2067_v55  ;;  %vm3813_vm8 = vcmp.ge.s32.totalorder %v2683_v39, 1 }
  0x9a   : >> { %v2075_v49 = vpop.permute.xlu0 %2074  ;;  %v2080_v57 = vpop.permute.xlu1 %2079  ;;  %vm2927_vm15 = vmand %vm3810_vm9, %vm3753_vm5  ;;  %1751 = vmatpush1.bf16.msk.msra.mxu1 %vm2854_vm12, %v1749_v37  ;;  %v405_v60 = vsel %vm400_vm7, %v2071_v63, %v2066_v54  ;;  %v1758_v19 = vpack.c.bf16 %v402_v38, %v401_v56  ;;  %vm3816_vm12 = vcmp.ge.s32.totalorder %v2688_v40, 1 }
  0x9b   : >> { %v2077_v44 = vunpack.i.h.bf16 %v2075_v49  ;;  %v2076_v45 = vunpack.i.l.bf16 %v2075_v49  ;;  %vm2939_vm0 = vmand %vm3813_vm8, %vm3751_vm10  ;;  %1754 = vmatprep.subr.msk.bf16.mxu1 %vm2864_vm1, %v1752_v16  ;;  %v2082_v24 = vunpack.i.h.bf16 %v2080_v57  ;;  %v2081_v25 = vunpack.i.l.bf16 %v2080_v57 }
  0x9c   : >> { %vm2951_vm9 = vmand %vm3816_vm12, %vm3752_vm4  ;;  %vm3760_vm10 = vcmp.lt.s32.totalorder %v2735_v47, 15  ;;  %vm457_vm1 = vcmp.lt.s32.totalorder %v2666_v35, 1  ;;  %vm3759_vm4 = vcmp.lt.s32.totalorder %v2747_v53, 15  ;;  %v1761_v54 = vpack.c.bf16 %v406_v17, %v405_v60 }
  0x9d   : >> { %vm1759_vm8 = vmpackc.low %vm2906_vm13, %vm2894_vm14  ;;  %v404_v23 = vsel %vm400_vm7, %v2077_v44, %v2082_v24  ;;  %v403_v37 = vsel %vm400_vm7, %v2076_v45, %v2081_v25  ;;  %v408_v59 = vsel %vm400_vm7, %v2082_v24, %v2077_v44  ;;  %v407_v63 = vsel %vm400_vm7, %v2081_v25, %v2076_v45 }
  0x9e   : >> { %v2085_v51 = vpop.permute.xlu0 %2084  ;;  %v2090_v55 = vpop.permute.xlu1 %2089  ;;  %vm1762_vm12 = vmpackc.low %vm2927_vm15, %vm2914_vm11  ;;  %1757 = vmatpush1.bf16.msk.msra.mxu1 %vm2877_vm3, %v1755_v62  ;;  %v1764_v38 = vpack.c.bf16 %v404_v23, %v403_v37  ;;  %vm3819_vm3 = vcmp.ge.s32.totalorder %v2730_v46, 1  ;;  %vm3822_vm7 = vcmp.ge.s32.totalorder %v2742_v52, 1  ;;  %v1767_v44 = vpack.c.bf16 %v408_v59, %v407_v63 }
  0x9f   : >> { %v2087_v16 = vunpack.i.h.bf16 %v2085_v51  ;;  %v2086_v50 = vunpack.i.l.bf16 %v2085_v51  ;;  %vm1765_vm5 = vmpackc.low %vm2951_vm9, %vm2939_vm0  ;;  %1760 = vmatprep.subr.msk.bf16.mxu1 %vm1759_vm8, %v1758_v19  ;;  %v2092_v56 = vunpack.i.h.bf16 %v2090_v55  ;;  %v2091_v36 = vunpack.i.l.bf16 %v2090_v55 }
  0xa0   : >> { %vm2989_vm2 = vmand %vm3819_vm3, %vm3760_vm10  ;;  %vm3825_vm13 = vcmp.ge.s32.totalorder %v2630_v27, 1  ;;  %vm3826_vm11 = vcmp.ge.s32.totalorder %v2640_v30, 1  ;;  %vm3829_vm0 = vcmp.ge.s32.totalorder %v2701_v42, 1  ;;  %vm3830_vm9 = vcmp.ge.s32.totalorder %v2706_v43, 1 }
  0xa1   : >> { %vm2997_vm6 = vmand %vm3822_vm7, %vm3759_vm4  ;;  %v459_v58 = vsel %vm457_vm1, %v2087_v16, %v2092_v56  ;;  %v458_v57 = vsel %vm457_vm1, %v2086_v50, %v2091_v36  ;;  %v463_v45 = vsel %vm457_vm1, %v2092_v56, %v2087_v16  ;;  %v462_v24 = vsel %vm457_vm1, %v2091_v36, %v2086_v50 }
  0xa2   : >> { %v2095_v62 = vpop.permute.xlu0 %2094  ;;  %v2100_v17 = vpop.permute.xlu1 %2099  ;;  %1763 = vmatpush1.bf16.msk.msra.mxu1 %vm1762_vm12, %v1761_v54  ;;  %v1770_v25 = vpack.c.bf16 %v459_v58, %v458_v57  ;;  %vm1768_vm14 = vmpackc.low %vm2997_vm6, %vm2989_vm2  ;;  %v1773_v51 = vpack.c.bf16 %v463_v45, %v462_v24  ;;  %vm3827_vm6 = vcmp.ge.s32.totalorder %v2650_v32, 1  ;;  %vm3828_vm2 = vcmp.ge.s32.totalorder %v2662_v34, 1 }
  0xa3   : >> { %v2097_v60 = vunpack.i.h.bf16 %v2095_v62  ;;  %v2096_v19 = vunpack.i.l.bf16 %v2095_v62  ;;  %1766 = vmatprep.subr.msk.bf16.mxu1 %vm1765_vm5, %v1764_v38  ;;  %v2102_v23 = vunpack.i.h.bf16 %v2100_v17  ;;  %v2101_v37 = vunpack.i.l.bf16 %v2100_v17  ;;  %vm1771_vm15 = vmpackc.low %vm3826_vm11, %vm3825_vm13 }
  0xa4   : >> { %vm1774_vm5 = vmpackc.low %vm3828_vm2, %vm3827_vm6  ;;  %vm3831_vm12 = vcmp.ge.s32.totalorder %v2735_v47, 1  ;;  %vm3757_vm7 = vcmp.lt.s32.totalorder %v2625_v26, 15  ;;  %vm3756_vm13 = vcmp.lt.s32.totalorder %v2635_v29, 15  ;;  %vm3833_vm11 = vcmp.lt.s32.totalorder %v2630_v27, 15 }
  0xa5   : >> { %v461_v48 = vsel %vm457_vm1, %v2097_v60, %v2102_v23  ;;  %v460_v61 = vsel %vm457_vm1, %v2096_v19, %v2101_v37  ;;  %v465_v55 = vsel %vm457_vm1, %v2102_v23, %v2097_v60  ;;  %v464_v54 = vsel %vm457_vm1, %v2101_v37, %v2096_v19  ;;  %vm1777_vm8 = vmpackc.low %vm3830_vm9, %vm3829_vm0 }
  0xa6   : >> { %v2105_v18 = vpop.permute.xlu0 %2104  ;;  %v2110_v28 = vpop.permute.xlu1 %2109  ;;  %1769 = vmatpush1.bf16.msk.msra.mxu1 %vm1768_vm14, %v1767_v44  ;;  %v1776_v59 = vpack.c.bf16 %v461_v48, %v460_v61  ;;  %v1779_v63 = vpack.c.bf16 %v465_v55, %v464_v54  ;;  %vm3832_vm1 = vcmp.ge.s32.totalorder %v2747_v53, 1  ;;  %vm506_vm14 = vcmp.lt.s32.totalorder %v2666_v35, 127 }
  0xa7   : >> { %1772 = vmatprep.subr.msk.bf16.mxu1 %vm1771_vm15, %v1770_v25  ;;  %vm1780_vm3 = vmpackc.low %vm3832_vm1, %vm3831_vm12  ;;  %v2107_v38 = vunpack.i.h.bf16 %v2105_v18  ;;  %v2106_v56 = vunpack.i.l.bf16 %v2105_v18  ;;  %v2112_v36 = vunpack.i.h.bf16 %v2110_v28  ;;  %v2111_v49 = vunpack.i.l.bf16 %v2110_v28 }
  0xa8   : >> { %vm3834_vm15 = vcmp.lt.s32.totalorder %v2640_v30, 15  ;;  %vm3837_vm2 = vcmp.lt.s32.totalorder %v2650_v32, 15  ;;  %vm3758_vm9 = vcmp.lt.s32.totalorder %v2645_v31, 15  ;;  %vm3841_vm12 = vcmp.lt.s32.totalorder %v2701_v42, 15 }
  0xa9   : >> { %vm3058_vm6 = vmpackc.low %vm3834_vm15, %vm3833_vm11  ;;  %v512_v17 = vsel %vm506_vm14, %v2112_v36, %v2107_v38  ;;  %v511_v44 = vsel %vm506_vm14, %v2111_v49, %v2106_v56  ;;  %vm3842_vm1 = vcmp.lt.s32.totalorder %v2706_v43, 15  ;;  %vm3845_vm11 = vcmp.ge.s32.totalorder %v2630_v27, 1 }
  0xaa   : >> { %v2115_v16 = vpop.permute.xlu0 %2114  ;;  %v2120_v50 = vpop.permute.xlu1 %2119  ;;  %1775 = vmatpush1.bf16.msk.msra.mxu1 %vm1774_vm5, %v1773_v51  ;;  %vm3838_vm5 = vcmp.lt.s32.totalorder %v2662_v34, 15  ;;  %vm3091_vm15 = vmand %vm3757_vm7, %vm3845_vm11  ;;  %vm3851_vm11 = vcmp.ge.s32.totalorder %v2650_v32, 1  ;;  %v3852_v28 = vmov 0  ;;  %v508_v8 = vsel %vm506_vm14, %v2107_v38, %v2112_v36 }
  0xab   : >> { %1778 = vmatprep.subr.msk.bf16.mxu1 %vm1777_vm8, %v1776_v59  ;;  %vm3069_vm0 = vmpackc.low %vm3838_vm5, %vm3837_vm2  ;;  %vm3762_vm8 = vcmp.lt.s32.totalorder %v2657_v33, 15  ;;  %v3847_v14 = vsel %vm3091_vm15, 4294967295, %v3846_v14  ;;  %vm3761_vm2 = vcmp.lt.s32.totalorder %v2683_v39, 15  ;;  %v2116_v45 = vunpack.i.l.bf16 %v2115_v16 }
  0xac   : >> { %v2122_v60 = vunpack.i.h.bf16 %v2120_v50  ;;  %v2121_v19 = vunpack.i.l.bf16 %v2120_v50  ;;  %vm3132_vm7 = vmpackc.low %vm3759_vm4, %vm3760_vm10  ;;  %vm3856_vm5 = vcmp.ge.s32.totalorder %v2662_v34, 1  ;;  %vm3859_vm4 = vcmp.ge.s32.totalorder %v2701_v42, 1 }
  0xad   : >> { %vm3154_vm10 = vmand %vm3761_vm2, %vm3859_vm4  ;;  %vm3862_vm4 = vcmp.ge.s32.totalorder %v2706_v43, 1  ;;  %vm3863_vm2 = vcmp.lt.s32.totalorder %v2688_v40, 15  ;;  %v3866_v36 = vpack.c.bf16 %v2425_v9, %v2433_v11  ;;  %vm3875_vm15 = vcmp.lt.s32.totalorder %v2650_v32, 15 }
  0xae   : >> { %v3049_v41 = vpop.permute.xlu0 %2124  ;;  %v3051_v58 = vpop.permute.xlu1 %2129  ;;  %1781 = vmatpush1.bf16.msk.msra.mxu1 %vm1780_vm3, %v1779_v63  ;;  %vm3083_vm3 = vmpackc.low %vm3842_vm1, %vm3841_vm12  ;;  %vm3848_vm12 = vcmp.ge.s32.totalorder %v2640_v30, 1  ;;  %v3861_v10 = vsel %vm3154_vm10, 4294967295, %v3860_v10  ;;  %v509_v50 = vsel %vm506_vm14, %v2116_v45, %v2121_v19  ;;  %v513_v63 = vsel %vm506_vm14, %v2121_v19, %v2116_v45 }
  0xaf   : >> { %1783 = vmatprep.subr.bf16.mxu1 %v1782_v20  ;;  %v2117_v20 = vunpack.i.h.bf16 %v2115_v16  ;;  %vm3105_vm1 = vmand %vm3756_vm13, %vm3848_vm12  ;;  %v2127_v37 = vunpack.i.h.bf16 %v3049_v41  ;;  %v2126_v48 = vunpack.i.l.bf16 %v3049_v41  ;;  %v2132_v61 = vunpack.i.h.bf16 %v3051_v58 }
  0xb0   : >> { %v2131_v18 = vunpack.i.l.bf16 %v3051_v58  ;;  %vm3120_vm12 = vmand %vm3758_vm9, %vm3851_vm11  ;;  %vm3763_vm13 = vcmp.lt.s32.totalorder %v2666_v35, 113  ;;  %v3864_v16 = vmov 0  ;;  %vm3881_vm10 = vcmp.lt.s32.totalorder %v2657_v33, 15 }
  0xb1   : >> { %v3853_v28 = vsel %vm3120_vm12, 4294967295, %v3852_v28  ;;  %vm3140_vm11 = vmand %vm3762_vm8, %vm3856_vm5  ;;  %v510_v51 = vsel %vm506_vm14, %v2117_v20, %v2122_v60  ;;  %v514_v55 = vsel %vm506_vm14, %v2122_v60, %v2117_v20  ;;  %v553_v38 = vsel %vm3763_vm13, %v2132_v61, %v2127_v37 }
  0xb2   : >> { %v3097_v24 = vpop.permute.xlu0 %2134  ;;  %v3099_v25 = vpop.permute.xlu1 %2139  ;;  %1785 = vmatpush1.bf16.msra.mxu1 %v1784_v21  ;;  %v507_v21 = vsel %vm506_vm14, %v2106_v56, %v2111_v49  ;;  %vm3173_vm9 = vmand %vm3863_vm2, %vm3862_vm4  ;;  %v552_v56 = vsel %vm3763_vm13, %v2131_v18, %v2126_v48  ;;  %vm3867_vm2 = vcmp.lt.s32.totalorder %v2630_v27, 15  ;;  %vm3868_vm4 = vcmp.lt.s32.totalorder %v2625_v26, 15 }
  0xb3   : >> { %1787 = vmatprep.subr.bf16.mxu1 %v1786_v22  ;;  %v1790_v22 = vpack.c.bf16 %v512_v17, %v511_v44  ;;  %v3865_v16 = vsel %vm3173_vm9, 4294967295, %v3864_v16  ;;  %vm3192_vm5 = vmand %vm3868_vm4, %vm3867_vm2  ;;  %v2137_v41 = vunpack.i.h.bf16 %v3097_v24  ;;  %v2136_v58 = vunpack.i.l.bf16 %v3097_v24 }
  0xb4   : >> { %v2142_v17 = vunpack.i.h.bf16 %v3099_v25  ;;  %v2141_v44 = vunpack.i.l.bf16 %v3099_v25  ;;  %vm3871_vm2 = vcmp.lt.s32.totalorder %v2640_v30, 15  ;;  %vm3872_vm4 = vcmp.lt.s32.totalorder %v2635_v29, 15 }
  0xb5   : >> { %vm3210_vm8 = vmand %vm3872_vm4, %vm3871_vm2  ;;  %v1793_v11 = vpack.c.bf16 %v508_v8, %v507_v21  ;;  %vm3876_vm14 = vcmp.lt.s32.totalorder %v2645_v31, 15  ;;  %vm3768_vm2 = vcmp.lt.s32.totalorder %v2742_v52, 15  ;;  %v1796_v30 = vpack.c.bf16 %v514_v55, %v513_v63  ;;  %v732_v8 = vld [vmem:[%s3728_s1 + $0x18] sm:$0xff] }
  0xb6   : >> { %v3165_v54 = vpop.permute.xlu0 %2144  ;;  %v3167_v59 = vpop.permute.xlu1 %2149  ;;  %1789 = vmatpush1.bf16.msra.mxu1 %v3866_v36  ;;  %vm3223_vm12 = vmand %vm3876_vm14, %vm3875_vm15  ;;  %v1799_v57 = vpack.c.bf16 %v510_v51, %v509_v50  ;;  %vm3879_vm4 = vcmp.lt.s32.totalorder %v2666_v35, 113  ;;  %v1802_v24 = vpack.c.bf16 %v553_v38, %v552_v56  ;;  %vm3885_vm14 = vcmp.ge.s32.totalorder %v2735_v47, 1 }
  0xb7   : >> { %1792 = vmatprep.subr.msk.bf16.mxu1 %vm3058_vm6, %v1790_v22  ;;  %v549_v20 = vsel %vm3879_vm4, %v2127_v37, %v2132_v61  ;;  %vm3880_vm6 = vcmp.lt.s32.totalorder %v2662_v34, 15  ;;  %vm3884_vm15 = vmmov %vm3879_vm4  ;;  %vm3886_vm4 = vcmp.lt.s32.totalorder %v2730_v46, 15  ;;  %v2147_v21 = vunpack.i.h.bf16 %v3165_v54  ;;  %v731_v34 = vld [vmem:[%s3728_s1 + $0x10] sm:$0xff] }
  0xb8   : >> { %vm3235_vm9 = vmand %vm3881_vm10, %vm3880_vm6  ;;  %v548_v19 = vsel %vm3884_vm15, %v2126_v48, %v2131_v18  ;;  %v2146_v22 = vunpack.i.l.bf16 %v3165_v54  ;;  %v2152_v51 = vunpack.i.h.bf16 %v3167_v59  ;;  %v2151_v55 = vunpack.i.l.bf16 %v3167_v59 }
  0xb9   : >> { %vm3247_vm13 = vmand %vm3886_vm4, %vm3885_vm14  ;;  %vm3894_vm14 = vcmp.lt.s32.totalorder %v2666_v35, 111  ;;  %v1805_v56 = vpack.c.bf16 %v549_v20, %v548_v19 }
  0xba   : >> { %v2155_v45 = vpop.permute.xlu0 %2154  ;;  %v2160_v60 = vpop.permute.xlu1 %2159  ;;  %1795 = vmatpush1.bf16.msk.msra.mxu1 %vm3069_vm0, %v1793_v11  ;;  %vm3889_vm10 = vmmov %vm3884_vm15  ;;  %vm3891_vm0 = vcmp.ge.s32.totalorder %v2747_v53, 1 }
  0xbb   : >> { %v2157_v25 = vunpack.i.h.bf16 %v2155_v45  ;;  %v2156_v37 = vunpack.i.l.bf16 %v2155_v45  ;;  %v555_v61 = vsel %vm3889_vm10, %v2142_v17, %v2137_v41  ;;  %vm3890_vm6 = vmmov %vm3889_vm10  ;;  %1798 = vmatprep.subr.msk.bf16.mxu1 %vm3083_vm3, %v1796_v30  ;;  %v2162_v62 = vunpack.i.h.bf16 %v2160_v60 }
  0xbc   : >> { %v554_v48 = vsel %vm3890_vm6, %v2141_v44, %v2136_v58  ;;  %v2161_v18 = vunpack.i.l.bf16 %v2160_v60  ;;  %vm3261_vm15 = vmand %vm3768_vm2, %vm3891_vm0  ;;  %vm3901_vm2 = vcmp.lt.s32.totalorder %v2701_v42, 15  ;;  %v758_v42 = vld [vmem:[%s3728_s1 + $0xe8] sm:$0xff]  ;;  %v759_v60 = vld [vmem:[%s3728_s1 + $0xf0] sm:$0xff] }
  0xbd   : >> { %vm3895_vm4 = vmmov %vm3894_vm14 }
  0xbe   : >> { %v3273_v12 = vpop.permute.xlu0 %2164  ;;  %v2170_v50 = vpop.permute.xlu1 %2169  ;;  %v650_v63 = vsel %vm3894_vm14, %v2161_v18, %v2156_v37  ;;  %v651_v38 = vsel %vm3895_vm4, %v2162_v62, %v2157_v25  ;;  %vm3896_vm10 = vmmov %vm3895_vm4  ;;  %1801 = vmatpush1.bf16.msk.msra.mxu1 %vm3132_vm7, %v1799_v57  ;;  %vm3902_vm7 = vcmp.lt.s32.totalorder %v2683_v39, 15 }
  0xbf   : >> { %v646_v54 = vsel %vm3896_vm10, %v2156_v37, %v2161_v18  ;;  %vm3897_vm6 = vmmov %vm3895_vm4  ;;  %vm3898_vm4 = vcmp.lt.s32.totalorder %v2666_v35, 113  ;;  %vm3899_vm10 = vnez %v3847_v14  ;;  %v1826_v11 = vpack.c.bf16 %v651_v38, %v650_v63  ;;  %v734_v18 = vld [vmem:[%s3728_s1 + $0x28] sm:$0xff] }
  0xc0   : >> { %v647_v59 = vsel %vm3897_vm6, %v2157_v25, %v2162_v62  ;;  %v551_v36 = vsel %vm3898_vm4, %v2137_v41, %v2142_v17  ;;  %vm3900_vm6 = vmpackc.low %vm3105_vm1, %vm3899_vm10  ;;  %v1808_v41 = vpack.c.bf16 %v555_v61, %v554_v48  ;;  %vm3908_vm10 = vcmp.lt.s32.totalorder %v2706_v43, 15  ;;  %v742_v63 = vld [vmem:[%s3728_s1 + $0x68] sm:$0xff] }
  0xc1   : >> { %1804 = vmatprep.subr.msk.bf16.mxu1 %vm3900_vm6, %v1802_v24  ;;  %v1829_v30 = vpack.c.bf16 %v647_v59, %v646_v54  ;;  %vm3304_vm0 = vmand %vm3902_vm7, %vm3901_vm2  ;;  %vm3909_vm6 = vcmp.lt.s32.totalorder %v2688_v40, 15  ;;  %v2167_v17 = vunpack.i.h.bf16 %v3273_v12  ;;  %v2166_v20 = vunpack.i.l.bf16 %v3273_v12  ;;  %v743_v12 = vld [vmem:[%s3728_s1 + $0x70] sm:$0xff]  ;;  %v746_v38 = vld [vmem:[%s3728_s1 + $0x88] sm:$0xff] }
  0xc2   : >> { %vm3905_vm14 = vmmov %vm3898_vm4  ;;  %vm3906_vm4 = vcmp.lt.s32.totalorder %v2666_v35, 112  ;;  %v2175_v45 = vpop.permute.xlu0 %2174  ;;  %v2180_v43 = vpop.permute.xlu1 %2179  ;;  %vm3914_vm7 = vcmp.lt.s32.totalorder %v2730_v46, 15  ;;  %v741_v54 = vld [vmem:[%s3728_s1 + $0x60] sm:$0xff] }
  0xc3   : >> { %v550_v57 = vsel %vm3905_vm14, %v2136_v58, %v2141_v44  ;;  %v610_v23 = vsel %vm3906_vm4, %v2152_v51, %v2147_v21  ;;  %vm3907_vm1 = vmmov %vm3906_vm4  ;;  %v2172_v58 = vunpack.i.h.bf16 %v2170_v50  ;;  %v2171_v44 = vunpack.i.l.bf16 %v2170_v50  ;;  %v738_v50 = vld [vmem:[%s3728_s1 + $0x48] sm:$0xff]  ;;  %v745_v59 = vld [vmem:[%s3728_s1 + $0x80] sm:$0xff] }
  0xc4   : >> { %v609_v14 = vsel %vm3907_vm1, %v2151_v55, %v2146_v22  ;;  %vm3318_vm3 = vmand %vm3909_vm6, %vm3908_vm10  ;;  %vm3913_vm14 = vcmp.lt.s32.totalorder %v2735_v47, 15  ;;  %vm3917_vm1 = vnez %v3853_v28  ;;  %v2177_v49 = vunpack.i.h.bf16 %v2175_v45 }
  0xc5   : >> { %vm3912_vm2 = vmpackc.low %vm3210_vm8, %vm3192_vm5  ;;  %v2176_v47 = vunpack.i.l.bf16 %v2175_v45  ;;  %v2182_v9 = vunpack.i.h.bf16 %v2180_v43  ;;  %v2181_v19 = vunpack.i.l.bf16 %v2180_v43  ;;  %vm3920_vm5 = vcmp.lt.s32.totalorder %v2747_v53, 15  ;;  %v760_v45 = vld [vmem:[%s3728_s1 + $0xf8] sm:$0xff] }
  0xc6   : >> { %1828 = vmatprep.subr.msk.bf16.mxu0 %vm3912_vm2, %v1826_v11  ;;  %vm3333_vm4 = vmand %vm3914_vm7, %vm3913_vm14  ;;  %vm3921_vm6 = vcmp.lt.s32.totalorder %v2742_v52, 15  ;;  %v1811_v28 = vpack.c.bf16 %v551_v36, %v550_v57  ;;  %vm3925_vm14 = vnez %v3865_v16  ;;  %vm3928_vm7 = vcmp.lt.s32.totalorder %v2625_v26, 15  ;;  %v744_v36 = vld [vmem:[%s3728_s1 + $0x78] sm:$0xff]  ;;  %v751_v57 = vld [vmem:[%s3728_s1 + $0xb0] sm:$0xff] }
  0xc7   : >> { %vm3918_vm10 = vmpackc.low %vm3140_vm11, %vm3917_vm1  ;;  %vm3924_vm11 = vcmp.lt.s32.totalorder %v2666_v35, 112  ;;  %vm3929_vm1 = vcmp.lt.s32.totalorder %v2635_v29, 15  ;;  %v1814_v29 = vpack.c.bf16 %v610_v23, %v609_v14  ;;  %v748_v11 = vld [vmem:[%s3728_s1 + $0x98] sm:$0xff]  ;;  %v750_v23 = vld [vmem:[%s3728_s1 + $0xa8] sm:$0xff] }
  0xc8   : >> { %1807 = vmatpush1.bf16.msk.msra.mxu1 %vm3918_vm10, %v1805_v56  ;;  %vm3919_vm8 = vmpackc.low %vm3235_vm9, %vm3223_vm12  ;;  %v606_v32 = vsel %vm3924_vm11, %v2147_v21, %v2152_v51  ;;  %vm3926_vm9 = vnez %v3861_v10  ;;  %v736_v21 = vld [vmem:[%s3728_s1 + $0x38] sm:$0xff]  ;;  %v735_v51 = vld [vmem:[%s3728_s1 + $0x30] sm:$0xff] }
  0xc9   : >> { %1831 = vmatpush1.bf16.msk.msra.mxu0 %vm3919_vm8, %v1829_v30  ;;  %vm3351_vm2 = vmand %vm3921_vm6, %vm3920_vm5  ;;  %vm3930_vm8 = vcmp.lt.s32.totalorder %v2666_v35, 111  ;;  %v749_v56 = vld [vmem:[%s3728_s1 + $0xa0] sm:$0xff]  ;;  %v752_v30 = vld [vmem:[%s3728_s1 + $0xb8] sm:$0xff] }
  0xca   : >> { %vm3927_vm12 = vmpackc.low %vm3925_vm14, %vm3926_vm9  ;;  %v649_v53 = vsel %vm3930_vm8, %v2177_v49, %v2182_v9  ;;  %vm3934_vm9 = vcmp.lt.s32.totalorder %v2666_v35, 112  ;;  %v729_v35 = vld [vmem:[%s3728_s1] sm:$0xff]  ;;  %v754_v14 = vld [vmem:[%s3728_s1 + $0xc8] sm:$0xff] }
  0xcb   : >> { %1810 = vmatprep.subr.msk.bf16.mxu1 %vm3927_vm12, %v1808_v41  ;;  %vm1815_vm10 = vmpackc.low %vm3929_vm1, %vm3928_vm7  ;;  %v605_v26 = vsel %vm3934_vm9, %v2146_v22, %v2151_v55  ;;  %v740_v22 = vld [vmem:[%s3728_s1 + $0x58] sm:$0xff]  ;;  %v739_v55 = vld [vmem:[%s3728_s1 + $0x50] sm:$0xff] }
  0xcc   : >> { %vm3931_vm5 = vmmov %vm3930_vm8  ;;  %vm3939_vm8 = vcmp.lt.s32.totalorder %v2657_v33, 15  ;;  %v1817_v48 = vpack.c.bf16 %v606_v32, %v605_v26  ;;  %v755_v41 = vld [vmem:[%s3728_s1 + $0xd0] sm:$0xff]  ;;  %v764_v43 = vld [vmem:[%s3728_s1 + $0x118] sm:$0xff] }
  0xcd   : >> { %v653_v27 = vsel %vm3931_vm5, %v2182_v9, %v2177_v49  ;;  %vm3932_vm6 = vmmov %vm3931_vm5  ;;  %v763_v49 = vld [vmem:[%s3728_s1 + $0x110] sm:$0xff]  ;;  %v762_v9 = vld [vmem:[%s3728_s1 + $0x108] sm:$0xff] }
  0xce   : >> { %v648_v24 = vsel %vm3932_vm6, %v2176_v47, %v2181_v19  ;;  %vm3933_vm11 = vmmov %vm3931_vm5  ;;  %v769_v32 = vld [vmem:[%s3728_s1 + $0x140] sm:$0xff]  ;;  %v771_v26 = vld [vmem:[%s3728_s1 + $0x150] sm:$0xff] }
  0xcf   : >> { %v652_v16 = vsel %vm3933_vm11, %v2181_v19, %v2176_v47  ;;  %vm1833_vm14 = vmpackc.low %vm3318_vm3, %vm3304_vm0  ;;  %v1835_v25 = vpack.c.bf16 %v649_v53, %v648_v24  ;;  %vm3938_vm0 = vcmp.lt.s32.totalorder %v2645_v31, 15  ;;  %vm3944_vm11 = vcmp.lt.s32.totalorder %v2730_v46, 15  ;;  %v733_v46 = vld [vmem:[%s3728_s1 + $0x20] sm:$0xff]  ;;  %v767_v47 = vld [vmem:[%s3728_s1 + $0x130] sm:$0xff] }
  0xd0   : >> { %v1832_v10 = vpack.c.bf16 %v653_v27, %v652_v16  ;;  %vm1836_vm12 = vmpackc.low %vm3351_vm2, %vm3333_vm4  ;;  %vm3940_vm4 = vcmp.lt.s32.totalorder %v2683_v39, 15  ;;  %vm3941_vm2 = vcmp.lt.s32.totalorder %v2688_v40, 15  ;;  %v3946_v40 = vmov 0.0   ;;  %v766_v19 = vld [vmem:[%s3728_s1 + $0x128] sm:$0xff]  ;;  %v773_v53 = vld [vmem:[%s3728_s1 + $0x160] sm:$0xff] }
  0xd1   : >> { %vm3935_vm7 = vmmov %vm3934_vm9  ;;  %v768_v27 = vld [vmem:[%s3728_s1 + $0x138] sm:$0xff] }
  0xd2   : >> { %v612_v37 = vsel %vm3935_vm7, %v2172_v58, %v2167_v17  ;;  %vm3936_vm1 = vmmov %vm3935_vm7  ;;  %1834 = vmatprep.subr.msk.bf16.mxu0 %vm1833_vm14, %v1832_v10  ;;  %vm3945_vm14 = vcmp.lt.s32.totalorder %v2742_v52, 15  ;;  %v737_v52 = vld [vmem:[%s3728_s1 + $0x40] sm:$0xff]  ;;  %v772_v24 = vld [vmem:[%s3728_s1 + $0x158] sm:$0xff] }
  0xd3   : >> { %v611_v61 = vsel %vm3936_vm1, %v2171_v44, %v2166_v20  ;;  %vm3937_vm3 = vmpackc.low %vm3261_vm15, %vm3247_vm13  ;;  %1837 = vmatpush1.bf16.msk.msra.mxu0 %vm1836_vm12, %v1835_v25  ;;  %vm849_vm13 = vcmask 261120   ;;  %v776_v16 = vld [vmem:[%s3728_s1 + $0x178] sm:$0xff]  ;;  %v774_v10 = vld [vmem:[%s3728_s1 + $0x168] sm:$0xff] }
  0xd4   : >> { %1813 = vmatpush1.bf16.msk.msra.mxu1 %vm3937_vm3, %v1811_v28  ;;  %vm1818_vm5 = vmpackc.low %vm3939_vm8, %vm3938_vm0  ;;  %v1820_v33 = vpack.c.bf16 %v612_v37, %v611_v61  ;;  %v765_v28 = vld [vmem:[%s3728_s1 + $0x120] sm:$0xff] }
  0xd5   : >> { %1816 = vmatprep.subr.msk.bf16.mxu1 %vm1815_vm10, %v1814_v29  ;;  %vm1821_vm6 = vmpackc.low %vm3941_vm2, %vm3940_vm4  ;;  %v775_v29 = vld [vmem:[%s3728_s1 + $0x170] sm:$0xff] }
  0xd6   : >> { %vm3942_vm15 = vmmov %vm3936_vm1  ;;  %1621 = vmatmul.mubr.msk.f32.vlgmr.msra.gmra.mrb[0].mxu0 %vm849_vm13, %v731_v34  ;;  %v681_v34 = vld [vmem:[%s3583_s28] sm:$0xff] }
  0xd7   : >> { %v608_v62 = vsel %vm3942_vm15, %v2167_v17, %v2172_v58  ;;  %vm3943_vm10 = vmmov %vm3936_vm1  ;;  %1129 = vmatprep.mubr.f32.mxu0 %v3946_v40  ;;  %v753_v17 = vld [vmem:[%s3728_s1 + $0xc0] sm:$0xff] }
  0xd8   : >> { %v607_v31 = vsel %vm3943_vm10, %v2166_v20, %v2171_v44  ;;  %1819 = vmatpush1.bf16.msk.msra.mxu1 %vm1818_vm5, %v1817_v48  ;;  %vm1824_vm9 = vmpackc.low %vm3945_vm14, %vm3944_vm11  ;;  %v757_v20 = vld [vmem:[%s3728_s1 + $0xe0] sm:$0xff]  ;;  %v756_v44 = vld [vmem:[%s3728_s1 + $0xd8] sm:$0xff] }
  0xd9   : >> { %1822 = vmatprep.subr.msk.bf16.mxu1 %vm1821_vm6, %v1820_v33  ;;  %v1823_v39 = vpack.c.bf16 %v608_v62, %v607_v31  ;;  %v761_v58 = vld [vmem:[%s3728_s1 + $0x100] sm:$0xff] }
  0xda   : >> { %1622 = vmatmul.mubr.msk.f32.gmra.mrb[2].mxu0 %vm849_vm13, %v734_v18  ;;  %v697_v18 = vunpack.c.l.bf16 %v681_v34 }
  0xdb   : >> { %1135 = vmatprep.mubr.f32.mxu0 %v3946_v40 }
  0xdc   : >> { %1825 = vmatpush1.bf16.msk.msra.mxu1 %vm1824_vm9, %v1823_v39 }
  0xde   : >> { %1623 = vmatmul.mubr.msk.f32.gmra.mrb[4].mxu0 %vm849_vm13, %v737_v52  ;;  %v682_v52 = vld [vmem:[%s3583_s28 + $0x8] sm:$0xff] }
  0xdf   : >> { %963 = vmatmul.mubr.f32.vlgmr.msra.gmra.mrb[0].mxu1 %v729_v35  ;;  %1141 = vmatprep.mubr.f32.mxu0 %v3946_v40 }
  0xe0   : >> { %968 = vmatprep.mubr.f32.mxu1 %v733_v46 }
  0xe2   : >> { %1624 = vmatmul.mubr.msk.f32.gmra.mrb[6].mxu0 %vm849_vm13, %v740_v22  ;;  %v698_v22 = vunpack.c.h.bf16 %v681_v34 }
  0xe3   : >> { %969 = vmatmul.mubr.f32.gmra.mrb[2].mxu1 %v732_v8  ;;  %1147 = vmatprep.mubr.f32.mxu0 %v3946_v40 }
  0xe4   : >> { %974 = vmatprep.mubr.f32.mxu1 %v736_v21 }
  0xe6   : >> { %1625 = vmatmul.mubr.msk.f32.gmra.mrb[8].mxu0 %vm849_vm13, %v743_v12 }
  0xe7   : >> { %975 = vmatmul.mubr.f32.gmra.mrb[4].mxu1 %v735_v51  ;;  %1153 = vmatprep.mubr.f32.mxu0 %v3946_v40 }
  0xe8   : >> { %980 = vmatprep.mubr.f32.mxu1 %v739_v55 }
  0xea   : >> { %1626 = vmatmul.mubr.msk.f32.gmra.mrb[10].mxu0 %vm849_vm13, %v746_v38  ;;  %v699_v38 = vunpack.c.l.bf16 %v682_v52 }
  0xeb   : >> { %981 = vmatmul.mubr.f32.gmra.mrb[6].mxu1 %v738_v50  ;;  %1159 = vmatprep.mubr.f32.mxu0 %v3946_v40  ;;  %v683_v50 = vld [vmem:[%s3583_s28 + $0x10] sm:$0xff] }
  0xec   : >> { %986 = vmatprep.mubr.f32.mxu1 %v742_v63 }
  0xee   : >> { %1627 = vmatmul.mubr.msk.f32.gmra.mrb[12].mxu0 %vm849_vm13, %v749_v56 }
  0xef   : >> { %987 = vmatmul.mubr.f32.gmra.mrb[8].mxu1 %v741_v54  ;;  %1165 = vmatprep.mubr.f32.mxu0 %v3946_v40 }
  0xf0   : >> { %992 = vmatprep.mubr.f32.mxu1 %v745_v59  ;;  %v700_v59 = vunpack.c.h.bf16 %v682_v52  ;;  %v687_v52 = vld [vmem:[%s3583_s28 + $0x30] sm:$0xff] }
  0xf2   : >> { %1628 = vmatmul.mubr.msk.f32.gmra.mrb[14].mxu0 %vm849_vm13, %v752_v30 }
  0xf3   : >> { %993 = vmatmul.mubr.f32.gmra.mrb[10].mxu1 %v744_v36  ;;  %1171 = vmatprep.mubr.f32.mxu0 %v3946_v40 }
  0xf4   : >> { %998 = vmatprep.mubr.f32.mxu1 %v748_v11  ;;  %v684_v11 = vld [vmem:[%s3583_s28 + $0x18] sm:$0xff] }
  0xf6   : >> { %1629 = vmatmul.mubr.msk.f32.gmra.mrb[16].mxu0 %vm849_vm13, %v755_v41 }
  0xf7   : >> { %999 = vmatmul.mubr.f32.gmra.mrb[12].mxu1 %v747_v13  ;;  %1177 = vmatprep.mubr.f32.mxu0 %v3946_v40  ;;  %v701_v13 = vunpack.c.l.bf16 %v683_v50 }
  0xf8   : >> { %1004 = vmatprep.mubr.f32.mxu1 %v751_v57 }
  0xfa   : >> { %1630 = vmatmul.mubr.msk.f32.gmra.mrb[18].mxu0 %vm849_vm13, %v758_v42 }
  0xfb   : >> { %1005 = vmatmul.mubr.f32.gmra.mrb[14].mxu1 %v750_v23  ;;  %1183 = vmatprep.mubr.f32.mxu0 %v3946_v40 }
  0xfc   : >> { %1010 = vmatprep.mubr.f32.mxu1 %v754_v14  ;;  %v702_v14 = vunpack.c.h.bf16 %v683_v50 }
  0xfe   : >> { %1631 = vmatmul.mubr.msk.f32.gmra.mrb[20].mxu0 %vm849_vm13, %v761_v58 }
  0xff   : >> { %1011 = vmatmul.mubr.f32.gmra.mrb[16].mxu1 %v753_v17  ;;  %1189 = vmatprep.mubr.f32.mxu0 %v3946_v40 }
 0x100   : >> { %1016 = vmatprep.mubr.f32.mxu1 %v757_v20  ;;  %v703_v20 = vunpack.c.l.bf16 %v684_v11 }
 0x102   : >> { %1632 = vmatmul.mubr.msk.f32.gmra.mrb[22].mxu0 %vm849_vm13, %v764_v43 }
 0x103   : >> { %1017 = vmatmul.mubr.f32.gmra.mrb[18].mxu1 %v756_v44  ;;  %1195 = vmatprep.mubr.f32.mxu0 %v3946_v40  ;;  %v685_v44 = vld [vmem:[%s3583_s28 + $0x20] sm:$0xff] }
 0x104   : >> { %1022 = vmatprep.mubr.f32.mxu1 %v760_v45 }
 0x106   : >> { %1633 = vmatmul.mubr.msk.f32.gmra.mrb[24].mxu0 %vm849_vm13, %v767_v47 }
 0x107   : >> { %1023 = vmatmul.mubr.f32.gmra.mrb[20].mxu1 %v759_v60  ;;  %1201 = vmatprep.mubr.f32.mxu0 %v3946_v40  ;;  %v704_v60 = vunpack.c.h.bf16 %v684_v11 }
 0x108   : >> { %1028 = vmatprep.mubr.f32.mxu1 %v763_v49 }
 0x10a   : >> { %1634 = vmatmul.mubr.msk.f32.gmra.mrb[26].mxu0 %vm849_vm13, %v770_v15 }
 0x10b   : >> { %1029 = vmatmul.mubr.f32.gmra.mrb[22].mxu1 %v762_v9  ;;  %1207 = vmatprep.mubr.f32.mxu0 %v3946_v40 }
 0x10c   : >> { %1034 = vmatprep.mubr.f32.mxu1 %v766_v19 }
 0x10e   : >> { %1635 = vmatmul.mubr.msk.f32.gmra.mrb[28].mxu0 %vm849_vm13, %v773_v53 }
 0x10f   : >> { %1035 = vmatmul.mubr.f32.gmra.mrb[24].mxu1 %v765_v28  ;;  %1213 = vmatprep.mubr.f32.mxu0 %v3946_v40 }
 0x110   : >> { %1040 = vmatprep.mubr.f32.mxu1 %v769_v32  ;;  %v705_v32 = vunpack.c.l.bf16 %v685_v44 }
 0x112   : >> { %1636 = vmatmul.mubr.msk.f32.gmra.mrb[30].mxu0 %vm849_vm13, %v776_v16 }
 0x113   : >> { %1041 = vmatmul.mubr.f32.gmra.mrb[26].mxu1 %v768_v27 }
 0x114   : >> { %1046 = vmatprep.mubr.f32.mxu1 %v772_v24 }
 0x117   : >> { %1047 = vmatmul.mubr.f32.gmra.mrb[28].mxu1 %v771_v26  ;;  %v686_v26 = vld [vmem:[%s3583_s28 + $0x28] sm:$0xff] }
 0x118   : >> { %1052 = vmatprep.mubr.f32.mxu1 %v775_v29 }
 0x11b   : >> { %1053 = vmatmul.mubr.f32.gmra.mrb[30].mxu1 %v774_v10 }
 0x1a9   : >> { %v1125_v25 = vpop.f32.mrb[0].mxu0 }
 0x1aa   : >> { %v1127_v37 = vpop.f32.mrb[1].mxu0 }
 0x1ad   : >> { %v1131_v61 = vpop.f32.mrb[2].mxu0 }
 0x1ae   : >> { %v1133_v48 = vpop.f32.mrb[3].mxu0 }
 0x1b1   : >> { %v1137_v40 = vpop.f32.mrb[4].mxu0 }
 0x1b2   : >> { %v964_v62 = vpop.f32.mrb[0].mxu1  ;;  %v1139_v35 = vpop.f32.mrb[5].mxu0 }
 0x1b3   : >> { %v1126_v31 = vadd.f32 %v1125_v25, %v964_v62  ;;  %v966_v33 = vpop.f32.mrb[1].mxu1 }
 0x1b4   : >> { %v1128_v39 = vadd.f32 %v1127_v37, %v966_v33  ;;  %v706_v37 = vunpack.c.h.bf16 %v685_v44 }
 0x1b5   : >> { %v1143_v55 = vpop.f32.mrb[6].mxu0  ;;  %v1220_v12 = vadd.f32 %v1126_v31, %v697_v18 }
 0x1b6   : >> { %v970_v46 = vpop.f32.mrb[2].mxu1  ;;  %v1145_v63 = vpop.f32.mrb[7].mxu0  ;;  %v1221_v30 = vadd.f32 %v1128_v39, %v698_v22  ;;  %v707_v39 = vunpack.c.l.bf16 %v686_v26 }
 0x1b7   : >> { %v1132_v8 = vadd.f32 %v1131_v61, %v970_v46  ;;  %v972_v21 = vpop.f32.mrb[3].mxu1  ;;  %v1637_v23 = vmul.f32 -1.442695, %v1220_v12  ;;  %v708_v46 = vunpack.c.h.bf16 %v686_v26 }
 0x1b8   : >> { %v1134_v51 = vadd.f32 %v1133_v48, %v972_v21  ;;  %v1638_v47 = vmul.f32 -1.442695, %v1221_v30 }
 0x1b9   : >> { %v1149_v41 = vpop.f32.mrb[8].mxu0  ;;  %v1222_v17 = vadd.f32 %v1132_v8, %v699_v38  ;;  %2183 = vpow2.f32 %v1637_v23  ;;  %v709_v38 = vunpack.c.l.bf16 %v687_v52 }
 0x1ba   : >> { %v976_v54 = vpop.f32.mrb[4].mxu1  ;;  %v1151_v42 = vpop.f32.mrb[9].mxu0  ;;  %v1223_v45 = vadd.f32 %v1134_v51, %v700_v59  ;;  %2185 = vpow2.f32 %v1638_v47 }
 0x1bb   : >> { %v1138_v56 = vadd.f32 %v1137_v40, %v976_v54  ;;  %v978_v36 = vpop.f32.mrb[5].mxu1  ;;  %v1639_v27 = vmul.f32 -1.442695, %v1222_v17 }
 0x1bc   : >> { %v1140_v57 = vadd.f32 %v1139_v35, %v978_v36  ;;  %v1640_v29 = vmul.f32 -1.442695, %v1223_v45  ;;  %v688_v45 = vld [vmem:[%s3583_s28 + $0x38] sm:$0xff] }
 0x1bd   : >> { %v1224_v9 = vadd.f32 %v1138_v56, %v701_v13  ;;  %v1155_v15 = vpop.f32.mrb[10].mxu0  ;;  %2187 = vpow2.f32 %v1639_v27  ;;  %v710_v56 = vunpack.c.h.bf16 %v687_v52  ;;  %v711_v27 = vunpack.c.l.bf16 %v688_v45 }
 0x1be   : >> { %v982_v58 = vpop.f32.mrb[6].mxu1  ;;  %v1225_v28 = vadd.f32 %v1140_v57, %v702_v14  ;;  %v1157_v53 = vpop.f32.mrb[11].mxu0  ;;  %2189 = vpow2.f32 %v1640_v29 }
 0x1bf   : >> { %v1144_v43 = vadd.f32 %v1143_v55, %v982_v58  ;;  %v984_v49 = vpop.f32.mrb[7].mxu1  ;;  %v1641_v48 = vmul.f32 -1.442695, %v1224_v9 }
 0x1c0   : >> { %v1146_v19 = vadd.f32 %v1145_v63, %v984_v49  ;;  %v1642_v31 = vmul.f32 -1.442695, %v1225_v28 }
 0x1c1   : >> { %v1226_v24 = vadd.f32 %v1144_v43, %v703_v20  ;;  %v1161_v62 = vpop.f32.mrb[12].mxu0  ;;  %2191 = vpow2.f32 %v1641_v48 }
 0x1c2   : >> { %v988_v16 = vpop.f32.mrb[8].mxu1  ;;  %v1227_v10 = vadd.f32 %v1146_v19, %v704_v60  ;;  %v1163_v40 = vpop.f32.mrb[13].mxu0  ;;  %2193 = vpow2.f32 %v1642_v31 }
 0x1c3   : >> { %v1150_v25 = vadd.f32 %v1149_v41, %v988_v16  ;;  %v990_v61 = vpop.f32.mrb[9].mxu1  ;;  %v1643_v18 = vmul.f32 -1.442695, %v1226_v24  ;;  %v2184_v36 = vpop.eup %2183 }
 0x1c4   : >> { %v1152_v34 = vadd.f32 %v1151_v42, %v990_v61  ;;  %v1644_v8 = vmul.f32 -1.442695, %v1227_v10  ;;  %v2186_v20 = vpop.eup %2185  ;;  %v1276_v58 = vadd.f32 1.0, %v2184_v36  ;;  %v689_v61 = vld [vmem:[%s3583_s28 + $0x40] sm:$0xff] }
 0x1c5   : >> { %v1228_v33 = vadd.f32 %v1150_v25, %v705_v32  ;;  %v1167_v12 = vpop.f32.mrb[14].mxu0  ;;  %2195 = vpow2.f32 %v1643_v18 }
 0x1c6   : >> { %v994_v35 = vpop.f32.mrb[10].mxu1  ;;  %v1229_v21 = vadd.f32 %v1152_v34, %v706_v37  ;;  %v1169_v54 = vpop.f32.mrb[15].mxu0  ;;  %2197 = vpow2.f32 %v1644_v8  ;;  %v712_v37 = vunpack.c.h.bf16 %v688_v45  ;;  %v713_v8 = vunpack.c.l.bf16 %v689_v61 }
 0x1c7   : >> { %v1156_v22 = vadd.f32 %v1155_v15, %v994_v35  ;;  %v996_v51 = vpop.f32.mrb[11].mxu1  ;;  %v1645_v50 = vmul.f32 -1.442695, %v1228_v33  ;;  %v2188_v9 = vpop.eup %2187 }
 0x1c8   : >> { %v1158_v55 = vadd.f32 %v1157_v53, %v996_v51  ;;  %v1646_v11 = vmul.f32 -1.442695, %v1229_v21  ;;  %v2190_v32 = vpop.eup %2189  ;;  %v1277_v53 = vadd.f32 1.0, %v2186_v20  ;;  %v1278_v25 = vadd.f32 1.0, %v2188_v9 }
 0x1c9   : >> { %v1230_v63 = vadd.f32 %v1156_v22, %v707_v39  ;;  %v1173_v14 = vpop.f32.mrb[16].mxu0  ;;  %2199 = vpow2.f32 %v1645_v50  ;;  %v1279_v31 = vadd.f32 1.0, %v2190_v32  ;;  %v714_v21 = vunpack.c.h.bf16 %v689_v61  ;;  %v690_v50 = vld [vmem:[%s3583_s28 + $0x48] sm:$0xff]  ;;  %v693_v61 = vld [vmem:[%s3583_s28 + $0x60] sm:$0xff] }
 0x1ca   : >> { %v1000_v59 = vpop.f32.mrb[12].mxu1  ;;  %v1231_v30 = vadd.f32 %v1158_v55, %v708_v46  ;;  %v1175_v17 = vpop.f32.mrb[17].mxu0  ;;  %2201 = vpow2.f32 %v1646_v11 }
 0x1cb   : >> { %v1162_v13 = vadd.f32 %v1161_v62, %v1000_v59  ;;  %v1002_v57 = vpop.f32.mrb[13].mxu1  ;;  %v1647_v41 = vmul.f32 -1.442695, %v1230_v63  ;;  %v2192_v16 = vpop.eup %2191 }
 0x1cc   : >> { %v1164_v23 = vadd.f32 %v1163_v40, %v1002_v57  ;;  %v1648_v60 = vmul.f32 -1.442695, %v1231_v30  ;;  %v2194_v10 = vpop.eup %2193  ;;  %v1280_v18 = vadd.f32 1.0, %v2192_v16 }
 0x1cd   : >> { %v1232_v42 = vadd.f32 %v1162_v13, %v709_v38  ;;  %2203 = vpow2.f32 %v1647_v41  ;;  %v1179_v28 = vpop.f32.mrb[18].mxu0  ;;  %v1281_v52 = vadd.f32 1.0, %v2194_v10 }
 0x1ce   : >> { %v1233_v44 = vadd.f32 %v1164_v23, %v710_v56  ;;  %v1006_v43 = vpop.f32.mrb[14].mxu1  ;;  %v1181_v24 = vpop.f32.mrb[19].mxu0  ;;  %2205 = vrcp.f32 %v1276_v58  ;;  %v715_v23 = vunpack.c.l.bf16 %v690_v50 }
 0x1cf   : >> { %v1168_v49 = vadd.f32 %v1167_v12, %v1006_v43  ;;  %v1008_v47 = vpop.f32.mrb[15].mxu1  ;;  %v1649_v19 = vmul.f32 -1.442695, %v1232_v42  ;;  %2207 = vpow2.f32 %v1648_v60  ;;  %v2196_v62 = vpop.eup %2195  ;;  %v716_v60 = vunpack.c.h.bf16 %v690_v50 }
 0x1d0   : >> { %v1170_v15 = vadd.f32 %v1169_v54, %v1008_v47  ;;  %v1650_v26 = vmul.f32 -1.442695, %v1233_v44  ;;  %v2198_v40 = vpop.eup %2197  ;;  %v1282_v55 = vadd.f32 1.0, %v2196_v62 }
 0x1d1   : >> { %2209 = vpow2.f32 %v1649_v19  ;;  %v1185_v39 = vpop.f32.mrb[20].mxu0  ;;  %v1234_v35 = vadd.f32 %v1168_v49, %v711_v27  ;;  %v1283_v54 = vadd.f32 1.0, %v2198_v40 }
 0x1d2   : >> { %v1012_v29 = vpop.f32.mrb[16].mxu1  ;;  %2211 = vrcp.f32 %v1277_v53  ;;  %v1187_v46 = vpop.f32.mrb[21].mxu0  ;;  %v1235_v12 = vadd.f32 %v1170_v15, %v712_v37 }
 0x1d3   : >> { %v1174_v48 = vadd.f32 %v1173_v14, %v1012_v29  ;;  %v1014_v34 = vpop.f32.mrb[17].mxu1  ;;  %2213 = vpow2.f32 %v1650_v26  ;;  %v2200_v51 = vpop.eup %2199  ;;  %v1651_v11 = vmul.f32 -1.442695, %v1234_v35  ;;  %v691_v14 = vld [vmem:[%s3583_s28 + $0x50] sm:$0xff] }
 0x1d4   : >> { %v1176_v33 = vadd.f32 %v1175_v17, %v1014_v34  ;;  %2215 = vrcp.f32 %v1278_v25  ;;  %v2202_v36 = vpop.eup %2201  ;;  %v1324_v57 = vadd.f32 1.0, %v2200_v51  ;;  %v1652_v17 = vmul.f32 -1.442695, %v1235_v12 }
 0x1d5   : >> { %2217 = vrcp.f32 %v1279_v31  ;;  %v1191_v56 = vpop.f32.mrb[22].mxu0  ;;  %v1236_v41 = vadd.f32 %v1174_v48, %v713_v8  ;;  %v1325_v43 = vadd.f32 1.0, %v2202_v36  ;;  %v717_v15 = vunpack.c.l.bf16 %v691_v14 }
 0x1d6   : >> { %v1018_v22 = vpop.f32.mrb[18].mxu1  ;;  %2219 = vrcp.f32 %v1280_v18  ;;  %v1193_v30 = vpop.f32.mrb[23].mxu0  ;;  %v1237_v20 = vadd.f32 %v1176_v33, %v714_v21  ;;  %v718_v10 = vunpack.c.h.bf16 %v691_v14 }
 0x1d7   : >> { %v1180_v63 = vadd.f32 %v1179_v28, %v1018_v22  ;;  %v1020_v38 = vpop.f32.mrb[19].mxu1  ;;  %v2204_v13 = vpop.eup %2203  ;;  %2221 = vrcp.f32 %v1281_v52  ;;  %v1653_v53 = vmul.f32 -1.442695, %v1236_v41  ;;  %v721_v22 = vunpack.c.l.bf16 %v693_v61 }
 0x1d8   : >> { %v1182_v59 = vadd.f32 %v1181_v24, %v1020_v38  ;;  %2223 = vrcp.f32 %v1282_v55  ;;  %v3596_v45 = vpop.eup %2205  ;;  %v1326_v19 = vadd.f32 1.0, %v2204_v13  ;;  %v692_v24 = vld [vmem:[%s3583_s28 + $0x58] sm:$0xff]  ;;  %v1654_v29 = vmul.f32 -1.442695, %v1237_v20  ;;  %v694_v55 = vld [vmem:[%s3583_s28 + $0x68] sm:$0xff] }
 0x1d9   : >> { %2225 = vrcp.f32 %v1283_v54  ;;  %v1197_v47 = vpop.f32.mrb[24].mxu0  ;;  %v2208_v9 = vpop.eup %2207  ;;  %v1238_v27 = vadd.f32 %v1180_v63, %v715_v23  ;;  %v719_v35 = vunpack.c.l.bf16 %v692_v24  ;;  %v720_v21 = vunpack.c.h.bf16 %v692_v24 }
 0x1da   : >> { %v1024_v42 = vpop.f32.mrb[20].mxu1  ;;  %2227 = vpow2.f32 %v1651_v11  ;;  %v1199_v28 = vpop.f32.mrb[25].mxu0  ;;  %v1327_v34 = vadd.f32 1.0, %v2208_v9  ;;  %v1239_v62 = vadd.f32 %v1182_v59, %v716_v60  ;;  %v722_v38 = vunpack.c.h.bf16 %v693_v61 }
 0x1db   : >> { %v1186_v58 = vadd.f32 %v1185_v39, %v1024_v42  ;;  %v1026_v44 = vpop.f32.mrb[21].mxu1  ;;  %v2210_v32 = vpop.eup %2209  ;;  %2229 = vrcp.f32 %v1324_v57  ;;  %v1655_v8 = vmul.f32 -1.442695, %v1238_v27  ;;  %v723_v41 = vunpack.c.l.bf16 %v694_v55 }
 0x1dc   : >> { %v1188_v49 = vadd.f32 %v1187_v46, %v1026_v44  ;;  %v3599_v26 = vpop.eup %2211  ;;  %2231 = vpow2.f32 %v1652_v17  ;;  %v1328_v40 = vadd.f32 1.0, %v2210_v32  ;;  %v724_v27 = vunpack.c.h.bf16 %v694_v55 }
 0x1dd   : >> { %v2214_v48 = vpop.eup %2213  ;;  %2233 = vrcp.f32 %v1325_v43  ;;  %v1203_v33 = vpop.f32.mrb[26].mxu0  ;;  %v1240_v18 = vadd.f32 %v1186_v58, %v717_v15 }
 0x1de   : >> { %v1030_v16 = vpop.f32.mrb[22].mxu1  ;;  %v3602_v39 = vpop.eup %2215  ;;  %2235 = vrcp.f32 %v1326_v19  ;;  %v1329_v50 = vadd.f32 1.0, %v2214_v48  ;;  %v1241_v36 = vadd.f32 %v1188_v49, %v718_v10  ;;  %v695_v49 = vld [vmem:[%s3583_s28 + $0x70] sm:$0xff] }
 0x1df   : >> { %v1192_v25 = vadd.f32 %v1191_v56, %v1030_v16  ;;  %v1032_v37 = vpop.f32.mrb[23].mxu1  ;;  %v1205_v46 = vpop.f32.mrb[27].mxu0  ;;  %2237 = vpow2.f32 %v1653_v53  ;;  %v1656_v56 = vmul.f32 -1.442695, %v1239_v62  ;;  %v1657_v57 = vmul.f32 -1.442695, %v1240_v18 }
 0x1e0   : >> { %v1194_v31 = vadd.f32 %v1193_v30, %v1032_v37  ;;  %v3604_v52 = vpop.eup %2217  ;;  %2239 = vpow2.f32 %v1654_v29  ;;  %v1658_v9 = vmul.f32 -1.442695, %v1241_v36  ;;  %v725_v10 = vunpack.c.l.bf16 %v695_v49  ;;  %v696_v62 = vld [vmem:[%s3583_s28 + $0x78] sm:$0xff] }
 0x1e1   : >> { %v3607_v12 = vpop.eup %2219  ;;  %2241 = vrcp.f32 %v1327_v34  ;;  %v1209_v30 = vpop.f32.mrb[28].mxu0  ;;  %v1242_v58 = vadd.f32 %v1192_v25, %v719_v35 }
 0x1e2   : >> { %v1036_v51 = vpop.f32.mrb[24].mxu1  ;;  %v3609_v59 = vpop.eup %2221  ;;  %2243 = vrcp.f32 %v1328_v40  ;;  %v1243_v19 = vadd.f32 %v1194_v31, %v720_v21 }
 0x1e3   : >> { %v1198_v63 = vadd.f32 %v1197_v47, %v1036_v51  ;;  %v1038_v54 = vpop.f32.mrb[25].mxu1  ;;  %v3611_v13 = vpop.eup %2223  ;;  %2245 = vpow2.f32 %v1655_v8  ;;  %v1659_v61 = vmul.f32 -1.442695, %v1242_v58 }
 0x1e4   : >> { %v1200_v11 = vadd.f32 %v1199_v28, %v1038_v54  ;;  %v1211_v23 = vpop.f32.mrb[29].mxu0  ;;  %v3613_v14 = vpop.eup %2225  ;;  %2247 = vrcp.f32 %v1329_v50 }
 0x1e5   : >> { %v1244_v42 = vadd.f32 %v1198_v63, %v721_v22  ;;  %v2228_v20 = vpop.eup %2227  ;;  %2249 = vpow2.f32 %v1656_v56  ;;  %v1215_v28 = vpop.f32.mrb[30].mxu0  ;;  %v727_v22 = vunpack.c.l.bf16 %v696_v62 }
 0x1e6   : >> { %v1042_v17 = vpop.f32.mrb[26].mxu1  ;;  %v1245_v44 = vadd.f32 %v1200_v11, %v722_v38  ;;  %v2230_v47 = vpop.eup %2229  ;;  %2251 = vpow2.f32 %v1657_v57  ;;  %v1330_v29 = vadd.f32 1.0, %v2228_v20  ;;  %v728_v38 = vunpack.c.h.bf16 %v696_v62 }
 0x1e7   : >> { %v1204_v43 = vadd.f32 %v1203_v33, %v1042_v17  ;;  %v1044_v60 = vpop.f32.mrb[27].mxu1  ;;  %v2232_v32 = vpop.eup %2231  ;;  %2253 = vtanh.f32 %v1244_v42  ;;  %v1660_v33 = vmul.f32 -1.442695, %v1243_v19 }
 0x1e8   : >> { %v1206_v15 = vadd.f32 %v1205_v46, %v1044_v60  ;;  %v1217_v24 = vpop.f32.mrb[31].mxu0  ;;  %v2234_v16 = vpop.eup %2233  ;;  %2255 = vtanh.f32 %v1245_v44  ;;  %v726_v46 = vunpack.c.h.bf16 %v695_v49  ;;  %v1331_v50 = vadd.f32 1.0, %v2232_v32 }
 0x1e9   : >> { %v1246_v53 = vadd.f32 %v1204_v43, %v723_v41  ;;  %v2236_v37 = vpop.eup %2235  ;;  %2257 = vpow2.f32 %v1658_v9  ;;  %v1404_v43 = vmul.f32 %v2417_v7, %v2230_v47  ;;  %v1405_v9 = vmul.f32 %v2413_v6, %v2234_v16 }
 0x1ea   : >> { %v1048_v25 = vpop.f32.mrb[28].mxu1  ;;  %v2238_v31 = vpop.eup %2237  ;;  %v1247_v35 = vadd.f32 %v1206_v15, %v724_v27  ;;  %v1406_v27 = vmul.f32 %v2409_v5, %v2236_v37 }
 0x1eb   : >> { %v1210_v48 = vadd.f32 %v1209_v30, %v1048_v25  ;;  %v1050_v34 = vpop.f32.mrb[29].mxu1  ;;  %v2240_v18 = vpop.eup %2239  ;;  %2259 = vtanh.f32 %v1246_v53  ;;  %v1372_v36 = vadd.f32 1.0, %v2238_v31 }
 0x1ec   : >> { %v1212_v40 = vadd.f32 %v1211_v23, %v1050_v34  ;;  %v2242_v8 = vpop.eup %2241  ;;  %2261 = vrcp.f32 %v1330_v29  ;;  %v1373_v58 = vadd.f32 1.0, %v2240_v18 }
 0x1ed   : >> { %v1248_v21 = vadd.f32 %v1210_v48, %v725_v10  ;;  %v2244_v55 = vpop.eup %2243  ;;  %2263 = vpow2.f32 %v1659_v61  ;;  %v1407_v37 = vmul.f32 %v2405_v4, %v2242_v8 }
 0x1ee   : >> { %v1054_v51 = vpop.f32.mrb[30].mxu1  ;;  %v2246_v56 = vpop.eup %2245  ;;  %2265 = vpow2.f32 %v1660_v33  ;;  %v1249_v57 = vadd.f32 %v1212_v40, %v726_v46  ;;  %v1408_v48 = vmul.f32 %v2401_v3, %v2244_v55 }
 0x1ef   : >> { %v1216_v63 = vadd.f32 %v1215_v28, %v1054_v51  ;;  %v1056_v54 = vpop.f32.mrb[31].mxu1  ;;  %v2248_v30 = vpop.eup %2247  ;;  %2267 = vtanh.f32 %v1247_v35  ;;  %v1374_v28 = vadd.f32 1.0, %v2246_v56 }
 0x1f0   : >> { %v1218_v11 = vadd.f32 %v1217_v24, %v1056_v54  ;;  %v2250_v41 = vpop.eup %2249  ;;  %2269 = vtanh.f32 %v1248_v21 }
 0x1f1   : >> { %v1250_v23 = vadd.f32 %v1216_v63, %v727_v22  ;;  %v2252_v42 = vpop.eup %2251  ;;  %2271 = vrcp.f32 %v1331_v50  ;;  %v1375_v29 = vadd.f32 1.0, %v2250_v41 }
 0x1f2   : >> { %v1251_v17 = vadd.f32 %v1218_v11, %v728_v38  ;;  %v2254_v20 = vpop.eup %2253  ;;  %2273 = vrcp.f32 %v1372_v36 }
 0x1f3   : >> { %v2256_v44 = vpop.eup %2255  ;;  %v1412_v60 = vmul.f32 %v2254_v20, %v3596_v45  ;;  %2275 = vtanh.f32 %v1249_v57 }
 0x1f4   : >> { %v2258_v49 = vpop.eup %2257  ;;  %v1413_v19 = vmul.f32 %v2256_v44, %v3599_v26  ;;  %2277 = vtanh.f32 %v1250_v23  ;;  %v1376_v26 = vadd.f32 1.0, %v2252_v42 }
 0x1f5   : >> { %v2260_v15 = vpop.eup %2259  ;;  %v3621_v7 = vadd.f32 %v1412_v60, %v1404_v43   ;;  %2279 = vtanh.f32 %v1251_v17  ;;  %v1377_v10 = vadd.f32 1.0, %v2258_v49 }
 0x1f6   : >> { %v2262_v53 = vpop.eup %2261  ;;  %2281 = vrcp.f32 %v1373_v58  ;;  %v3624_v6 = vadd.f32 %v1413_v19, %v1405_v9   ;;  %v1414_v45 = vmul.f32 %v2260_v15, %v3602_v39 }
 0x1f7   : >> { %v3947_v32 = vmov %v3621_v7  ;;  %v2264_v24 = vpop.eup %2263  ;;  %v1410_v8 = vmul.f32 %v2393_v1, %v2262_v53 }
 0x1f8   : >> { %v3948_v47 = vmov %v3624_v6  ;;  %2283 = vtanh.f32 %v3947_v32  ;;  %v2266_v16 = vpop.eup %2265  ;;  %v3629_v5 = vadd.f32 %v1414_v45, %v1406_v27   ;;  %1455 = vst [vmem:[%s2515_s6] sm:$0xff] (%p3664_p4), %v3947_v32 }
 0x1f9   : >> { %2285 = vtanh.f32 %v3948_v47  ;;  %v2268_v7 = vpop.eup %2267  ;;  %v1379_v40 = vadd.f32 1.0, %v2266_v16  ;;  %1456 = vst [vmem:[%s2515_s6 + $0x8] sm:$0xff] (%p3664_p4), %v3948_v47 }
 0x1fa   : >> { %v3949_v25 = vmov %v3629_v5  ;;  %2287 = vrcp.f32 %v1374_v28  ;;  %v2270_v61 = vpop.eup %2269  ;;  %v1415_v6 = vmul.f32 %v2268_v7, %v3604_v52  ;;  %v1378_v5 = vadd.f32 1.0, %v2264_v24 }
 0x1fb   : >> { %2289 = vtanh.f32 %v3949_v25  ;;  %v2272_v39 = vpop.eup %2271  ;;  %v1416_v34 = vmul.f32 %v2270_v61, %v3607_v12  ;;  %v1409_v52 = vmul.f32 %v2397_v2, %v2248_v30  ;;  %v3961_v7 = vmov %v3947_v32  ;;  %1457 = vst [vmem:[%s2515_s6 + $0x10] sm:$0xff] (%p3664_p4), %v3949_v25 }
 0x1fc   : >> { %2291 = vrcp.f32 %v1375_v29  ;;  %v2274_v62 = vpop.eup %2273  ;;  %v3636_v4 = vadd.f32 %v1415_v6, %v1407_v37   ;;  %v1411_v22 = vmul.f32 %v2389_v0, %v2272_v39  ;;  %v3960_v6 = vmov %v3948_v47 }
 0x1fd   : >> { %2293 = vrcp.f32 %v1376_v26  ;;  %v2276_v33 = vpop.eup %2275  ;;  %v3638_v3 = vadd.f32 %v1416_v34, %v1408_v48  }
 0x1fe   : >> { %v3950_v31 = vmov %v3636_v4  ;;  %2295 = vrcp.f32 %v1377_v10  ;;  %v2278_v35 = vpop.eup %2277  ;;  %v1417_v46 = vmul.f32 %v2276_v33, %v3609_v59 }
 0x1ff   : >> { %v3951_v18 = vmov %v3638_v3  ;;  %2297 = vtanh.f32 %v3950_v31  ;;  %v2280_v12 = vpop.eup %2279  ;;  %v1418_v4 = vmul.f32 %v2278_v35, %v3611_v13  ;;  %1458 = vst [vmem:[%s2515_s6 + $0x18] sm:$0xff] (%p3664_p4), %v3950_v31 }
 0x200   : >> { %2299 = vtanh.f32 %v3951_v18  ;;  %v2282_v21 = vpop.eup %2281  ;;  %v3648_v2 = vadd.f32 %v1417_v46, %v1409_v52   ;;  %v1419_v3 = vmul.f32 %v2280_v12, %v3613_v14  ;;  %1459 = vst [vmem:[%s2515_s6 + $0x20] sm:$0xff] (%p3664_p4), %v3951_v18 }
 0x201   : >> { %2301 = vrcp.f32 %v1378_v5  ;;  %v1426_v59 = vadd.f32 %v1418_v4, %v1410_v8   ;;  %v3958_v4 = vmov %v3950_v31  ;;  %v3959_v5 = vmov %v3949_v25 }
 0x202   : >> { %v3952_v51 = vmov %v3648_v2  ;;  %v2284_v55 = vpop.eup %2283  ;;  %2303 = vrcp.f32 %v1379_v40  ;;  %v1427_v50 = vadd.f32 %v1419_v3, %v1411_v22   ;;  %v3957_v3 = vmov %v3951_v18 }
 0x203   : >> { %v2286_v1 = vpop.eup %2285  ;;  %v1436_v15 = vmul.f32 %v2284_v55, %v2274_v62   ;;  %2305 = vtanh.f32 %v3952_v51  ;;  %1460 = vst [vmem:[%s2515_s6 + $0x28] sm:$0xff] (%p3664_p4), %v3952_v51  ;;  %1461 = vst [vmem:[%s2515_s6 + $0x30] sm:$0xff] (%p3664_p4), %v1426_v59 }
 0x204   : >> { %v2288_v13 = vpop.eup %2287  ;;  %v1437_v14 = vmul.f32 %v2286_v1, %v2282_v21   ;;  %2307 = vtanh.f32 %v1426_v59  ;;  %v3955_v1 = vmov %v1426_v59  ;;  %1462 = vst [vmem:[%s2515_s6 + $0x38] sm:$0xff] (%p3664_p4), %v1427_v50 }
 0x205   : >> { %v2290_v0 = vpop.eup %2289  ;;  %1447 = vst [vmem:[%s3652_s30] sm:$0xff] %v1436_v15  ;;  %2309 = vtanh.f32 %v1427_v50 }
 0x206   : >> { %v2292_v2 = vpop.eup %2291  ;;  %1448 = vst [vmem:[%s3652_s30 + $0x8] sm:$0xff] %v1437_v14  ;;  %v1438_v13 = vmul.f32 %v2290_v0, %v2288_v13   ;;  %v3954_v0 = vmov %v1427_v50 }
 0x207   : >> { %v2294_v63 = vpop.eup %2293 }
 0x208   : >> { %v2296_v38 = vpop.eup %2295  ;;  %1449 = vst [vmem:[%s3652_s30 + $0x10] sm:$0xff] %v1438_v13 }
 0x209   : >> { %v2298_v54 = vpop.eup %2297 }
 0x20a   : >> { %v2300_v56 = vpop.eup %2299  ;;  %v1439_v12 = vmul.f32 %v2298_v54, %v2292_v2   ;;  %v3956_v2 = vmov %v3952_v51 }
 0x20b   : >> { %v2302_v36 = vpop.eup %2301  ;;  %v1440_v11 = vmul.f32 %v2300_v56, %v2294_v63  }
 0x20c   : >> { %v2304_v30 = vpop.eup %2303  ;;  %1450 = vst [vmem:[%s3652_s30 + $0x18] sm:$0xff] %v1439_v12  ;;  %242 = sbr.rel (!%p3664_p4) target bundleno = 18 (0x12), region = 87 }
 0x20d   : >> { %v2306_v57 = vpop.eup %2305  ;;  %1451 = vst [vmem:[%s3652_s30 + $0x20] sm:$0xff] %v1440_v11 }
 0x20e   : >> { %v2308_v41 = vpop.eup %2307  ;;  %v1441_v10 = vmul.f32 %v2306_v57, %v2296_v38  }
 0x20f   : >> { %v2310_v23 = vpop.eup %2309  ;;  %v1442_v9 = vmul.f32 %v2308_v41, %v2302_v36  }
 0x210   : >> { %1452 = vst [vmem:[%s3652_s30 + $0x28] sm:$0xff] %v1441_v10  ;;  %v1443_v8 = vmul.f32 %v2310_v23, %v2304_v30  }
 0x211   : >> { %1453 = vst [vmem:[%s3652_s30 + $0x30] sm:$0xff] %v1442_v9 }
 0x212   : >> { %1454 = vst [vmem:[%s3652_s30 + $0x38] sm:$0xff] %v1443_v8 }
 0x213 PF: > { %s16_s18 = sadd.s32 1, %s2385_s18  }
 0x214   : > { %p13_p5 = scmp.ge.s32.totalorder %s16_s18, 4  }
 0x216   :  { %15 = sbr.rel (!%p13_p5) target bundleno = 1 (0x1), region = 98 }

</bundles_post_ra>
